<compile_context>
chip_gen: v5e
topology: v5e:2x2
jax: 0.10.0
libtpu: 0.0.40
codegen_flags: <defaults>
</compile_context>

<pallas_src>
import jax
import jax.numpy as jnp
from jax.experimental import pallas as pl
from jax.experimental.pallas import tpu as pltpu

BN_EPS = 1e-5
MATMUL_DTYPE = jnp.bfloat16   # MXU operand dtype; accumulation/epilogue stay f32


# --------------------------------------------------------------------------
# Fused kernel: conv1+BN+ReLU -> conv2+BN+ReLU -> partial 2x maxpool
# --------------------------------------------------------------------------
def _fused_upsample_kernel(x_ref, w1_ref, b1_ref, w2_ref, b2_ref,
                           conn_ref, pp_ref, xpad_ref, hpad_ref):
    # x_ref   : (1, D, H, W*Cin)            bf16, one batch element, lane-folded
    # w1_ref  : (9, W*Cin,  W*Cout)         bf16, W-banded conv1 weights (BN folded)
    # b1_ref  : (1, W*Cout)                 f32
    # w2_ref  : (9, W*Cout, W*Cout)         bf16
    # b2_ref  : (1, W*Cout)                 f32
    # conn_ref: (1, D*H, W*Cout)            f32, connection output
    # pp_ref  : (1, (D//2)*(H//2), W*Cout)  f32, (d,h)-pooled partial output
    # xpad_ref: (D+2, H+2, W*Cin)           f32 scratch (zero D/H halo)
    # hpad_ref: (D+2, H+2, W*Cout)          f32 scratch (zero D/H halo)
    D = x_ref.shape[1]
    H = x_ref.shape[2]
    KC1 = x_ref.shape[3]           # W*Cin
    WC = w1_ref.shape[2]           # W*Cout

    def conv_bn_relu(pad_ref, w_ref, b_ref, k_lanes):
        # 9 MXU dots: (D*H, k_lanes) x (k_lanes, W*Cout), f32 accumulate.
        acc = jnp.zeros((D * H, WC), jnp.float32)
        for kd in range(3):
            for kh in range(3):
                patch = pad_ref[pl.ds(kd, D), pl.ds(kh, H), :]
                patch = patch.reshape(D * H, k_lanes).astype(MATMUL_DTYPE)
                acc = acc + jnp.dot(patch, w_ref[kd * 3 + kh],
                                    preferred_element_type=jnp.float32)
        return jnp.maximum(acc + b_ref[...], 0.0)          # (D*H, W*Cout) f32

    # ---- build zero-padded conv1 input in VMEM (halo handled in-kernel) ----
    xpad_ref[...] = jnp.zeros(xpad_ref.shape, xpad_ref.dtype)
    xpad_ref[pl.ds(1, D), pl.ds(1, H), :] = x_ref[0].astype(jnp.float32)

    # ---- conv1 + BN + ReLU; intermediate stays in VMEM (never hits HBM) ----
    h = conv_bn_relu(xpad_ref, w1_ref, b1_ref, KC1)
    hpad_ref[...] = jnp.zeros(hpad_ref.shape, hpad_ref.dtype)
    hpad_ref[pl.ds(1, D), pl.ds(1, H), :] = h.reshape(D, H, WC)

    # ---- conv2 + BN + ReLU -> connection output (lane-dense 128-wide store) -
    conn = conv_bn_relu(hpad_ref, w2_ref, b2_ref, WC)
    conn_ref[...] = conn.reshape(conn_ref.shape).astype(conn_ref.dtype)

    # ---- fused partial 2x2x2 maxpool: depth pairs then H pairs ----
    a = jnp.max(conn.reshape(D // 2, 2, H, WC), axis=1)       # (D/2, H,   WC)
    a = jnp.max(a.reshape(D // 2, H // 2, 2, WC), axis=2)     # (D/2, H/2, WC)
    pp_ref[...] = a.reshape(pp_ref.shape).astype(pp_ref.dtype)


def fused_upsample_call(x_lane, w1b, b1, w2b, b2, D, H):
    """x_lane: (N, D, H, W*Cin) bf16. Returns (conn, partial_pool) in f32."""
    N = x_lane.shape[0]
    KC1 = x_lane.shape[-1]
    WC = w1b.shape[-1]
    assert D % 2 == 0 and H % 2 == 0

    conn, pp = pl.pallas_call(
        _fused_upsample_kernel,
        out_shape=(
            jax.ShapeDtypeStruct((N, D * H, WC), jnp.float32),
            jax.ShapeDtypeStruct((N, (D // 2) * (H // 2), WC), jnp.float32),
        ),
        grid_spec=pltpu.PrefetchScalarGridSpec(
            num_scalar_prefetch=0,
            grid=(N,),                                   # 2 blocks -> 2 v7x TCs
            in_specs=[
                pl.BlockSpec((1, D, H, KC1), lambda n: (n, 0, 0, 0)),
                pl.BlockSpec((9, KC1, WC), lambda n: (0, 0, 0)),
                pl.BlockSpec((1, WC), lambda n: (0, 0)),
                pl.BlockSpec((9, WC, WC), lambda n: (0, 0, 0)),
                pl.BlockSpec((1, WC), lambda n: (0, 0)),
            ],
            out_specs=(
                pl.BlockSpec((1, D * H, WC), lambda n: (n, 0, 0)),
                pl.BlockSpec((1, (D // 2) * (H // 2), WC), lambda n: (n, 0, 0)),
            ),
            scratch_shapes=[
                pltpu.VMEM((D + 2, H + 2, KC1), jnp.float32),
                pltpu.VMEM((D + 2, H + 2, WC), jnp.float32),
            ],
        ),
        compiler_params=pltpu.CompilerParams(
            dimension_semantics=("parallel",)),
    )(x_lane, w1b, b1, w2b, b2)
    return conn, pp


# --------------------------------------------------------------------------
# Parameter setup (deterministic, synthetic) + BN folding into banded weights
# --------------------------------------------------------------------------
def init_raw_params(key, cin, cout):
    ks = jax.random.split(key, 12)
    return {
        "w1": jax.random.normal(ks[0], (cout, cin, 3, 3, 3), jnp.float32) * 0.1,
        "b1": jax.random.normal(ks[1], (cout,), jnp.float32) * 0.05,
        "g1": jax.random.uniform(ks[2], (cout,), jnp.float32, 0.5, 1.5),
        "be1": jax.random.normal(ks[3], (cout,), jnp.float32) * 0.05,
        "m1": jax.random.normal(ks[4], (cout,), jnp.float32) * 0.05,
        "v1": jax.random.uniform(ks[5], (cout,), jnp.float32, 0.5, 1.5),
        "w2": jax.random.normal(ks[6], (cout, cout, 3, 3, 3), jnp.float32) * 0.1,
        "b2": jax.random.normal(ks[7], (cout,), jnp.float32) * 0.05,
        "g2": jax.random.uniform(ks[8], (cout,), jnp.float32, 0.5, 1.5),
        "be2": jax.random.normal(ks[9], (cout,), jnp.float32) * 0.05,
        "m2": jax.random.normal(ks[10], (cout,), jnp.float32) * 0.05,
        "v2": jax.random.uniform(ks[11], (cout,), jnp.float32, 0.5, 1.5),
    }


def _fold_conv_bn(w, b, gamma, beta, mean, var, W):
    """Fold inference BN into the conv and build the W-banded weight.

    The W-direction zero padding is folded into the band (rows where the tap
    falls outside [0, W) are simply absent), so the kernel-side input lane
    dimension is exactly W*Cin — no wrapper-side padding needed.
    """
    cout, cin = w.shape[0], w.shape[1]
    scale = gamma / jnp.sqrt(var + BN_EPS)                    # (Cout,)
    bias = scale * (b - mean) + beta                          # (Cout,)
    ws = w * scale[:, None, None, None, None]                 # fold BN scale
    wt = jnp.transpose(ws, (2, 3, 4, 1, 0))                   # (kd,kh,kw,Cin,Cout)

    # banded: WB[kd,kh][wi*Cin + ci, wo*Cout + co] = wt[kd,kh,kw,ci,co]
    # with wi = wo + kw - 1, only where 0 <= wi < W (pad folded away).
    wb = jnp.zeros((3, 3, W * cin, W * cout), jnp.float32)
    for kw in range(3):
        for wo in range(W):
            wi = wo + kw - 1
            if 0 <= wi < W:
                wb = wb.at[:, :,
                           wi * cin:(wi + 1) * cin,
                           wo * cout:(wo + 1) * cout].set(wt[:, :, kw])
    wb = wb.reshape(9, W * cin, W * cout).astype(MATMUL_DTYPE)
    bias_tiled = jnp.tile(bias, (W,)).reshape(1, W * cout).astype(jnp.float32)
    return wb, bias_tiled


def fold_params(raw, W):
    w1, b1 = _fold_conv_bn(raw["w1"], raw["b1"], raw["g1"], raw["be1"],
                           raw["m1"], raw["v1"], W)
    w2, b2 = _fold_conv_bn(raw["w2"], raw["b2"], raw["g2"], raw["be2"],
                           raw["m2"], raw["v2"], W)
    return {"w1_banded": w1, "bias1": b1, "w2_banded": w2, "bias2": b2}


# --------------------------------------------------------------------------
# Forward pass (matches Upsample.forward): returns (pooled_out, connection)
# --------------------------------------------------------------------------
def upsample_forward(x_ncdhw, params):
    N, Cin, D, H, W = x_ncdhw.shape
    WC = params["w1_banded"].shape[-1]
    Cout = WC // W

    # NCDHW (PyTorch) -> NDHWC -> lane-fold (W, Cin) -> bf16, single HBM read.
    x = jnp.transpose(x_ncdhw, (0, 2, 3, 4, 1))
    x = x.reshape(N, D, H, W * Cin).astype(MATMUL_DTYPE)

    conn, pp = fused_upsample_call(
        x, params["w1_banded"], params["bias1"],
        params["w2_banded"], params["bias2"], D, H)

    connection = conn.reshape(N, D, H, W, Cout)
    # finish the W-direction of the 2x2x2 maxpool on the 4x-smaller partial.
    pooled = pp.reshape(N, D // 2, H // 2, W // 2, 2, Cout).max(axis=4)

    out = jnp.transpose(pooled, (0, 4, 1, 2, 3))
    connection = jnp.transpose(connection, (0, 4, 1, 2, 3))
    return out, connection


# --------------------------------------------------------------------------
# Pure-JAX f32 reference (NCDHW) for validation
# --------------------------------------------------------------------------
def reference_forward(x, raw):
    def conv_bn_relu_ref(x, w, b, gamma, beta, mean, var):
        y = jax.lax.conv_general_dilated(
            x, w, window_strides=(1, 1, 1),
            padding=((1, 1), (1, 1), (1, 1)),
            dimension_numbers=("NCDHW", "OIDHW", "NCDHW"))

        def bc(v):
            return v.reshape(1, -1, 1, 1, 1)

        y = y + bc(b)
        y = bc(gamma) * (y - bc(mean)) / jnp.sqrt(bc(var) + BN_EPS) + bc(beta)
        return jnp.maximum(y, 0.0)

    h = conv_bn_relu_ref(x, raw["w1"], raw["b1"], raw["g1"], raw["be1"],
                         raw["m1"], raw["v1"])
    h = conv_bn_relu_ref(h, raw["w2"], raw["b2"], raw["g2"], raw["be2"],
                         raw["m2"], raw["v2"])
    connection = h
    out = jax.lax.reduce_window(h, -jnp.inf, jax.lax.max,
                                window_dimensions=(1, 1, 2, 2, 2),
                                window_strides=(1, 1, 2, 2, 2),
                                padding="VALID")
    return out, connection


if __name__ == "__main__":
    key = jax.random.PRNGKey(0)
    k_x, k_p = jax.random.split(key)

    N, CIN, COUT, D, H, W = 2, 4, 8, 16, 16, 16
    x = jax.random.normal(k_x, (N, CIN, D, H, W), jnp.float32)   # NCDHW

    raw = init_raw_params(k_p, CIN, COUT)
    params = fold_params(raw, W)

    fwd = jax.jit(upsample_forward)
    out, connection = fwd(x, params)
    out = jax.block_until_ready(out)
    connection = jax.block_until_ready(connection)

    assert out.shape == (N, COUT, D // 2, H // 2, W // 2), out.shape
    assert connection.shape == (N, COUT, D, H, W), connection.shape

    out_ref, conn_ref = reference_forward(x, raw)
    err_out_max = float(jnp.max(jnp.abs(out - out_ref)))
    err_conn_max = float(jnp.max(jnp.abs(connection - conn_ref)))
    err_conn_mean = float(jnp.mean(jnp.abs(connection - conn_ref)))

    # Tolerances account for bf16 MXU operands (f32 accumulation): two stacked
    # 3x3x3 convs accumulate ~100-200 bf16-quantized products on O(1-5)
    # activations, so worst-case deviations are ~1e-2 scale while the mean
    # error stays a few 1e-3. With MATMUL_DTYPE = f32 both errors are ~1e-5.
    if MATMUL_DTYPE == jnp.bfloat16:
        max_tol, mean_tol = 6e-2, 8e-3
    else:
        max_tol, mean_tol = 2e-3, 1e-4
    assert err_out_max < max_tol and err_conn_max < max_tol, \
        (err_out_max, err_conn_max)
    assert err_conn_mean < mean_tol, err_conn_mean

    print("KERNEL_OK")
</pallas_src>

<mosaic_0001>
module attributes {stable_mosaic.version = 11 : i64} {
  func.func @_fused_upsample_kernel(%arg0: i32, %arg1: memref<1x16x16x64xbf16, #tpu.memory_space<vmem>>, %arg2: memref<9x64x128xbf16, #tpu.memory_space<vmem>>, %arg3: memref<1x128xf32, #tpu.memory_space<vmem>>, %arg4: memref<9x128x128xbf16, #tpu.memory_space<vmem>>, %arg5: memref<1x128xf32, #tpu.memory_space<vmem>>, %arg6: memref<1x256x128xf32, #tpu.memory_space<vmem>>, %arg7: memref<1x64x128xf32, #tpu.memory_space<vmem>>, %arg8: memref<18x18x64xf32, #tpu.memory_space<vmem>>, %arg9: memref<18x18x128xf32, #tpu.memory_space<vmem>>) attributes {dimension_semantics = [#tpu.dimension_semantics<parallel>], iteration_bounds = array<i64: 2>, scalar_prefetch = 0 : i64, scratch_operands = 2 : i64, tpu.core_type = #tpu.core_type<tc>, window_params = [{transform_indices = @transform_0, window_bounds = array<i64: 1, 16, 16, 64>}, {pipeline_mode = #tpu.pipeline_mode<synchronous>, transform_indices = @transform_1, window_bounds = array<i64: 9, 64, 128>}, {pipeline_mode = #tpu.pipeline_mode<synchronous>, transform_indices = @transform_2, window_bounds = array<i64: 1, 128>}, {pipeline_mode = #tpu.pipeline_mode<synchronous>, transform_indices = @transform_3, window_bounds = array<i64: 9, 128, 128>}, {pipeline_mode = #tpu.pipeline_mode<synchronous>, transform_indices = @transform_4, window_bounds = array<i64: 1, 128>}, {transform_indices = @transform_5, window_bounds = array<i64: 1, 256, 128>}, {transform_indices = @transform_6, window_bounds = array<i64: 1, 64, 128>}]} {
    %cst = arith.constant 0.000000e+00 : f32
    %0 = vector.broadcast %cst : f32 to vector<18x18x64xf32>
    %c0 = arith.constant 0 : index
    %c0_0 = arith.constant 0 : index
    %c0_1 = arith.constant 0 : index
    %1 = vector.load %arg8[%c0, %c0_0, %c0_1] : memref<18x18x64xf32, #tpu.memory_space<vmem>>, vector<18x18x64xf32>
    tpu.vector_store %arg8[%c0, %c0_0, %c0_1], %0 {strides = array<i32>} : memref<18x18x64xf32, #tpu.memory_space<vmem>>, vector<18x18x64xf32>,
    %c0_2 = arith.constant 0 : index
    %c0_3 = arith.constant 0 : index
    %c0_4 = arith.constant 0 : index
    %c0_5 = arith.constant 0 : index
    %2 = vector.load %arg1[%c0_2, %c0_3, %c0_4, %c0_5] : memref<1x16x16x64xbf16, #tpu.memory_space<vmem>>, vector<1x16x16x64xbf16>
    %3 = vector.shape_cast %2 : vector<1x16x16x64xbf16> to vector<16x16x64xbf16>
    %4 = arith.extf %3 : vector<16x16x64xbf16> to vector<16x16x64xf32>
    %c1 = arith.constant 1 : index
    %c1_6 = arith.constant 1 : index
    %c0_7 = arith.constant 0 : index
    %5 = vector.load %arg8[%c1, %c1_6, %c0_7] : memref<18x18x64xf32, #tpu.memory_space<vmem>>, vector<16x16x64xf32>
    tpu.vector_store %arg8[%c1, %c1_6, %c0_7], %4 {strides = array<i32>} : memref<18x18x64xf32, #tpu.memory_space<vmem>>, vector<16x16x64xf32>,
    %cst_8 = arith.constant 0.000000e+00 : f32
    %6 = vector.broadcast %cst_8 : f32 to vector<256x128xf32>
    %c0_9 = arith.constant 0 : index
    %c0_10 = arith.constant 0 : index
    %c0_11 = arith.constant 0 : index
    %7 = vector.load %arg8[%c0_9, %c0_10, %c0_11] : memref<18x18x64xf32, #tpu.memory_space<vmem>>, vector<16x16x64xf32>
    %8 = vector.shape_cast %7 : vector<16x16x64xf32> to vector<256x64xf32>
    %9 = arith.truncf %8 : vector<256x64xf32> to vector<256x64xbf16>
    %c0_12 = arith.constant 0 : index
    %c0_13 = arith.constant 0 : index
    %c0_14 = arith.constant 0 : index
    %10 = vector.load %arg2[%c0_12, %c0_13, %c0_14] : memref<9x64x128xbf16, #tpu.memory_space<vmem>>, vector<1x64x128xbf16>
    %11 = vector.shape_cast %10 : vector<1x64x128xbf16> to vector<64x128xbf16>
    %cst_15 = arith.constant dense<0.000000e+00> : vector<256x128xf32>
    %12 = tpu.matmul %9, %11, %cst_15 {dimension_numbers = #tpu.dot_dimension_numbers<[1], [0], [0], [1], [0, 0, 1, 1], [], []>} : vector<256x64xbf16>, vector<64x128xbf16>, vector<256x128xf32> -> vector<256x128xf32>
    %13 = arith.addf %6, %12 : vector<256x128xf32>
    %c0_16 = arith.constant 0 : index
    %c1_17 = arith.constant 1 : index
    %c0_18 = arith.constant 0 : index
    %14 = vector.load %arg8[%c0_16, %c1_17, %c0_18] : memref<18x18x64xf32, #tpu.memory_space<vmem>>, vector<16x16x64xf32>
    %15 = vector.shape_cast %14 : vector<16x16x64xf32> to vector<256x64xf32>
    %16 = arith.truncf %15 : vector<256x64xf32> to vector<256x64xbf16>
    %c1_19 = arith.constant 1 : index
    %c0_20 = arith.constant 0 : index
    %c0_21 = arith.constant 0 : index
    %17 = vector.load %arg2[%c1_19, %c0_20, %c0_21] : memref<9x64x128xbf16, #tpu.memory_space<vmem>>, vector<1x64x128xbf16>
    %18 = vector.shape_cast %17 : vector<1x64x128xbf16> to vector<64x128xbf16>
    %cst_22 = arith.constant dense<0.000000e+00> : vector<256x128xf32>
    %19 = tpu.matmul %16, %18, %cst_22 {dimension_numbers = #tpu.dot_dimension_numbers<[1], [0], [0], [1], [0, 0, 1, 1], [], []>} : vector<256x64xbf16>, vector<64x128xbf16>, vector<256x128xf32> -> vector<256x128xf32>
    %20 = arith.addf %13, %19 : vector<256x128xf32>
    %c0_23 = arith.constant 0 : index
    %c2 = arith.constant 2 : index
    %c0_24 = arith.constant 0 : index
    %21 = vector.load %arg8[%c0_23, %c2, %c0_24] : memref<18x18x64xf32, #tpu.memory_space<vmem>>, vector<16x16x64xf32>
    %22 = vector.shape_cast %21 : vector<16x16x64xf32> to vector<256x64xf32>
    %23 = arith.truncf %22 : vector<256x64xf32> to vector<256x64xbf16>
    %c2_25 = arith.constant 2 : index
    %c0_26 = arith.constant 0 : index
    %c0_27 = arith.constant 0 : index
    %24 = vector.load %arg2[%c2_25, %c0_26, %c0_27] : memref<9x64x128xbf16, #tpu.memory_space<vmem>>, vector<1x64x128xbf16>
    %25 = vector.shape_cast %24 : vector<1x64x128xbf16> to vector<64x128xbf16>
    %cst_28 = arith.constant dense<0.000000e+00> : vector<256x128xf32>
    %26 = tpu.matmul %23, %25, %cst_28 {dimension_numbers = #tpu.dot_dimension_numbers<[1], [0], [0], [1], [0, 0, 1, 1], [], []>} : vector<256x64xbf16>, vector<64x128xbf16>, vector<256x128xf32> -> vector<256x128xf32>
    %27 = arith.addf %20, %26 : vector<256x128xf32>
    %c1_29 = arith.constant 1 : index
    %c0_30 = arith.constant 0 : index
    %c0_31 = arith.constant 0 : index
    %28 = vector.load %arg8[%c1_29, %c0_30, %c0_31] : memref<18x18x64xf32, #tpu.memory_space<vmem>>, vector<16x16x64xf32>
    %29 = vector.shape_cast %28 : vector<16x16x64xf32> to vector<256x64xf32>
    %30 = arith.truncf %29 : vector<256x64xf32> to vector<256x64xbf16>
    %c3 = arith.constant 3 : index
    %c0_32 = arith.constant 0 : index
    %c0_33 = arith.constant 0 : index
    %31 = vector.load %arg2[%c3, %c0_32, %c0_33] : memref<9x64x128xbf16, #tpu.memory_space<vmem>>, vector<1x64x128xbf16>
    %32 = vector.shape_cast %31 : vector<1x64x128xbf16> to vector<64x128xbf16>
    %cst_34 = arith.constant dense<0.000000e+00> : vector<256x128xf32>
    %33 = tpu.matmul %30, %32, %cst_34 {dimension_numbers = #tpu.dot_dimension_numbers<[1], [0], [0], [1], [0, 0, 1, 1], [], []>} : vector<256x64xbf16>, vector<64x128xbf16>, vector<256x128xf32> -> vector<256x128xf32>
    %34 = arith.addf %27, %33 : vector<256x128xf32>
    %c1_35 = arith.constant 1 : index
    %c1_36 = arith.constant 1 : index
    %c0_37 = arith.constant 0 : index
    %35 = vector.load %arg8[%c1_35, %c1_36, %c0_37] : memref<18x18x64xf32, #tpu.memory_space<vmem>>, vector<16x16x64xf32>
    %36 = vector.shape_cast %35 : vector<16x16x64xf32> to vector<256x64xf32>
    %37 = arith.truncf %36 : vector<256x64xf32> to vector<256x64xbf16>
    %c4 = arith.constant 4 : index
    %c0_38 = arith.constant 0 : index
    %c0_39 = arith.constant 0 : index
    %38 = vector.load %arg2[%c4, %c0_38, %c0_39] : memref<9x64x128xbf16, #tpu.memory_space<vmem>>, vector<1x64x128xbf16>
    %39 = vector.shape_cast %38 : vector<1x64x128xbf16> to vector<64x128xbf16>
    %cst_40 = arith.constant dense<0.000000e+00> : vector<256x128xf32>
    %40 = tpu.matmul %37, %39, %cst_40 {dimension_numbers = #tpu.dot_dimension_numbers<[1], [0], [0], [1], [0, 0, 1, 1], [], []>} : vector<256x64xbf16>, vector<64x128xbf16>, vector<256x128xf32> -> vector<256x128xf32>
    %41 = arith.addf %34, %40 : vector<256x128xf32>
    %c1_41 = arith.constant 1 : index
    %c2_42 = arith.constant 2 : index
    %c0_43 = arith.constant 0 : index
    %42 = vector.load %arg8[%c1_41, %c2_42, %c0_43] : memref<18x18x64xf32, #tpu.memory_space<vmem>>, vector<16x16x64xf32>
    %43 = vector.shape_cast %42 : vector<16x16x64xf32> to vector<256x64xf32>
    %44 = arith.truncf %43 : vector<256x64xf32> to vector<256x64xbf16>
    %c5 = arith.constant 5 : index
    %c0_44 = arith.constant 0 : index
    %c0_45 = arith.constant 0 : index
    %45 = vector.load %arg2[%c5, %c0_44, %c0_45] : memref<9x64x128xbf16, #tpu.memory_space<vmem>>, vector<1x64x128xbf16>
    %46 = vector.shape_cast %45 : vector<1x64x128xbf16> to vector<64x128xbf16>
    %cst_46 = arith.constant dense<0.000000e+00> : vector<256x128xf32>
    %47 = tpu.matmul %44, %46, %cst_46 {dimension_numbers = #tpu.dot_dimension_numbers<[1], [0], [0], [1], [0, 0, 1, 1], [], []>} : vector<256x64xbf16>, vector<64x128xbf16>, vector<256x128xf32> -> vector<256x128xf32>
    %48 = arith.addf %41, %47 : vector<256x128xf32>
    %c2_47 = arith.constant 2 : index
    %c0_48 = arith.constant 0 : index
    %c0_49 = arith.constant 0 : index
    %49 = vector.load %arg8[%c2_47, %c0_48, %c0_49] : memref<18x18x64xf32, #tpu.memory_space<vmem>>, vector<16x16x64xf32>
    %50 = vector.shape_cast %49 : vector<16x16x64xf32> to vector<256x64xf32>
    %51 = arith.truncf %50 : vector<256x64xf32> to vector<256x64xbf16>
    %c6 = arith.constant 6 : index
    %c0_50 = arith.constant 0 : index
    %c0_51 = arith.constant 0 : index
    %52 = vector.load %arg2[%c6, %c0_50, %c0_51] : memref<9x64x128xbf16, #tpu.memory_space<vmem>>, vector<1x64x128xbf16>
    %53 = vector.shape_cast %52 : vector<1x64x128xbf16> to vector<64x128xbf16>
    %cst_52 = arith.constant dense<0.000000e+00> : vector<256x128xf32>
    %54 = tpu.matmul %51, %53, %cst_52 {dimension_numbers = #tpu.dot_dimension_numbers<[1], [0], [0], [1], [0, 0, 1, 1], [], []>} : vector<256x64xbf16>, vector<64x128xbf16>, vector<256x128xf32> -> vector<256x128xf32>
    %55 = arith.addf %48, %54 : vector<256x128xf32>
    %c2_53 = arith.constant 2 : index
    %c1_54 = arith.constant 1 : index
    %c0_55 = arith.constant 0 : index
    %56 = vector.load %arg8[%c2_53, %c1_54, %c0_55] : memref<18x18x64xf32, #tpu.memory_space<vmem>>, vector<16x16x64xf32>
    %57 = vector.shape_cast %56 : vector<16x16x64xf32> to vector<256x64xf32>
    %58 = arith.truncf %57 : vector<256x64xf32> to vector<256x64xbf16>
    %c7 = arith.constant 7 : index
    %c0_56 = arith.constant 0 : index
    %c0_57 = arith.constant 0 : index
    %59 = vector.load %arg2[%c7, %c0_56, %c0_57] : memref<9x64x128xbf16, #tpu.memory_space<vmem>>, vector<1x64x128xbf16>
    %60 = vector.shape_cast %59 : vector<1x64x128xbf16> to vector<64x128xbf16>
    %cst_58 = arith.constant dense<0.000000e+00> : vector<256x128xf32>
    %61 = tpu.matmul %58, %60, %cst_58 {dimension_numbers = #tpu.dot_dimension_numbers<[1], [0], [0], [1], [0, 0, 1, 1], [], []>} : vector<256x64xbf16>, vector<64x128xbf16>, vector<256x128xf32> -> vector<256x128xf32>
    %62 = arith.addf %55, %61 : vector<256x128xf32>
    %c2_59 = arith.constant 2 : index
    %c2_60 = arith.constant 2 : index
    %c0_61 = arith.constant 0 : index
    %63 = vector.load %arg8[%c2_59, %c2_60, %c0_61] : memref<18x18x64xf32, #tpu.memory_space<vmem>>, vector<16x16x64xf32>
    %64 = vector.shape_cast %63 : vector<16x16x64xf32> to vector<256x64xf32>
    %65 = arith.truncf %64 : vector<256x64xf32> to vector<256x64xbf16>
    %c8 = arith.constant 8 : index
    %c0_62 = arith.constant 0 : index
    %c0_63 = arith.constant 0 : index
    %66 = vector.load %arg2[%c8, %c0_62, %c0_63] : memref<9x64x128xbf16, #tpu.memory_space<vmem>>, vector<1x64x128xbf16>
    %67 = vector.shape_cast %66 : vector<1x64x128xbf16> to vector<64x128xbf16>
    %cst_64 = arith.constant dense<0.000000e+00> : vector<256x128xf32>
    %68 = tpu.matmul %65, %67, %cst_64 {dimension_numbers = #tpu.dot_dimension_numbers<[1], [0], [0], [1], [0, 0, 1, 1], [], []>} : vector<256x64xbf16>, vector<64x128xbf16>, vector<256x128xf32> -> vector<256x128xf32>
    %69 = arith.addf %62, %68 : vector<256x128xf32>
    %c0_65 = arith.constant 0 : index
    %c0_66 = arith.constant 0 : index
    %70 = vector.load %arg3[%c0_65, %c0_66] : memref<1x128xf32, #tpu.memory_space<vmem>>, vector<1x128xf32>
    %71 = vector.broadcast %70 : vector<1x128xf32> to vector<256x128xf32>
    %72 = arith.addf %69, %71 : vector<256x128xf32>
    %cst_67 = arith.constant 0.000000e+00 : f32
    %73 = vector.broadcast %cst_67 : f32 to vector<256x128xf32>
    %74 = arith.maximumf %72, %73 : vector<256x128xf32>
    %cst_68 = arith.constant 0.000000e+00 : f32
    %75 = vector.broadcast %cst_68 : f32 to vector<18x18x128xf32>
    %c0_69 = arith.constant 0 : index
    %c0_70 = arith.constant 0 : index
    %c0_71 = arith.constant 0 : index
    %76 = vector.load %arg9[%c0_69, %c0_70, %c0_71] : memref<18x18x128xf32, #tpu.memory_space<vmem>>, vector<18x18x128xf32>
    tpu.vector_store %arg9[%c0_69, %c0_70, %c0_71], %75 {strides = array<i32>} : memref<18x18x128xf32, #tpu.memory_space<vmem>>, vector<18x18x128xf32>,
    %77 = vector.shape_cast %74 : vector<256x128xf32> to vector<16x16x128xf32>
    %c1_72 = arith.constant 1 : index
    %c1_73 = arith.constant 1 : index
    %c0_74 = arith.constant 0 : index
    %78 = vector.load %arg9[%c1_72, %c1_73, %c0_74] : memref<18x18x128xf32, #tpu.memory_space<vmem>>, vector<16x16x128xf32>
    tpu.vector_store %arg9[%c1_72, %c1_73, %c0_74], %77 {strides = array<i32>} : memref<18x18x128xf32, #tpu.memory_space<vmem>>, vector<16x16x128xf32>,
    %cst_75 = arith.constant 0.000000e+00 : f32
    %79 = vector.broadcast %cst_75 : f32 to vector<256x128xf32>
    %c0_76 = arith.constant 0 : index
    %c0_77 = arith.constant 0 : index
    %c0_78 = arith.constant 0 : index
    %80 = vector.load %arg9[%c0_76, %c0_77, %c0_78] : memref<18x18x128xf32, #tpu.memory_space<vmem>>, vector<16x16x128xf32>
    %81 = vector.shape_cast %80 : vector<16x16x128xf32> to vector<256x128xf32>
    %82 = arith.truncf %81 : vector<256x128xf32> to vector<256x128xbf16>
    %c0_79 = arith.constant 0 : index
    %c0_80 = arith.constant 0 : index
    %c0_81 = arith.constant 0 : index
    %83 = vector.load %arg4[%c0_79, %c0_80, %c0_81] : memref<9x128x128xbf16, #tpu.memory_space<vmem>>, vector<1x128x128xbf16>
    %84 = vector.shape_cast %83 : vector<1x128x128xbf16> to vector<128x128xbf16>
    %cst_82 = arith.constant dense<0.000000e+00> : vector<256x128xf32>
    %85 = tpu.matmul %82, %84, %cst_82 {dimension_numbers = #tpu.dot_dimension_numbers<[1], [0], [0], [1], [0, 0, 1, 1], [], []>} : vector<256x128xbf16>, vector<128x128xbf16>, vector<256x128xf32> -> vector<256x128xf32>
    %86 = arith.addf %79, %85 : vector<256x128xf32>
    %c0_83 = arith.constant 0 : index
    %c1_84 = arith.constant 1 : index
    %c0_85 = arith.constant 0 : index
    %87 = vector.load %arg9[%c0_83, %c1_84, %c0_85] : memref<18x18x128xf32, #tpu.memory_space<vmem>>, vector<16x16x128xf32>
    %88 = vector.shape_cast %87 : vector<16x16x128xf32> to vector<256x128xf32>
    %89 = arith.truncf %88 : vector<256x128xf32> to vector<256x128xbf16>
    %c1_86 = arith.constant 1 : index
    %c0_87 = arith.constant 0 : index
    %c0_88 = arith.constant 0 : index
    %90 = vector.load %arg4[%c1_86, %c0_87, %c0_88] : memref<9x128x128xbf16, #tpu.memory_space<vmem>>, vector<1x128x128xbf16>
    %91 = vector.shape_cast %90 : vector<1x128x128xbf16> to vector<128x128xbf16>
    %cst_89 = arith.constant dense<0.000000e+00> : vector<256x128xf32>
    %92 = tpu.matmul %89, %91, %cst_89 {dimension_numbers = #tpu.dot_dimension_numbers<[1], [0], [0], [1], [0, 0, 1, 1], [], []>} : vector<256x128xbf16>, vector<128x128xbf16>, vector<256x128xf32> -> vector<256x128xf32>
    %93 = arith.addf %86, %92 : vector<256x128xf32>
    %c0_90 = arith.constant 0 : index
    %c2_91 = arith.constant 2 : index
    %c0_92 = arith.constant 0 : index
    %94 = vector.load %arg9[%c0_90, %c2_91, %c0_92] : memref<18x18x128xf32, #tpu.memory_space<vmem>>, vector<16x16x128xf32>
    %95 = vector.shape_cast %94 : vector<16x16x128xf32> to vector<256x128xf32>
    %96 = arith.truncf %95 : vector<256x128xf32> to vector<256x128xbf16>
    %c2_93 = arith.constant 2 : index
    %c0_94 = arith.constant 0 : index
    %c0_95 = arith.constant 0 : index
    %97 = vector.load %arg4[%c2_93, %c0_94, %c0_95] : memref<9x128x128xbf16, #tpu.memory_space<vmem>>, vector<1x128x128xbf16>
    %98 = vector.shape_cast %97 : vector<1x128x128xbf16> to vector<128x128xbf16>
    %cst_96 = arith.constant dense<0.000000e+00> : vector<256x128xf32>
    %99 = tpu.matmul %96, %98, %cst_96 {dimension_numbers = #tpu.dot_dimension_numbers<[1], [0], [0], [1], [0, 0, 1, 1], [], []>} : vector<256x128xbf16>, vector<128x128xbf16>, vector<256x128xf32> -> vector<256x128xf32>
    %100 = arith.addf %93, %99 : vector<256x128xf32>
    %c1_97 = arith.constant 1 : index
    %c0_98 = arith.constant 0 : index
    %c0_99 = arith.constant 0 : index
    %101 = vector.load %arg9[%c1_97, %c0_98, %c0_99] : memref<18x18x128xf32, #tpu.memory_space<vmem>>, vector<16x16x128xf32>
    %102 = vector.shape_cast %101 : vector<16x16x128xf32> to vector<256x128xf32>
    %103 = arith.truncf %102 : vector<256x128xf32> to vector<256x128xbf16>
    %c3_100 = arith.constant 3 : index
    %c0_101 = arith.constant 0 : index
    %c0_102 = arith.constant 0 : index
    %104 = vector.load %arg4[%c3_100, %c0_101, %c0_102] : memref<9x128x128xbf16, #tpu.memory_space<vmem>>, vector<1x128x128xbf16>
    %105 = vector.shape_cast %104 : vector<1x128x128xbf16> to vector<128x128xbf16>
    %cst_103 = arith.constant dense<0.000000e+00> : vector<256x128xf32>
    %106 = tpu.matmul %103, %105, %cst_103 {dimension_numbers = #tpu.dot_dimension_numbers<[1], [0], [0], [1], [0, 0, 1, 1], [], []>} : vector<256x128xbf16>, vector<128x128xbf16>, vector<256x128xf32> -> vector<256x128xf32>
    %107 = arith.addf %100, %106 : vector<256x128xf32>
    %c1_104 = arith.constant 1 : index
    %c1_105 = arith.constant 1 : index
    %c0_106 = arith.constant 0 : index
    %108 = vector.load %arg9[%c1_104, %c1_105, %c0_106] : memref<18x18x128xf32, #tpu.memory_space<vmem>>, vector<16x16x128xf32>
    %109 = vector.shape_cast %108 : vector<16x16x128xf32> to vector<256x128xf32>
    %110 = arith.truncf %109 : vector<256x128xf32> to vector<256x128xbf16>
    %c4_107 = arith.constant 4 : index
    %c0_108 = arith.constant 0 : index
    %c0_109 = arith.constant 0 : index
    %111 = vector.load %arg4[%c4_107, %c0_108, %c0_109] : memref<9x128x128xbf16, #tpu.memory_space<vmem>>, vector<1x128x128xbf16>
    %112 = vector.shape_cast %111 : vector<1x128x128xbf16> to vector<128x128xbf16>
    %cst_110 = arith.constant dense<0.000000e+00> : vector<256x128xf32>
    %113 = tpu.matmul %110, %112, %cst_110 {dimension_numbers = #tpu.dot_dimension_numbers<[1], [0], [0], [1], [0, 0, 1, 1], [], []>} : vector<256x128xbf16>, vector<128x128xbf16>, vector<256x128xf32> -> vector<256x128xf32>
    %114 = arith.addf %107, %113 : vector<256x128xf32>
    %c1_111 = arith.constant 1 : index
    %c2_112 = arith.constant 2 : index
    %c0_113 = arith.constant 0 : index
    %115 = vector.load %arg9[%c1_111, %c2_112, %c0_113] : memref<18x18x128xf32, #tpu.memory_space<vmem>>, vector<16x16x128xf32>
    %116 = vector.shape_cast %115 : vector<16x16x128xf32> to vector<256x128xf32>
    %117 = arith.truncf %116 : vector<256x128xf32> to vector<256x128xbf16>
    %c5_114 = arith.constant 5 : index
    %c0_115 = arith.constant 0 : index
    %c0_116 = arith.constant 0 : index
    %118 = vector.load %arg4[%c5_114, %c0_115, %c0_116] : memref<9x128x128xbf16, #tpu.memory_space<vmem>>, vector<1x128x128xbf16>
    %119 = vector.shape_cast %118 : vector<1x128x128xbf16> to vector<128x128xbf16>
    %cst_117 = arith.constant dense<0.000000e+00> : vector<256x128xf32>
    %120 = tpu.matmul %117, %119, %cst_117 {dimension_numbers = #tpu.dot_dimension_numbers<[1], [0], [0], [1], [0, 0, 1, 1], [], []>} : vector<256x128xbf16>, vector<128x128xbf16>, vector<256x128xf32> -> vector<256x128xf32>
    %121 = arith.addf %114, %120 : vector<256x128xf32>
    %c2_118 = arith.constant 2 : index
    %c0_119 = arith.constant 0 : index
    %c0_120 = arith.constant 0 : index
    %122 = vector.load %arg9[%c2_118, %c0_119, %c0_120] : memref<18x18x128xf32, #tpu.memory_space<vmem>>, vector<16x16x128xf32>
    %123 = vector.shape_cast %122 : vector<16x16x128xf32> to vector<256x128xf32>
    %124 = arith.truncf %123 : vector<256x128xf32> to vector<256x128xbf16>
    %c6_121 = arith.constant 6 : index
    %c0_122 = arith.constant 0 : index
    %c0_123 = arith.constant 0 : index
    %125 = vector.load %arg4[%c6_121, %c0_122, %c0_123] : memref<9x128x128xbf16, #tpu.memory_space<vmem>>, vector<1x128x128xbf16>
    %126 = vector.shape_cast %125 : vector<1x128x128xbf16> to vector<128x128xbf16>
    %cst_124 = arith.constant dense<0.000000e+00> : vector<256x128xf32>
    %127 = tpu.matmul %124, %126, %cst_124 {dimension_numbers = #tpu.dot_dimension_numbers<[1], [0], [0], [1], [0, 0, 1, 1], [], []>} : vector<256x128xbf16>, vector<128x128xbf16>, vector<256x128xf32> -> vector<256x128xf32>
    %128 = arith.addf %121, %127 : vector<256x128xf32>
    %c2_125 = arith.constant 2 : index
    %c1_126 = arith.constant 1 : index
    %c0_127 = arith.constant 0 : index
    %129 = vector.load %arg9[%c2_125, %c1_126, %c0_127] : memref<18x18x128xf32, #tpu.memory_space<vmem>>, vector<16x16x128xf32>
    %130 = vector.shape_cast %129 : vector<16x16x128xf32> to vector<256x128xf32>
    %131 = arith.truncf %130 : vector<256x128xf32> to vector<256x128xbf16>
    %c7_128 = arith.constant 7 : index
    %c0_129 = arith.constant 0 : index
    %c0_130 = arith.constant 0 : index
    %132 = vector.load %arg4[%c7_128, %c0_129, %c0_130] : memref<9x128x128xbf16, #tpu.memory_space<vmem>>, vector<1x128x128xbf16>
    %133 = vector.shape_cast %132 : vector<1x128x128xbf16> to vector<128x128xbf16>
    %cst_131 = arith.constant dense<0.000000e+00> : vector<256x128xf32>
    %134 = tpu.matmul %131, %133, %cst_131 {dimension_numbers = #tpu.dot_dimension_numbers<[1], [0], [0], [1], [0, 0, 1, 1], [], []>} : vector<256x128xbf16>, vector<128x128xbf16>, vector<256x128xf32> -> vector<256x128xf32>
    %135 = arith.addf %128, %134 : vector<256x128xf32>
    %c2_132 = arith.constant 2 : index
    %c2_133 = arith.constant 2 : index
    %c0_134 = arith.constant 0 : index
    %136 = vector.load %arg9[%c2_132, %c2_133, %c0_134] : memref<18x18x128xf32, #tpu.memory_space<vmem>>, vector<16x16x128xf32>
    %137 = vector.shape_cast %136 : vector<16x16x128xf32> to vector<256x128xf32>
    %138 = arith.truncf %137 : vector<256x128xf32> to vector<256x128xbf16>
    %c8_135 = arith.constant 8 : index
    %c0_136 = arith.constant 0 : index
    %c0_137 = arith.constant 0 : index
    %139 = vector.load %arg4[%c8_135, %c0_136, %c0_137] : memref<9x128x128xbf16, #tpu.memory_space<vmem>>, vector<1x128x128xbf16>
    %140 = vector.shape_cast %139 : vector<1x128x128xbf16> to vector<128x128xbf16>
    %cst_138 = arith.constant dense<0.000000e+00> : vector<256x128xf32>
    %141 = tpu.matmul %138, %140, %cst_138 {dimension_numbers = #tpu.dot_dimension_numbers<[1], [0], [0], [1], [0, 0, 1, 1], [], []>} : vector<256x128xbf16>, vector<128x128xbf16>, vector<256x128xf32> -> vector<256x128xf32>
    %142 = arith.addf %135, %141 : vector<256x128xf32>
    %c0_139 = arith.constant 0 : index
    %c0_140 = arith.constant 0 : index
    %143 = vector.load %arg5[%c0_139, %c0_140] : memref<1x128xf32, #tpu.memory_space<vmem>>, vector<1x128xf32>
    %144 = vector.broadcast %143 : vector<1x128xf32> to vector<256x128xf32>
    %145 = arith.addf %142, %144 : vector<256x128xf32>
    %cst_141 = arith.constant 0.000000e+00 : f32
    %146 = vector.broadcast %cst_141 : f32 to vector<256x128xf32>
    %147 = arith.maximumf %145, %146 : vector<256x128xf32>
    %148 = vector.shape_cast %147 : vector<256x128xf32> to vector<1x256x128xf32>
    %c0_142 = arith.constant 0 : index
    %c0_143 = arith.constant 0 : index
    %c0_144 = arith.constant 0 : index
    %149 = vector.load %arg6[%c0_142, %c0_143, %c0_144] : memref<1x256x128xf32, #tpu.memory_space<vmem>>, vector<1x256x128xf32>
    tpu.vector_store %arg6[%c0_142, %c0_143, %c0_144], %148 {strides = array<i32>} : memref<1x256x128xf32, #tpu.memory_space<vmem>>, vector<1x256x128xf32>,
    %150 = vector.shape_cast %147 : vector<256x128xf32> to vector<8x2x16x128xf32>
    %cst_145 = arith.constant dense<0xFF800000> : vector<8x16x128xf32>
    %151 = vector.multi_reduction <maximumf>, %150, %cst_145 [1] : vector<8x2x16x128xf32> to vector<8x16x128xf32>
    %152 = vector.shape_cast %151 : vector<8x16x128xf32> to vector<8x8x2x128xf32>
    %cst_146 = arith.constant dense<0xFF800000> : vector<8x8x128xf32>
    %153 = vector.multi_reduction <maximumf>, %152, %cst_146 [2] : vector<8x8x2x128xf32> to vector<8x8x128xf32>
    %154 = vector.shape_cast %153 : vector<8x8x128xf32> to vector<1x64x128xf32>
    %c0_147 = arith.constant 0 : index
    %c0_148 = arith.constant 0 : index
    %c0_149 = arith.constant 0 : index
    %155 = vector.load %arg7[%c0_147, %c0_148, %c0_149] : memref<1x64x128xf32, #tpu.memory_space<vmem>>, vector<1x64x128xf32>
    tpu.vector_store %arg7[%c0_147, %c0_148, %c0_149], %154 {strides = array<i32>} : memref<1x64x128xf32, #tpu.memory_space<vmem>>, vector<1x64x128xf32>,
    return
  }
  func.func @transform_0(%arg0: i32) -> (i32, i32, i32, i32) {
    %c0_i32 = arith.constant 0 : i32
    %c0_i32_0 = arith.constant 0 : i32
    %c0_i32_1 = arith.constant 0 : i32
    %c0_i32_2 = arith.constant 0 : i32
    return %arg0, %c0_i32, %c0_i32_0, %c0_i32_1 : i32, i32, i32, i32
  }
  func.func @transform_1(%arg0: i32) -> (i32, i32, i32) {
    %c0_i32 = arith.constant 0 : i32
    %c0_i32_0 = arith.constant 0 : i32
    %c0_i32_1 = arith.constant 0 : i32
    %c0_i32_2 = arith.constant 0 : i32
    return %c0_i32, %c0_i32_0, %c0_i32_1 : i32, i32, i32
  }
  func.func @transform_2(%arg0: i32) -> (i32, i32) {
    %c0_i32 = arith.constant 0 : i32
    %c0_i32_0 = arith.constant 0 : i32
    %c0_i32_1 = arith.constant 0 : i32
    return %c0_i32, %c0_i32_0 : i32, i32
  }
  func.func @transform_3(%arg0: i32) -> (i32, i32, i32) {
    %c0_i32 = arith.constant 0 : i32
    %c0_i32_0 = arith.constant 0 : i32
    %c0_i32_1 = arith.constant 0 : i32
    %c0_i32_2 = arith.constant 0 : i32
    return %c0_i32, %c0_i32_0, %c0_i32_1 : i32, i32, i32
  }
  func.func @transform_4(%arg0: i32) -> (i32, i32) {
    %c0_i32 = arith.constant 0 : i32
    %c0_i32_0 = arith.constant 0 : i32
    %c0_i32_1 = arith.constant 0 : i32
    return %c0_i32, %c0_i32_0 : i32, i32
  }
  func.func @transform_5(%arg0: i32) -> (i32, i32, i32) {
    %c0_i32 = arith.constant 0 : i32
    %c0_i32_0 = arith.constant 0 : i32
    %c0_i32_1 = arith.constant 0 : i32
    return %arg0, %c0_i32, %c0_i32_0 : i32, i32, i32
  }
  func.func @transform_6(%arg0: i32) -> (i32, i32, i32) {
    %c0_i32 = arith.constant 0 : i32
    %c0_i32_0 = arith.constant 0 : i32
    %c0_i32_1 = arith.constant 0 : i32
    return %arg0, %c0_i32, %c0_i32_0 : i32, i32, i32
  }
}

</mosaic_0001>

<bundles_post_ra>
// kernel: upsample_forward.1
= control target key start
LH: loop header
LB: loop body
LE: loop exit
PB: predicated region body
PF: predicated region fallthrough
CT: control target
= control target key end

     0   :  { %s6748_s21 = smov 0   ;;  %s8769_s0 = inlined_call_operand.vmem [shape: bf16[2,16,16,64], index: 0, kind: input, shape index: {}]   ;;  %s8770_s1 = inlined_call_operand.vmem [shape: bf16[9,64,128], index: 1, kind: input, shape index: {}]   ;;  %s8771_s2 = inlined_call_operand.vmem [shape: f32[1,128], index: 2, kind: input, shape index: {}]   ;;  %s8772_s3 = inlined_call_operand.vmem [shape: bf16[9,128,128], index: 3, kind: input, shape index: {}]   ;;  %s8773_s4 = inlined_call_operand.vmem [shape: f32[1,128], index: 4, kind: input, shape index: {}]   ;;  %s8774_s5 = inlined_call_operand.vmem [shape: f32[2,256,128], index: 5, kind: output, shape index: {0}]   ;;  %s8775_s6 = inlined_call_operand.vmem [shape: f32[2,64,128], index: 6, kind: output, shape index: {1}]  }
   0x1 LB: > { %s5710_s22 = sadd.s32 4294967295, %s6710_s21   ;;  %p5714_p0 = scmp.ge.s32.totalorder %s6710_s21, 1  ;;  %s6710_s21 = sphi %s6748_s21, %s17_s21  }
   0x2   : > { %p215_p1 = scmp.lt.s32.totalorder %s6710_s21, 3 }
   0x4   : > { %p216_p2 = pnand %p5714_p0, %p215_p1 }
   0x6   : > { %219 = sbr.rel (%p216_p2) target bundleno = 1566 (0x61e), region = 40 }
   0xb   : > { %v6501_v0 = vld [vmem:[%s8770_s1 + $0x38] sm:$0xff]  ;;  %vm266_vm0 = vcmask 523264   ;;  %vm269_vm1 = vcmask 517120   ;;  %v6712_v2 = vmov 0.0   ;;  %v6500_v3 = vld [vmem:[%s8770_s1 + $0x30] sm:$0xff]  ;;  %v6499_v5 = vld [vmem:[%s8770_s1 + $0x28] sm:$0xff] }
   0xc   : > { %v6497_v1 = vld [vmem:[%s8770_s1 + $0x18] sm:$0xff]  ;;  %267 = vst.msk [vmem:[#allocation2] sm:$0xff] %vm266_vm0, %v6712_v2  ;;  %608 = vmatpush.bf16.msra.mxu0 %v6501_v0  ;;  %6681 = vmatpush.bf16.msra.mxu2 %v6501_v0  ;;  %v6496_v4 = vld [vmem:[%s8770_s1 + $0x10] sm:$0xff]  ;;  %v6495_v6 = vld [vmem:[%s8770_s1 + $0x8] sm:$0xff]  ;;  %p250_p3 = scmp.lt.s32.totalorder %s5710_s22, 1  ;;  %vm5030_vm2 = vcmask 1041408  }
   0xd   : > { %268 = vst.msk [vmem:[#allocation2 + $0x8] sm:$0xff] %vm266_vm0, %v6712_v2  ;;  %6685 = vmatpush.bf16.msra.mxu3 %v6497_v1  ;;  %769 = vmatpush.bf16.msra.mxu1 %v6497_v1  ;;  %v6498_v7 = vld [vmem:[%s8770_s1 + $0x20] sm:$0xff]  ;;  %v6505_v14 = vld [vmem:[%s8770_s1 + $0x58] sm:$0xff]  ;;  %v6504_v45 = vld [vmem:[%s8770_s1 + $0x50] sm:$0xff]  ;;  %vm5543_vm3 = vcmask 1041409   ;;  %vm5545_vm4 = vcmask 1042434  }
   0xe   : > { %270 = vst.msk [vmem:[#allocation2 + $0x10] sm:$0x3] %vm269_vm1, %v6712_v2  ;;  %v6494_v10 = vld [vmem:[%s8770_s1] sm:$0xff]  ;;  %v6509_v16 = vld [vmem:[%s8770_s1 + $0x78] sm:$0xff]  ;;  %s8836_s22 = smov (!%p250_p3, %s5710_s22), 1  ;;  %v6508_v46 = vld [vmem:[%s8770_s1 + $0x70] sm:$0xff] }
   0xf   : > { %271 = vst.msk [vmem:[#allocation2 + $0x18] sm:$0xff] %vm266_vm0, %v6712_v2  ;;  %v6513_v17 = vld [vmem:[%s8770_s1 + $0x98] sm:$0xff]  ;;  %s6491_s23 = sshll.u32 %s8836_s22, 7  ;;  %v6512_v47 = vld [vmem:[%s8770_s1 + $0x90] sm:$0xff]  ;;  %s6492_s7 = sshll.u32 %s8836_s22, 8  ;;  %vm5547_vm5 = vcmask 1043459  }
  0x10   : > { %272 = vst.msk [vmem:[#allocation2 + $0x20] sm:$0xff] %vm266_vm0, %v6712_v2  ;;  %609 = vmatpush.bf16.msra.mxu0 %v6500_v3  ;;  %6682 = vmatpush.bf16.msra.mxu2 %v6500_v3  ;;  %s6954_s26 = scalar_lea.vmem %s8769_s0, %s6491_s23  ;;  %s8378_s10 = scalar_lea.vmem %s8774_s5, %s6492_s7  ;;  %vm5549_vm6 = vcmask 1044484   ;;  %vm5551_vm7 = vcmask 1045509   ;;  %vm5553_vm8 = vcmask 1046534   ;;  %vm5555_vm9 = vcmask 1047559  }
  0x11   : > { %273 = vst.msk [vmem:[#allocation2 + $0x28] sm:$0x3] %vm269_vm1, %v6712_v2  ;;  %6686 = vmatpush.bf16.msra.mxu3 %v6496_v4  ;;  %770 = vmatpush.bf16.msra.mxu1 %v6496_v4  ;;  %v6672_v18 = vld [vmem:[%s6954_s26 + $0x38] sm:$0xff]   ;;  %v6603_v19 = vld [vmem:[%s6954_s26] sm:$0xff]   ;;  %v6666_v25 = vld [vmem:[%s6954_s26 + $0x8] sm:$0xff]   ;;  %s6493_s11 = sshll.u32 %s8836_s22, 6 }
  0x12   : > { %274 = vst.msk [vmem:[#allocation2 + $0x30] sm:$0xff] %vm266_vm0, %v6712_v2  ;;  %v6632_v20 = vunpack.c.l.bf16 %v6672_v18  ;;  %v6633_v21 = vunpack.c.h.bf16 %v6672_v18  ;;  %v6673_v22 = vld [vmem:[%s6954_s26 + $0x40] sm:$0xff]   ;;  %v6604_v23 = vunpack.c.l.bf16 %v6603_v19  ;;  %v6605_v24 = vunpack.c.h.bf16 %v6603_v19  ;;  %v6674_v28 = vld [vmem:[%s6954_s26 + $0x48] sm:$0xff]   ;;  %v6667_v48 = vld [vmem:[%s6954_s26 + $0x10] sm:$0xff]   ;;  %s8441_s14 = scalar_lea.vmem %s8775_s6, %s6493_s11 }
  0x13   : > { %275 = vst.msk [vmem:[#allocation2 + $0x38] sm:$0xff] %vm266_vm0, %v6712_v2  ;;  %v419_v12 = vld [vmem:[#allocation2] sm:$0xff]  ;;  %v6636_v26 = vunpack.c.l.bf16 %v6673_v22  ;;  %v6637_v27 = vunpack.c.h.bf16 %v6673_v22  ;;  %v6608_v29 = vunpack.c.l.bf16 %v6666_v25  ;;  %v6609_v30 = vunpack.c.h.bf16 %v6666_v25  ;;  %v6675_v51 = vld [vmem:[%s6954_s26 + $0x50] sm:$0xff]   ;;  %v6511_v22 = vld [vmem:[%s8770_s1 + $0x88] sm:$0xff] }
  0x14   : > { %276 = vst.msk [vmem:[#allocation2 + $0x40] sm:$0x3] %vm269_vm1, %v6712_v2  ;;  %610 = vmatpush.bf16.msra.mxu0 %v6499_v5  ;;  %6683 = vmatpush.bf16.msra.mxu2 %v6499_v5  ;;  %v475_v8 = vld [vmem:[#allocation2 + $0x1] sm:$0xff]  ;;  %v6640_v31 = vunpack.c.l.bf16 %v6674_v28  ;;  %v6641_v32 = vunpack.c.h.bf16 %v6674_v28  ;;  %v6612_v49 = vunpack.c.l.bf16 %v6667_v48  ;;  %v6613_v50 = vunpack.c.h.bf16 %v6667_v48  ;;  %v6676_v5 = vld [vmem:[%s6954_s26 + $0x58] sm:$0xff]  }
  0x15   : > { %v476_v9 = vld [vmem:[#allocation2 + $0x9] sm:$0xff]  ;;  %277 = vst.msk [vmem:[#allocation2 + $0x48] sm:$0xff] %vm266_vm0, %v6712_v2  ;;  %6687 = vmatpush.bf16.msra.mxu3 %v6495_v6  ;;  %771 = vmatpush.bf16.msra.mxu1 %v6495_v6  ;;  %v6644_v52 = vunpack.c.l.bf16 %v6675_v51  ;;  %v6645_v53 = vunpack.c.h.bf16 %v6675_v51  ;;  %v6648_v6 = vunpack.c.l.bf16 %v6676_v5 }
  0x16   : > { %278 = vst.msk [vmem:[#allocation2 + $0x50] sm:$0xff] %vm266_vm0, %v6712_v2  ;;  %v507_v11 = vpack.c.bf16 %v476_v9, %v475_v8  ;;  %v420_v13 = vld [vmem:[#allocation2 + $0x8] sm:$0xff] }
  0x17   : > { %279 = vst.msk [vmem:[#allocation2 + $0x58] sm:$0x3] %vm269_vm1, %v6712_v2  ;;  %v451_v15 = vpack.c.bf16 %v420_v13, %v419_v12  ;;  %v6678_v48 = vld [vmem:[%s6954_s26 + $0x68] sm:$0xff]  }
  0x18   : > { %280 = vst.msk [vmem:[#allocation2 + $0x60] sm:$0xff] %vm266_vm0, %v6712_v2  ;;  %611 = vmatpush.bf16.msra.mxu0 %v6498_v7  ;;  %6684 = vmatpush.bf16.msra.mxu2 %v6498_v7  ;;  %v6649_v7 = vunpack.c.h.bf16 %v6676_v5  ;;  %v6510_v5 = vld [vmem:[%s8770_s1 + $0x80] sm:$0xff] }
  0x19   : > { %281 = vst.msk [vmem:[#allocation2 + $0x68] sm:$0xff] %vm266_vm0, %v6712_v2  ;;  %6688 = vmatpush.bf16.msra.mxu3 %v6494_v10  ;;  %772 = vmatpush.bf16.msra.mxu1 %v6494_v10 }
  0x1a   : > { %282 = vst.msk [vmem:[#allocation2 + $0x70] sm:$0x3] %vm269_vm1, %v6712_v2 }
  0x1b   : > { %283 = vst.msk [vmem:[#allocation2 + $0x78] sm:$0xff] %vm266_vm0, %v6712_v2  ;;  %5745 = vmatmul.msk.bf16.vlgmr.msra.gmra.mxu0 %vm266_vm0, %v507_v11 }
  0x1c   : > { %284 = vst.msk [vmem:[#allocation2 + $0x80] sm:$0xff] %vm266_vm0, %v6712_v2  ;;  %987 = vmatpush.bf16.msrb.mxu2 %v6505_v14  ;;  %5777 = vmatmul.msk.bf16.vlgmr.msra.gmra.mxu1 %vm266_vm0, %v451_v15 }
  0x1d   : > { %285 = vst.msk [vmem:[#allocation2 + $0x88] sm:$0x3] %vm269_vm1, %v6712_v2  ;;  %1237 = vmatpush.bf16.msrb.mxu3 %v6509_v16  ;;  %1487 = vmatpush.bf16.msrb.mxu0 %v6513_v17 }
  0x1e   : > { %286 = vst.msk [vmem:[#allocation2 + $0x90] sm:$0xff] %vm266_vm0, %v6712_v2 }
  0x1f   : > { %287 = vst.msk [vmem:[#allocation2 + $0x98] sm:$0xff] %vm266_vm0, %v6712_v2 }
  0x20   : > { %288 = vst.msk [vmem:[#allocation2 + $0xa0] sm:$0x3] %vm269_vm1, %v6712_v2  ;;  %988 = vmatpush.bf16.msrb.mxu2 %v6504_v45  ;;  %v6670_v45 = vld [vmem:[%s6954_s26 + $0x28] sm:$0xff]  }
  0x21   : > { %289 = vst.msk [vmem:[#allocation2 + $0xa8] sm:$0xff] %vm266_vm0, %v6712_v2  ;;  %1238 = vmatpush.bf16.msrb.mxu3 %v6508_v46  ;;  %1488 = vmatpush.bf16.msrb.mxu0 %v6512_v47  ;;  %v6624_v46 = vunpack.c.l.bf16 %v6670_v45  ;;  %v6625_v47 = vunpack.c.h.bf16 %v6670_v45 }
  0x22   : > { %290 = vst.msk [vmem:[#allocation2 + $0xb0] sm:$0xff] %vm266_vm0, %v6712_v2 }
  0x23   : > { %291 = vst.msk [vmem:[#allocation2 + $0xb8] sm:$0x3] %vm269_vm1, %v6712_v2 }
  0x24   : > { %292 = vst.msk [vmem:[#allocation2 + $0xc0] sm:$0xff] %vm266_vm0, %v6712_v2 }
  0x25   : > { %293 = vst.msk [vmem:[#allocation2 + $0xc8] sm:$0xff] %vm266_vm0, %v6712_v2  ;;  %1489 = vmatpush.bf16.msrb.mxu0 %v6511_v22 }
  0x26   : > { %294 = vst.msk [vmem:[#allocation2 + $0xd0] sm:$0x3] %vm269_vm1, %v6712_v2 }
  0x27   : > { %295 = vst.msk [vmem:[#allocation2 + $0xd8] sm:$0xff] %vm266_vm0, %v6712_v2 }
  0x28   : > { %296 = vst.msk [vmem:[#allocation2 + $0xe0] sm:$0xff] %vm266_vm0, %v6712_v2 }
  0x29   : > { %297 = vst.msk [vmem:[#allocation2 + $0xe8] sm:$0x3] %vm269_vm1, %v6712_v2  ;;  %1490 = vmatpush.bf16.msrb.mxu0 %v6510_v5 }
  0x2a   : > { %298 = vst.msk [vmem:[#allocation2 + $0xf0] sm:$0xff] %vm266_vm0, %v6712_v2 }
  0x2b   : > { %299 = vst.msk [vmem:[#allocation2 + $0xf8] sm:$0xff] %vm266_vm0, %v6712_v2 }
  0x2c   : > { %300 = vst.msk [vmem:[#allocation2 + $0x100] sm:$0x3] %vm269_vm1, %v6712_v2 }
  0x2d   : > { %301 = vst.msk [vmem:[#allocation2 + $0x108] sm:$0xff] %vm266_vm0, %v6712_v2 }
  0x2e   : > { %302 = vst.msk [vmem:[#allocation2 + $0x110] sm:$0xff] %vm266_vm0, %v6712_v2 }
  0x2f   : > { %303 = vst.msk [vmem:[#allocation2 + $0x118] sm:$0x3] %vm269_vm1, %v6712_v2 }
  0x30   : > { %304 = vst.msk [vmem:[#allocation2 + $0x120] sm:$0xff] %vm266_vm0, %v6712_v2 }
  0x31   : > { %305 = vst.msk [vmem:[#allocation2 + $0x128] sm:$0xff] %vm266_vm0, %v6712_v2 }
  0x32   : > { %306 = vst.msk [vmem:[#allocation2 + $0x130] sm:$0x3] %vm269_vm1, %v6712_v2 }
  0x33   : > { %307 = vst.msk [vmem:[#allocation2 + $0x138] sm:$0xff] %vm266_vm0, %v6712_v2 }
  0x34   : > { %308 = vst.msk [vmem:[#allocation2 + $0x140] sm:$0xff] %vm266_vm0, %v6712_v2 }
  0x35   : > { %309 = vst.msk [vmem:[#allocation2 + $0x148] sm:$0x3] %vm269_vm1, %v6712_v2 }
  0x36   : > { %310 = vst.msk [vmem:[#allocation2 + $0x150] sm:$0xff] %vm266_vm0, %v6712_v2 }
  0x37   : > { %311 = vst.msk [vmem:[#allocation2 + $0x158] sm:$0xff] %vm266_vm0, %v6712_v2 }
  0x38   : > { %312 = vst.msk [vmem:[#allocation2 + $0x160] sm:$0x3] %vm269_vm1, %v6712_v2 }
  0x39   : > { %313 = vst.msk [vmem:[#allocation2 + $0x168] sm:$0xff] %vm266_vm0, %v6712_v2 }
  0x3a   : > { %314 = vst.msk [vmem:[#allocation2 + $0x170] sm:$0xff] %vm266_vm0, %v6712_v2 }
  0x3b   : > { %315 = vst.msk [vmem:[#allocation2 + $0x178] sm:$0x3] %vm269_vm1, %v6712_v2 }
  0x3c   : > { %316 = vst.msk [vmem:[#allocation2 + $0x180] sm:$0xff] %vm266_vm0, %v6712_v2 }
  0x3d   : > { %317 = vst.msk [vmem:[#allocation2 + $0x188] sm:$0xff] %vm266_vm0, %v6712_v2 }
  0x3e   : > { %318 = vst.msk [vmem:[#allocation2 + $0x190] sm:$0x3] %vm269_vm1, %v6712_v2 }
  0x3f   : > { %319 = vst.msk [vmem:[#allocation2 + $0x198] sm:$0xff] %vm266_vm0, %v6712_v2 }
  0x40   : > { %320 = vst.msk [vmem:[#allocation2 + $0x1a0] sm:$0xff] %vm266_vm0, %v6712_v2 }
  0x41   : > { %321 = vst.msk [vmem:[#allocation2 + $0x1a8] sm:$0x3] %vm269_vm1, %v6712_v2 }
  0x42   : > { %2673 = vst [vmem:[#allocation3] sm:$0xff] %v6712_v2 }
  0x43   : > { %2674 = vst [vmem:[#allocation3 + $0x8] sm:$0xff] %v6712_v2 }
  0x44   : > { %2675 = vst [vmem:[#allocation3 + $0x10] sm:$0x3] %v6712_v2 }
  0x45   : > { %2676 = vst [vmem:[#allocation3 + $0x18] sm:$0xff] %v6712_v2 }
  0x46   : > { %2677 = vst [vmem:[#allocation3 + $0x20] sm:$0xff] %v6712_v2 }
  0x47   : > { %2678 = vst [vmem:[#allocation3 + $0x28] sm:$0x3] %v6712_v2 }
  0x48   : > { %2679 = vst [vmem:[#allocation3 + $0x30] sm:$0xff] %v6712_v2 }
  0x49   : > { %2680 = vst [vmem:[#allocation3 + $0x38] sm:$0xff] %v6712_v2 }
  0x4a   : > { %2681 = vst [vmem:[#allocation3 + $0x40] sm:$0x3] %v6712_v2 }
  0x4b   : > { %2682 = vst [vmem:[#allocation3 + $0x48] sm:$0xff] %v6712_v2 }
  0x4c   : > { %2683 = vst [vmem:[#allocation3 + $0x50] sm:$0xff] %v6712_v2 }
  0x4d   : > { %2684 = vst [vmem:[#allocation3 + $0x58] sm:$0x3] %v6712_v2 }
  0x4e   : > { %2685 = vst [vmem:[#allocation3 + $0x60] sm:$0xff] %v6712_v2 }
  0x4f   : > { %2686 = vst [vmem:[#allocation3 + $0x68] sm:$0xff] %v6712_v2 }
  0x50   : > { %2687 = vst [vmem:[#allocation3 + $0x70] sm:$0x3] %v6712_v2 }
  0x51   : > { %2688 = vst [vmem:[#allocation3 + $0x78] sm:$0xff] %v6712_v2 }
  0x52   : > { %2689 = vst [vmem:[#allocation3 + $0x80] sm:$0xff] %v6712_v2 }
  0x53   : > { %2690 = vst [vmem:[#allocation3 + $0x88] sm:$0x3] %v6712_v2 }
  0x54   : > { %2691 = vst [vmem:[#allocation3 + $0x90] sm:$0xff] %v6712_v2 }
  0x55   : > { %2692 = vst [vmem:[#allocation3 + $0x98] sm:$0xff] %v6712_v2 }
  0x56   : > { %2693 = vst [vmem:[#allocation3 + $0xa0] sm:$0x3] %v6712_v2 }
  0x57   : > { %2694 = vst [vmem:[#allocation3 + $0xa8] sm:$0xff] %v6712_v2 }
  0x58   : > { %2695 = vst [vmem:[#allocation3 + $0xb0] sm:$0xff] %v6712_v2 }
  0x59   : > { %2696 = vst [vmem:[#allocation3 + $0xb8] sm:$0x3] %v6712_v2 }
  0x5a   : > { %2697 = vst [vmem:[#allocation3 + $0xc0] sm:$0xff] %v6712_v2 }
  0x5b   : > { %2698 = vst [vmem:[#allocation3 + $0xc8] sm:$0xff] %v6712_v2 }
  0x5c   : > { %2699 = vst [vmem:[#allocation3 + $0xd0] sm:$0x3] %v6712_v2 }
  0x5d   : > { %2700 = vst [vmem:[#allocation3 + $0xd8] sm:$0xff] %v6712_v2 }
  0x5e   : > { %2701 = vst [vmem:[#allocation3 + $0xe0] sm:$0xff] %v6712_v2 }
  0x5f   : > { %2702 = vst [vmem:[#allocation3 + $0xe8] sm:$0x3] %v6712_v2 }
  0x60   : > { %2703 = vst [vmem:[#allocation3 + $0xf0] sm:$0xff] %v6712_v2 }
  0x61   : > { %2704 = vst [vmem:[#allocation3 + $0xf8] sm:$0xff] %v6712_v2 }
  0x62   : > { %2705 = vst [vmem:[#allocation3 + $0x100] sm:$0x3] %v6712_v2 }
  0x63   : > { %2706 = vst [vmem:[#allocation3 + $0x108] sm:$0xff] %v6712_v2 }
  0x64   : > { %2707 = vst [vmem:[#allocation3 + $0x110] sm:$0xff] %v6712_v2 }
  0x65   : > { %2708 = vst [vmem:[#allocation3 + $0x118] sm:$0x3] %v6712_v2 }
  0x66   : > { %2709 = vst [vmem:[#allocation3 + $0x120] sm:$0xff] %v6712_v2 }
  0x67   : > { %2710 = vst [vmem:[#allocation3 + $0x128] sm:$0xff] %v6712_v2 }
  0x68   : > { %2711 = vst [vmem:[#allocation3 + $0x130] sm:$0x3] %v6712_v2 }
  0x69   : > { %2712 = vst [vmem:[#allocation3 + $0x138] sm:$0xff] %v6712_v2 }
  0x6a   : > { %2713 = vst [vmem:[#allocation3 + $0x140] sm:$0xff] %v6712_v2 }
  0x6b   : > { %2714 = vst [vmem:[#allocation3 + $0x148] sm:$0x3] %v6712_v2 }
  0x6c   : > { %2715 = vst [vmem:[#allocation3 + $0x150] sm:$0xff] %v6712_v2 }
  0x6d   : > { %2716 = vst [vmem:[#allocation3 + $0x158] sm:$0xff] %v6712_v2 }
  0x6e   : > { %2717 = vst [vmem:[#allocation3 + $0x160] sm:$0x3] %v6712_v2 }
  0x6f   : > { %2718 = vst [vmem:[#allocation3 + $0x168] sm:$0xff] %v6712_v2 }
  0x70   : > { %2719 = vst [vmem:[#allocation3 + $0x170] sm:$0xff] %v6712_v2 }
  0x71   : > { %2720 = vst [vmem:[#allocation3 + $0x178] sm:$0x3] %v6712_v2 }
  0x72   : > { %2721 = vst [vmem:[#allocation3 + $0x180] sm:$0xff] %v6712_v2 }
  0x73   : > { %2722 = vst [vmem:[#allocation3 + $0x188] sm:$0xff] %v6712_v2 }
  0x74   : > { %2723 = vst [vmem:[#allocation3 + $0x190] sm:$0x3] %v6712_v2 }
  0x75   : > { %2724 = vst [vmem:[#allocation3 + $0x198] sm:$0xff] %v6712_v2 }
  0x76   : > { %2725 = vst [vmem:[#allocation3 + $0x1a0] sm:$0xff] %v6712_v2 }
  0x77   : > { %2726 = vst [vmem:[#allocation3 + $0x1a8] sm:$0x3] %v6712_v2  ;;  %v6668_v2 = vld [vmem:[%s6954_s26 + $0x18] sm:$0xff]  }
  0x78   : > { %401 = vst.msk [vmem:[#allocation2 + $0xc1] sm:$0xff] %vm266_vm0, %v6632_v20  ;;  %v6616_v3 = vunpack.c.l.bf16 %v6668_v2  ;;  %v6617_v4 = vunpack.c.h.bf16 %v6668_v2  ;;  %v6503_v20 = vld [vmem:[%s8770_s1 + $0x48] sm:$0xff] }
  0x79   : > { %402 = vst.msk [vmem:[#allocation2 + $0xc9] sm:$0xff] %vm266_vm0, %v6633_v21  ;;  %v6507_v21 = vld [vmem:[%s8770_s1 + $0x68] sm:$0xff]  ;;  %989 = vmatpush.bf16.msrb.mxu2 %v6503_v20 }
  0x7a   : > { %387 = vst.msk [vmem:[#allocation2 + $0x19] sm:$0xff] %vm266_vm0, %v6604_v23  ;;  %v6669_v23 = vld [vmem:[%s6954_s26 + $0x20] sm:$0xff]   ;;  %1239 = vmatpush.bf16.msrb.mxu3 %v6507_v21 }
  0x7b   : > { %388 = vst.msk [vmem:[#allocation2 + $0x21] sm:$0xff] %vm266_vm0, %v6605_v24  ;;  %v6620_v24 = vunpack.c.l.bf16 %v6669_v23  ;;  %v6621_v25 = vunpack.c.h.bf16 %v6669_v23 }
  0x7c   : > { %403 = vst.msk [vmem:[#allocation2 + $0xd9] sm:$0xff] %vm266_vm0, %v6636_v26  ;;  %v6677_v26 = vld [vmem:[%s6954_s26 + $0x60] sm:$0xff]  }
  0x7d   : > { %404 = vst.msk [vmem:[#allocation2 + $0xe1] sm:$0xff] %vm266_vm0, %v6637_v27  ;;  %v6652_v27 = vunpack.c.l.bf16 %v6677_v26  ;;  %v6653_v28 = vunpack.c.h.bf16 %v6677_v26 }
  0x7e   : > { %389 = vst.msk [vmem:[#allocation2 + $0x31] sm:$0xff] %vm266_vm0, %v6608_v29 }
  0x7f   : > { %v491_v33 = vld [vmem:[#allocation2 + $0xc1] sm:$0xff]  ;;  %390 = vst.msk [vmem:[#allocation2 + $0x39] sm:$0xff] %vm266_vm0, %v6609_v30 }
  0x80   : > { %v435_v34 = vld [vmem:[#allocation2 + $0xc0] sm:$0xff]  ;;  %v492_v35 = vld [vmem:[#allocation2 + $0xc9] sm:$0xff]  ;;  %405 = vst.msk [vmem:[#allocation2 + $0xf1] sm:$0xff] %vm266_vm0, %v6640_v31 }
  0x81   : > { %v436_v36 = vld [vmem:[#allocation2 + $0xc8] sm:$0xff]  ;;  %v6979_v37 = vpack.c.bf16 %v492_v35, %v491_v33  ;;  %v477_v39 = vld [vmem:[#allocation2 + $0x19] sm:$0xff]  ;;  %406 = vst.msk [vmem:[#allocation2 + $0xf9] sm:$0xff] %vm266_vm0, %v6641_v32 }
  0x82   : > { %v6981_v38 = vpack.c.bf16 %v436_v36, %v435_v34  ;;  %v421_v40 = vld [vmem:[#allocation2 + $0x18] sm:$0xff]  ;;  %v478_v41 = vld [vmem:[#allocation2 + $0x21] sm:$0xff]  ;;  %391 = vst.msk [vmem:[#allocation2 + $0x49] sm:$0xff] %vm266_vm0, %v6612_v49  ;;  %v6656_v49 = vunpack.c.l.bf16 %v6678_v48 }
  0x83   : > { %v422_v42 = vld [vmem:[#allocation2 + $0x20] sm:$0xff]  ;;  %5753 = vmatmul.msk.bf16.vlgmr.msra.gmra.mxu2 %vm266_vm0, %v6979_v37  ;;  %v6988_v43 = vpack.c.bf16 %v478_v41, %v477_v39  ;;  %392 = vst.msk [vmem:[#allocation2 + $0x51] sm:$0xff] %vm266_vm0, %v6613_v50  ;;  %v437_v56 = vld [vmem:[#allocation2 + $0xd8] sm:$0xff]  ;;  %v6657_v50 = vunpack.c.h.bf16 %v6678_v48 }
  0x84   : > { %5785 = vmatmul.msk.bf16.vlgmr.msra.gmra.mxu3 %vm266_vm0, %v6981_v38  ;;  %v6990_v44 = vpack.c.bf16 %v422_v42, %v421_v40  ;;  %v493_v54 = vld [vmem:[#allocation2 + $0xd9] sm:$0xff]  ;;  %407 = vst.msk [vmem:[#allocation2 + $0x109] sm:$0xff] %vm266_vm0, %v6644_v52  ;;  %v494_v55 = vld [vmem:[#allocation2 + $0xe1] sm:$0xff] }
  0x85   : > { %5746 = vmatmul.msk.bf16.gmra.mxu0 %vm266_vm0, %v6988_v43  ;;  %v438_v57 = vld [vmem:[#allocation2 + $0xe0] sm:$0xff]  ;;  %408 = vst.msk [vmem:[#allocation2 + $0x111] sm:$0xff] %vm266_vm0, %v6645_v53  ;;  %v479_v58 = vld [vmem:[#allocation2 + $0x31] sm:$0xff]  ;;  %v7011_v62 = vpack.c.bf16 %v494_v55, %v493_v54 }
  0x86   : > { %5778 = vmatmul.msk.bf16.gmra.mxu1 %vm266_vm0, %v6990_v44  ;;  %v480_v59 = vld [vmem:[#allocation2 + $0x39] sm:$0xff]  ;;  %v423_v60 = vld [vmem:[#allocation2 + $0x30] sm:$0xff]  ;;  %v7013_v63 = vpack.c.bf16 %v438_v57, %v437_v56  ;;  %393 = vst.msk [vmem:[#allocation2 + $0x61] sm:$0xff] %vm266_vm0, %v6616_v3 }
  0x87   : > { %v424_v61 = vld [vmem:[#allocation2 + $0x38] sm:$0xff]  ;;  %v7015_v0 = vpack.c.bf16 %v480_v59, %v479_v58  ;;  %394 = vst.msk [vmem:[#allocation2 + $0x69] sm:$0xff] %vm266_vm0, %v6617_v4  ;;  %v439_v10 = vld [vmem:[#allocation2 + $0xf0] sm:$0xff]  ;;  %v6502_v3 = vld [vmem:[%s8770_s1 + $0x40] sm:$0xff] }
  0x88   : > { %v7017_v1 = vpack.c.bf16 %v424_v61, %v423_v60  ;;  %409 = vst.msk [vmem:[#allocation2 + $0x121] sm:$0xff] %vm266_vm0, %v6648_v6  ;;  %v495_v8 = vld [vmem:[#allocation2 + $0xf1] sm:$0xff]  ;;  %v496_v9 = vld [vmem:[#allocation2 + $0xf9] sm:$0xff]  ;;  %990 = vmatpush.bf16.msrb.mxu2 %v6502_v3 }
  0x89   : > { %410 = vst.msk [vmem:[#allocation2 + $0x129] sm:$0xff] %vm266_vm0, %v6649_v7  ;;  %v440_v11 = vld [vmem:[#allocation2 + $0xf8] sm:$0xff]  ;;  %v481_v12 = vld [vmem:[#allocation2 + $0x49] sm:$0xff]  ;;  %v7033_v16 = vpack.c.bf16 %v496_v9, %v495_v8  ;;  %v6506_v4 = vld [vmem:[%s8770_s1 + $0x60] sm:$0xff] }
  0x8a   : > { %v482_v13 = vld [vmem:[#allocation2 + $0x51] sm:$0xff]  ;;  %v425_v14 = vld [vmem:[#allocation2 + $0x48] sm:$0xff]  ;;  %v7035_v17 = vpack.c.bf16 %v440_v11, %v439_v10  ;;  %395 = vst.msk [vmem:[#allocation2 + $0x79] sm:$0xff] %vm266_vm0, %v6620_v24  ;;  %1240 = vmatpush.bf16.msrb.mxu3 %v6506_v4 }
  0x8b   : > { %v426_v15 = vld [vmem:[#allocation2 + $0x50] sm:$0xff]  ;;  %v7037_v18 = vpack.c.bf16 %v482_v13, %v481_v12  ;;  %396 = vst.msk [vmem:[#allocation2 + $0x81] sm:$0xff] %vm266_vm0, %v6621_v25  ;;  %v441_v31 = vld [vmem:[#allocation2 + $0x108] sm:$0xff] }
  0x8c   : > { %v7039_v19 = vpack.c.bf16 %v426_v15, %v425_v14  ;;  %411 = vst.msk [vmem:[#allocation2 + $0x139] sm:$0xff] %vm266_vm0, %v6652_v27  ;;  %v497_v29 = vld [vmem:[#allocation2 + $0x109] sm:$0xff]  ;;  %v498_v30 = vld [vmem:[#allocation2 + $0x111] sm:$0xff] }
  0x8d   : > { %412 = vst.msk [vmem:[#allocation2 + $0x141] sm:$0xff] %vm266_vm0, %v6653_v28  ;;  %v442_v32 = vld [vmem:[#allocation2 + $0x110] sm:$0xff]  ;;  %v483_v33 = vld [vmem:[#allocation2 + $0x61] sm:$0xff]  ;;  %v7064_v39 = vpack.c.bf16 %v498_v30, %v497_v29  ;;  %v6517_v28 = vld [vmem:[%s8770_s1 + $0xb8] sm:$0xff] }
  0x8e   : > { %v484_v34 = vld [vmem:[#allocation2 + $0x69] sm:$0xff]  ;;  %v427_v35 = vld [vmem:[#allocation2 + $0x60] sm:$0xff]  ;;  %v7066_v40 = vpack.c.bf16 %v442_v32, %v441_v31  ;;  %397 = vst.msk [vmem:[#allocation2 + $0x91] sm:$0xff] %vm266_vm0, %v6624_v46  ;;  %1737 = vmatpush.bf16.msrb.mxu1 %v6517_v28 }
  0x8f   : > { %v428_v36 = vld [vmem:[#allocation2 + $0x68] sm:$0xff]  ;;  %v7068_v41 = vpack.c.bf16 %v484_v34, %v483_v33  ;;  %398 = vst.msk [vmem:[#allocation2 + $0x99] sm:$0xff] %vm266_vm0, %v6625_v47  ;;  %v443_v53 = vld [vmem:[#allocation2 + $0x120] sm:$0xff]  ;;  %v6671_v6 = vld [vmem:[%s6954_s26 + $0x30] sm:$0xff]  }
  0x90   : > { %v7070_v42 = vpack.c.bf16 %v428_v36, %v427_v35  ;;  %413 = vst.msk [vmem:[#allocation2 + $0x151] sm:$0xff] %vm266_vm0, %v6656_v49  ;;  %v499_v51 = vld [vmem:[#allocation2 + $0x121] sm:$0xff]  ;;  %v500_v52 = vld [vmem:[#allocation2 + $0x129] sm:$0xff]  ;;  %v6628_v7 = vunpack.c.l.bf16 %v6671_v6  ;;  %v6629_v8 = vunpack.c.h.bf16 %v6671_v6 }
  0x91   : > { %414 = vst.msk [vmem:[#allocation2 + $0x159] sm:$0xff] %vm266_vm0, %v6657_v50  ;;  %v444_v54 = vld [vmem:[#allocation2 + $0x128] sm:$0xff]  ;;  %v485_v55 = vld [vmem:[#allocation2 + $0x79] sm:$0xff]  ;;  %v7086_v59 = vpack.c.bf16 %v500_v52, %v499_v51  ;;  %v6679_v9 = vld [vmem:[%s6954_s26 + $0x70] sm:$0xff]  }
  0x92   : > { %v486_v56 = vld [vmem:[#allocation2 + $0x81] sm:$0xff]  ;;  %v429_v57 = vld [vmem:[#allocation2 + $0x78] sm:$0xff]  ;;  %v7088_v60 = vpack.c.bf16 %v444_v54, %v443_v53  ;;  %v6660_v10 = vunpack.c.l.bf16 %v6679_v9  ;;  %v6661_v11 = vunpack.c.h.bf16 %v6679_v9  ;;  %399 = vst.msk [vmem:[#allocation2 + $0xa9] sm:$0xff] %vm266_vm0, %v6628_v7  ;;  %v6516_v51 = vld [vmem:[%s8770_s1 + $0xb0] sm:$0xff] }
  0x93   : > { %5754 = vmatmul.msk.bf16.gmra.mxu2 %vm266_vm0, %v7011_v62  ;;  %v430_v58 = vld [vmem:[#allocation2 + $0x80] sm:$0xff]  ;;  %v7090_v61 = vpack.c.bf16 %v486_v56, %v485_v55  ;;  %400 = vst.msk [vmem:[#allocation2 + $0xb1] sm:$0xff] %vm266_vm0, %v6629_v8  ;;  %v445_v14 = vld [vmem:[#allocation2 + $0x138] sm:$0xff]  ;;  %1738 = vmatpush.bf16.msrb.mxu1 %v6516_v51  ;;  %v6515_v55 = vld [vmem:[%s8770_s1 + $0xa8] sm:$0xff] }
  0x94   : > { %5786 = vmatmul.msk.bf16.gmra.mxu3 %vm266_vm0, %v7013_v63  ;;  %v7092_v2 = vpack.c.bf16 %v430_v58, %v429_v57  ;;  %415 = vst.msk [vmem:[#allocation2 + $0x169] sm:$0xff] %vm266_vm0, %v6660_v10  ;;  %v501_v12 = vld [vmem:[#allocation2 + $0x139] sm:$0xff]  ;;  %v502_v13 = vld [vmem:[#allocation2 + $0x141] sm:$0xff] }
  0x95   : > { %5747 = vmatmul.msk.bf16.gmra.mxu0 %vm266_vm0, %v7015_v0  ;;  %416 = vst.msk [vmem:[#allocation2 + $0x171] sm:$0xff] %vm266_vm0, %v6661_v11  ;;  %v446_v15 = vld [vmem:[#allocation2 + $0x140] sm:$0xff]  ;;  %v487_v20 = vld [vmem:[#allocation2 + $0x91] sm:$0xff]  ;;  %v7117_v24 = vpack.c.bf16 %v502_v13, %v501_v12 }
  0x96   : > { %5779 = vmatmul.msk.bf16.gmra.mxu1 %vm266_vm0, %v7017_v1  ;;  %v488_v21 = vld [vmem:[#allocation2 + $0x99] sm:$0xff]  ;;  %v431_v22 = vld [vmem:[#allocation2 + $0x90] sm:$0xff]  ;;  %v7119_v25 = vpack.c.bf16 %v446_v15, %v445_v14  ;;  %v1605_v7 = vld [vmem:[#allocation2 + $0x22] sm:$0xff] }
  0x97   : > { %v432_v23 = vld [vmem:[#allocation2 + $0x98] sm:$0xff]  ;;  %v7121_v26 = vpack.c.bf16 %v488_v21, %v487_v20  ;;  %v447_v31 = vld [vmem:[#allocation2 + $0x150] sm:$0xff]  ;;  %1739 = vmatpush.bf16.msrb.mxu1 %v6515_v55  ;;  %v6514_v57 = vld [vmem:[%s8770_s1 + $0xa0] sm:$0xff] }
  0x98   : > { %v7123_v27 = vpack.c.bf16 %v432_v23, %v431_v22  ;;  %v503_v29 = vld [vmem:[#allocation2 + $0x151] sm:$0xff]  ;;  %v504_v30 = vld [vmem:[#allocation2 + $0x159] sm:$0xff]  ;;  %v613_v49 = vpop.f32.mrf.mxu0  ;;  %v854_v13 = vld [vmem:[#allocation2 + $0x2] sm:$0xff] }
  0x99   : > { %v448_v32 = vld [vmem:[#allocation2 + $0x158] sm:$0xff]  ;;  %v489_v33 = vld [vmem:[#allocation2 + $0xa9] sm:$0xff]  ;;  %v7136_v45 = vpack.c.bf16 %v504_v30, %v503_v29  ;;  %v774_v50 = vpop.f32.mrf.mxu1 }
  0x9a   : > { %v490_v34 = vld [vmem:[#allocation2 + $0xb1] sm:$0xff]  ;;  %v433_v35 = vld [vmem:[#allocation2 + $0xa8] sm:$0xff]  ;;  %v7138_v46 = vpack.c.bf16 %v448_v32, %v447_v31  ;;  %v7151_v52 = vadd.f32 %v774_v50, %v613_v49  ;;  %v1604_v6 = vld [vmem:[#allocation2 + $0x1a] sm:$0xff] }
  0x9b   : > { %v434_v36 = vld [vmem:[#allocation2 + $0xb0] sm:$0xff]  ;;  %v7140_v47 = vpack.c.bf16 %v490_v34, %v489_v33  ;;  %v6521_v53 = vld [vmem:[%s8770_s1 + $0xd8] sm:$0xff]  ;;  %v449_v4 = vld [vmem:[#allocation2 + $0x168] sm:$0xff]  ;;  %1740 = vmatpush.bf16.msrb.mxu1 %v6514_v57  ;;  %v1636_v10 = vpack.c.bf16 %v1605_v7, %v1604_v6 }
  0x9c   : > { %v7142_v48 = vpack.c.bf16 %v434_v36, %v433_v35  ;;  %v6525_v54 = vld [vmem:[%s8770_s1 + $0xf8] sm:$0xff]  ;;  %1988 = vmatpush.bf16.msra.mxu2 %v6521_v53  ;;  %v505_v58 = vld [vmem:[#allocation2 + $0x169] sm:$0xff] }
  0x9d   : > { %2238 = vmatpush.bf16.msra.mxu3 %v6525_v54  ;;  %v6529_v56 = vld [vmem:[%s8770_s1 + $0x118] sm:$0xff]  ;;  %v450_v5 = vld [vmem:[#allocation2 + $0x170] sm:$0xff]  ;;  %v1610_v7 = vld [vmem:[#allocation2 + $0x62] sm:$0xff] }
  0x9e   : > { %2488 = vmatpush.bf16.msra.mxu0 %v6529_v56  ;;  %v506_v3 = vld [vmem:[#allocation2 + $0x171] sm:$0xff]  ;;  %v7174_v9 = vpack.c.bf16 %v450_v5, %v449_v4  ;;  %v1607_v20 = vld [vmem:[#allocation2 + $0x3a] sm:$0xff] }
  0x9f   : > { %v7172_v8 = vpack.c.bf16 %v506_v3, %v505_v58  ;;  %v855_v14 = vld [vmem:[#allocation2 + $0xa] sm:$0xff]  ;;  %v1606_v15 = vld [vmem:[#allocation2 + $0x32] sm:$0xff] }
  0xa0   : > { %v7183_v11 = vpop.f32.mrf.mxu0  ;;  %v886_v21 = vpack.c.bf16 %v855_v14, %v854_v13  ;;  %v7187_v22 = vpack.c.bf16 %v1607_v20, %v1606_v15  ;;  %v1608_v49 = vld [vmem:[#allocation2 + $0x4a] sm:$0xff] }
  0xa1   : > { %v7185_v12 = vpop.f32.mrf.mxu1  ;;  %v6520_v20 = vld [vmem:[%s8770_s1 + $0xd0] sm:$0xff] }
  0xa2   : > { %1989 = vmatpush.bf16.msra.mxu2 %v6520_v20  ;;  %v1614_v20 = vld [vmem:[#allocation2 + $0x92] sm:$0xff] }
  0xa3   : > { %5755 = vmatmul.msk.bf16.gmra.mxu2 %vm266_vm0, %v7033_v16 }
  0xa4   : > { %5787 = vmatmul.msk.bf16.gmra.mxu3 %vm266_vm0, %v7035_v17 }
  0xa5   : > { %5748 = vmatmul.msk.bf16.gmra.mxu0 %vm266_vm0, %v7037_v18 }
  0xa6   : > { %5780 = vmatmul.msk.bf16.gmra.mxu1 %vm266_vm0, %v7039_v19 }
  0xb3   : > { %5756 = vmatmul.msk.bf16.gmra.mxu2 %vm266_vm0, %v7064_v39 }
  0xb4   : > { %5788 = vmatmul.msk.bf16.gmra.mxu3 %vm266_vm0, %v7066_v40 }
  0xb5   : > { %5749 = vmatmul.msk.bf16.gmra.mxu0 %vm266_vm0, %v7068_v41 }
  0xb6   : > { %5781 = vmatmul.msk.bf16.gmra.mxu1 %vm266_vm0, %v7070_v42 }
  0xc3   : > { %5757 = vmatmul.msk.bf16.gmra.mxu2 %vm266_vm0, %v7086_v59 }
  0xc4   : > { %5789 = vmatmul.msk.bf16.gmra.mxu3 %vm266_vm0, %v7088_v60 }
  0xc5   : > { %5750 = vmatmul.msk.bf16.gmra.mxu0 %vm266_vm0, %v7090_v61 }
  0xc6   : > { %5782 = vmatmul.msk.bf16.gmra.mxu1 %vm266_vm0, %v7092_v2 }
  0xd3   : > { %5758 = vmatmul.msk.bf16.gmra.mxu2 %vm266_vm0, %v7117_v24 }
  0xd4   : > { %5790 = vmatmul.msk.bf16.gmra.mxu3 %vm266_vm0, %v7119_v25 }
  0xd5   : > { %5751 = vmatmul.msk.bf16.gmra.mxu0 %vm266_vm0, %v7121_v26 }
  0xd6   : > { %5783 = vmatmul.msk.bf16.gmra.mxu1 %vm266_vm0, %v7123_v27 }
  0xe3   : > { %5759 = vmatmul.msk.bf16.gmra.mxu2 %vm266_vm0, %v7136_v45 }
  0xe4   : > { %5791 = vmatmul.msk.bf16.gmra.mxu3 %vm266_vm0, %v7138_v46 }
  0xe5   : > { %5752 = vmatmul.msk.bf16.gmra.mxu0 %vm266_vm0, %v7140_v47 }
  0xe6   : > { %5784 = vmatmul.msk.bf16.gmra.mxu1 %vm266_vm0, %v7142_v48 }
  0xf3   : > { %5760 = vmatmul.msk.bf16.gmra.mxu2 %vm266_vm0, %v7172_v8 }
  0xf4   : > { %5792 = vmatmul.msk.bf16.gmra.mxu3 %vm266_vm0, %v7174_v9 }
  0xf5   : > { %5897 = vmatmul.msk.bf16.vlgmr.msrb.gmra.mxu0 %vm266_vm0, %v6988_v43 }
  0xf6   : > { %5937 = vmatmul.msk.bf16.vlgmr.msrb.gmra.mxu1 %vm266_vm0, %v1636_v10 }
 0x102   : > { %v618_v23 = vpop.f32.mrf.mxu0 }
 0x103   : > { %v779_v28 = vpop.f32.mrf.mxu1  ;;  %5817 = vmatmul.msk.bf16.vlgmr.msrb.gmra.mxu2 %vm266_vm0, %v886_v21  ;;  %v6524_v21 = vld [vmem:[%s8770_s1 + $0xf0] sm:$0xff] }
 0x104   : > { %5857 = vmatmul.msk.bf16.vlgmr.msrb.gmra.mxu3 %vm266_vm0, %v6990_v44  ;;  %v7192_v43 = vadd.f32 %v779_v28, %v618_v23  ;;  %v1609_v44 = vld [vmem:[#allocation2 + $0x52] sm:$0xff] }
 0x105   : > { %5898 = vmatmul.msk.bf16.gmra.mxu0 %vm266_vm0, %v7015_v0  ;;  %v7204_v51 = vpack.c.bf16 %v1609_v44, %v1608_v49  ;;  %2239 = vmatpush.bf16.msra.mxu3 %v6524_v21  ;;  %v1613_v49 = vld [vmem:[#allocation2 + $0x82] sm:$0xff] }
 0x106   : > { %5938 = vmatmul.msk.bf16.gmra.mxu1 %vm266_vm0, %v7187_v22  ;;  %v653_v29 = vpop.f32.mrf.mxu2 }
 0x107   : > { %v814_v30 = vpop.f32.mrf.mxu3 }
 0x108   : > { %v7198_v31 = vadd.f32 %v814_v30, %v653_v29  ;;  %v6528_v29 = vld [vmem:[%s8770_s1 + $0x110] sm:$0xff] }
 0x109   : > { %2489 = vmatpush.bf16.msra.mxu0 %v6528_v29 }
 0x10a   : > { %v620_v32 = vpop.f32.mrf.mxu0 }
 0x10b   : > { %v781_v33 = vpop.f32.mrf.mxu1 }
 0x10c   : > { %v7200_v34 = vadd.f32 %v781_v33, %v620_v32 }
 0x10e   : > { %v655_v35 = vpop.f32.mrf.mxu2 }
 0x10f   : > { %v816_v36 = vpop.f32.mrf.mxu3 }
 0x110   : > { %v7202_v50 = vadd.f32 %v816_v36, %v655_v35  ;;  %v1612_v36 = vld [vmem:[#allocation2 + $0x7a] sm:$0xff] }
 0x112   : > { %v623_v0 = vpop.f32.mrf.mxu0 }
 0x113   : > { %v784_v53 = vpop.f32.mrf.mxu1  ;;  %5818 = vmatmul.msk.bf16.gmra.mxu2 %vm266_vm0, %v1636_v10 }
 0x114   : > { %5858 = vmatmul.msk.bf16.gmra.mxu3 %vm266_vm0, %v7017_v1  ;;  %v7209_v54 = vadd.f32 %v784_v53, %v623_v0  ;;  %v1611_v1 = vld [vmem:[#allocation2 + $0x6a] sm:$0xff]  ;;  %v7248_v0 = vpack.c.bf16 %v1613_v49, %v1612_v36 }
 0x115   : > { %5899 = vmatmul.msk.bf16.gmra.mxu0 %vm266_vm0, %v7037_v18  ;;  %v7221_v13 = vpack.c.bf16 %v1611_v1, %v1610_v7 }
 0x116   : > { %5939 = vmatmul.msk.bf16.gmra.mxu1 %vm266_vm0, %v7204_v51  ;;  %v658_v55 = vpop.f32.mrf.mxu2 }
 0x117   : > { %v819_v56 = vpop.f32.mrf.mxu3 }
 0x118   : > { %v7215_v57 = vadd.f32 %v819_v56, %v658_v55 }
 0x11a   : > { %v625_v58 = vpop.f32.mrf.mxu0 }
 0x11b   : > { %v786_v3 = vpop.f32.mrf.mxu1 }
 0x11c   : > { %v7217_v4 = vadd.f32 %v786_v3, %v625_v58 }
 0x11e   : > { %v660_v5 = vpop.f32.mrf.mxu2 }
 0x11f   : > { %v821_v6 = vpop.f32.mrf.mxu3 }
 0x120   : > { %v7219_v10 = vadd.f32 %v821_v6, %v660_v5 }
 0x122   : > { %v628_v18 = vpop.f32.mrf.mxu0 }
 0x123   : > { %v789_v14 = vpop.f32.mrf.mxu1  ;;  %5819 = vmatmul.msk.bf16.gmra.mxu2 %vm266_vm0, %v7187_v22 }
 0x124   : > { %5859 = vmatmul.msk.bf16.gmra.mxu3 %vm266_vm0, %v7039_v19  ;;  %v7227_v15 = vadd.f32 %v789_v14, %v628_v18 }
 0x125   : > { %5900 = vmatmul.msk.bf16.gmra.mxu0 %vm266_vm0, %v7068_v41 }
 0x126   : > { %5940 = vmatmul.msk.bf16.gmra.mxu1 %vm266_vm0, %v7221_v13  ;;  %v663_v23 = vpop.f32.mrf.mxu2 }
 0x127   : > { %v824_v28 = vpop.f32.mrf.mxu3 }
 0x128   : > { %v7239_v19 = vadd.f32 %v824_v28, %v663_v23 }
 0x12a   : > { %v630_v30 = vpop.f32.mrf.mxu0 }
 0x12b   : > { %v791_v32 = vpop.f32.mrf.mxu1 }
 0x12c   : > { %v7244_v33 = vadd.f32 %v791_v32, %v630_v30 }
 0x12e   : > { %v665_v35 = vpop.f32.mrf.mxu2 }
 0x12f   : > { %v826_v41 = vpop.f32.mrf.mxu3 }
 0x130   : > { %v7246_v44 = vadd.f32 %v826_v41, %v665_v35 }
 0x132   : > { %v633_v53 = vpop.f32.mrf.mxu0 }
 0x133   : > { %v794_v55 = vpop.f32.mrf.mxu1  ;;  %5820 = vmatmul.msk.bf16.gmra.mxu2 %vm266_vm0, %v7204_v51 }
 0x134   : > { %5860 = vmatmul.msk.bf16.gmra.mxu3 %vm266_vm0, %v7070_v42  ;;  %v7254_v56 = vadd.f32 %v794_v55, %v633_v53  ;;  %v1615_v42 = vld [vmem:[#allocation2 + $0x9a] sm:$0xff] }
 0x135   : > { %5901 = vmatmul.msk.bf16.gmra.mxu0 %vm266_vm0, %v7090_v61  ;;  %v7266_v23 = vpack.c.bf16 %v1615_v42, %v1614_v20 }
 0x136   : > { %5941 = vmatmul.msk.bf16.gmra.mxu1 %vm266_vm0, %v7248_v0  ;;  %v668_v58 = vpop.f32.mrf.mxu2 }
 0x137   : > { %v829_v3 = vpop.f32.mrf.mxu3  ;;  %8781 = vst [vmem:[#allocation6_spill] sm:$0xff] %v7266_v23 }
 0x138   : > { %v7260_v5 = vadd.f32 %v829_v3, %v668_v58  ;;  %v1616_v58 = vld [vmem:[#allocation2 + $0xaa] sm:$0xff] }
 0x13a   : > { %8779 = vst [vmem:[#allocation4_spill] sm:$0xff] %v7260_v5  ;;  %v635_v6 = vpop.f32.mrf.mxu0 }
 0x13b   : > { %v796_v7 = vpop.f32.mrf.mxu1 }
 0x13c   : > { %v7262_v1 = vadd.f32 %v796_v7, %v635_v6 }
 0x13e   : > { %v670_v18 = vpop.f32.mrf.mxu2 }
 0x13f   : > { %v831_v14 = vpop.f32.mrf.mxu3 }
 0x140   : > { %v7264_v21 = vadd.f32 %v831_v14, %v670_v18 }
 0x142   : > { %8780 = vst [vmem:[#allocation5_spill] sm:$0xff] %v7264_v21  ;;  %v638_v61 = vpop.f32.mrf.mxu0 }
 0x143   : > { %v799_v28 = vpop.f32.mrf.mxu1  ;;  %5821 = vmatmul.msk.bf16.gmra.mxu2 %vm266_vm0, %v7221_v13 }
 0x144   : > { %5861 = vmatmul.msk.bf16.gmra.mxu3 %vm266_vm0, %v7092_v2  ;;  %v7272_v29 = vadd.f32 %v799_v28, %v638_v61  ;;  %v1617_v2 = vld [vmem:[#allocation2 + $0xb2] sm:$0xff] }
 0x145   : > { %5902 = vmatmul.msk.bf16.gmra.mxu0 %vm266_vm0, %v7121_v26  ;;  %v7284_v6 = vpack.c.bf16 %v1617_v2, %v1616_v58 }
 0x146   : > { %5942 = vmatmul.msk.bf16.gmra.mxu1 %vm266_vm0, %v7266_v23  ;;  %v673_v30 = vpop.f32.mrf.mxu2 }
 0x147   : > { %v834_v32 = vpop.f32.mrf.mxu3  ;;  %8784 = vst [vmem:[#allocation9_spill] sm:$0xff] %v7284_v6 }
 0x148   : > { %v7278_v35 = vadd.f32 %v834_v32, %v673_v30 }
 0x14a   : > { %8782 = vst [vmem:[#allocation7_spill] sm:$0xff] %v7278_v35  ;;  %v640_v41 = vpop.f32.mrf.mxu0 }
 0x14b   : > { %v801_v36 = vpop.f32.mrf.mxu1 }
 0x14c   : > { %v7280_v49 = vadd.f32 %v801_v36, %v640_v41  ;;  %v1618_v36 = vld [vmem:[#allocation2 + $0xc2] sm:$0xff] }
 0x14e   : > { %v675_v53 = vpop.f32.mrf.mxu2 }
 0x14f   : > { %v836_v55 = vpop.f32.mrf.mxu3 }
 0x150   : > { %v7282_v3 = vadd.f32 %v836_v55, %v675_v53 }
 0x152   : > { %8783 = vst [vmem:[#allocation8_spill] sm:$0xff] %v7282_v3  ;;  %v643_v26 = vpop.f32.mrf.mxu0  ;;  %v1624_v3 = vld [vmem:[#allocation2 + $0x10a] sm:$0xff] }
 0x153   : > { %v804_v7 = vpop.f32.mrf.mxu1  ;;  %5822 = vmatmul.msk.bf16.gmra.mxu2 %vm266_vm0, %v7248_v0 }
 0x154   : > { %5862 = vmatmul.msk.bf16.gmra.mxu3 %vm266_vm0, %v7123_v27  ;;  %v7290_v18 = vadd.f32 %v804_v7, %v643_v26  ;;  %v1619_v27 = vld [vmem:[#allocation2 + $0xca] sm:$0xff] }
 0x155   : > { %5903 = vmatmul.msk.bf16.gmra.mxu0 %vm266_vm0, %v7140_v47  ;;  %v7302_v55 = vpack.c.bf16 %v1619_v27, %v1618_v36  ;;  %v6519_v26 = vld [vmem:[%s8770_s1 + $0xc8] sm:$0xff] }
 0x156   : > { %5943 = vmatmul.msk.bf16.gmra.mxu1 %vm266_vm0, %v7284_v6  ;;  %v678_v14 = vpop.f32.mrf.mxu2  ;;  %v6523_v7 = vld [vmem:[%s8770_s1 + $0xe8] sm:$0xff]  ;;  %1990 = vmatpush.bf16.msra.mxu2 %v6519_v26 }
 0x157   : > { %v839_v20 = vpop.f32.mrf.mxu3  ;;  %8787 = vst [vmem:[#allocation12_spill] sm:$0xff] %v7302_v55  ;;  %2240 = vmatpush.bf16.msra.mxu3 %v6523_v7 }
 0x158   : > { %v7296_v42 = vadd.f32 %v839_v20, %v678_v14 }
 0x15a   : > { %8785 = vst [vmem:[#allocation10_spill] sm:$0xff] %v7296_v42  ;;  %v645_v61 = vpop.f32.mrf.mxu0 }
 0x15b   : > { %v806_v28 = vpop.f32.mrf.mxu1 }
 0x15c   : > { %v7298_v30 = vadd.f32 %v806_v28, %v645_v61 }
 0x15e   : > { %v680_v32 = vpop.f32.mrf.mxu2 }
 0x15f   : > { %v841_v41 = vpop.f32.mrf.mxu3 }
 0x160   : > { %v7300_v53 = vadd.f32 %v841_v41, %v680_v32  ;;  %v6527_v41 = vld [vmem:[%s8770_s1 + $0x108] sm:$0xff] }
 0x161   : > { %2490 = vmatpush.bf16.msra.mxu0 %v6527_v41 }
 0x162   : > { %8786 = vst [vmem:[#allocation11_spill] sm:$0xff] %v7300_v53  ;;  %v648_v47 = vpop.f32.mrf.mxu0 }
 0x163   : > { %v809_v58 = vpop.f32.mrf.mxu1  ;;  %5823 = vmatmul.msk.bf16.gmra.mxu2 %vm266_vm0, %v7266_v23 }
 0x164   : > { %5863 = vmatmul.msk.bf16.gmra.mxu3 %vm266_vm0, %v7142_v48  ;;  %v7308_v2 = vadd.f32 %v809_v58, %v648_v47  ;;  %v1621_v47 = vld [vmem:[#allocation2 + $0xe2] sm:$0xff] }
 0x165   : > { %5904 = vmatmul.msk.bf16.gmra.mxu0 %vm266_vm0, %v6979_v37  ;;  %v1620_v37 = vld [vmem:[#allocation2 + $0xda] sm:$0xff] }
 0x166   : > { %5944 = vmatmul.msk.bf16.gmra.mxu1 %vm266_vm0, %v7302_v55  ;;  %v683_v14 = vpop.f32.mrf.mxu2  ;;  %v7329_v53 = vpack.c.bf16 %v1621_v47, %v1620_v37  ;;  %v1623_v47 = vld [vmem:[#allocation2 + $0xfa] sm:$0xff] }
 0x167   : > { %v844_v20 = vpop.f32.mrf.mxu3 }
 0x168   : > { %v7320_v48 = vadd.f32 %v844_v20, %v683_v14  ;;  %v6545_v14 = vld [vmem:[%s8772_s3 + $0x78] sm:$0xff] }
 0x169   : > { %2937 = vmatpush.bf16.msra.mxu1 %v6545_v14 }
 0x16a   : > { %8788 = vst [vmem:[#allocation13_spill] sm:$0xff] %v7320_v48  ;;  %v650_v61 = vpop.f32.mrf.mxu0 }
 0x16b   : > { %v811_v28 = vpop.f32.mrf.mxu1 }
 0x16c   : > { %v7322_v32 = vadd.f32 %v811_v28, %v650_v61 }
 0x16e   : > { %v685_v36 = vpop.f32.mrf.mxu2 }
 0x16f   : > { %v846_v27 = vpop.f32.mrf.mxu3 }
 0x170   : > { %v7327_v58 = vadd.f32 %v846_v27, %v685_v36 }
 0x172   : > { %8789 = vst [vmem:[#allocation14_spill] sm:$0xff] %v7327_v58  ;;  %v1492_v26 = vpop.f32.mrf.mxu0 }
 0x173   : > { %v1742_v7 = vpop.f32.mrf.mxu1  ;;  %5824 = vmatmul.msk.bf16.gmra.mxu2 %vm266_vm0, %v7284_v6 }
 0x174   : > { %5864 = vmatmul.msk.bf16.gmra.mxu3 %vm266_vm0, %v6981_v38  ;;  %v1622_v38 = vld [vmem:[#allocation2 + $0xf2] sm:$0xff] }
 0x175   : > { %5905 = vmatmul.msk.bf16.gmra.mxu0 %vm266_vm0, %v7011_v62  ;;  %v7346_v48 = vpack.c.bf16 %v1623_v47, %v1622_v38 }
 0x176   : > { %5945 = vmatmul.msk.bf16.gmra.mxu1 %vm266_vm0, %v7329_v53  ;;  %v688_v20 = vpop.f32.mrf.mxu2 }
 0x177   : > { %v849_v61 = vpop.f32.mrf.mxu3 }
 0x178   : > { %v7342_v28 = vadd.f32 %v849_v61, %v688_v20 }
 0x17a   : > { %8790 = vst [vmem:[#allocation15_spill] sm:$0xff] %v7342_v28  ;;  %v1494_v41 = vpop.f32.mrf.mxu0 }
 0x17b   : > { %v1744_v36 = vpop.f32.mrf.mxu1 }
 0x17e   : > { %v690_v27 = vpop.f32.mrf.mxu2 }
 0x17f   : > { %v851_v37 = vpop.f32.mrf.mxu3 }
 0x180   : > { %v7344_v58 = vadd.f32 %v851_v37, %v690_v27 }
 0x182   : > { %8791 = vst [vmem:[#allocation16_spill] sm:$0xff] %v7344_v58  ;;  %v1497_v42 = vpop.f32.mrf.mxu0  ;;  %v777_v58 = vadd.f32 %v7185_v12, %v7183_v11  ;;  %v6544_v11 = vld [vmem:[%s8772_s3 + $0x70] sm:$0xff] }
 0x183   : > { %v1747_v62 = vpop.f32.mrf.mxu1  ;;  %5825 = vmatmul.msk.bf16.gmra.mxu2 %vm266_vm0, %v7302_v55  ;;  %2938 = vmatpush.bf16.msra.mxu1 %v6544_v11 }
 0x184   : > { %5865 = vmatmul.msk.bf16.gmra.mxu3 %vm266_vm0, %v7013_v63 }
 0x185   : > { %5906 = vmatmul.msk.bf16.gmra.mxu0 %vm266_vm0, %v7033_v16  ;;  %v1625_v16 = vld [vmem:[#allocation2 + $0x112] sm:$0xff] }
 0x186   : > { %5946 = vmatmul.msk.bf16.gmra.mxu1 %vm266_vm0, %v7346_v48  ;;  %v992_v14 = vpop.f32.mrf.mxu2  ;;  %v7361_v21 = vpack.c.bf16 %v1625_v16, %v1624_v3 }
 0x187   : > { %v1242_v20 = vpop.f32.mrf.mxu3  ;;  %v1072_v61 = vadd.f32 %v992_v14, %v7151_v52  ;;  %v1626_v14 = vld [vmem:[#allocation2 + $0x122] sm:$0xff] }
 0x189   : > { %v1322_v27 = vadd.f32 %v1242_v20, %v1072_v61  ;;  %v1627_v20 = vld [vmem:[#allocation2 + $0x12a] sm:$0xff] }
 0x18a   : > { %v1499_v37 = vpop.f32.mrf.mxu0 }
 0x18b   : > { %v1749_v38 = vpop.f32.mrf.mxu1  ;;  %v1572_v47 = vadd.f32 %v1492_v26, %v1322_v27  ;;  %v7380_v27 = vpack.c.bf16 %v1627_v20, %v1626_v14 }
 0x18d   : > { %v7359_v28 = vadd.f32 %v1742_v7, %v1572_v47 }
 0x18e   : > { %v994_v63 = vpop.f32.mrf.mxu2 }
 0x18f   : > { %v1244_v55 = vpop.f32.mrf.mxu3  ;;  %v1073_v35 = vadd.f32 %v994_v63, %v777_v58 }
 0x191   : > { %v1323_v6 = vadd.f32 %v1244_v55, %v1073_v35 }
 0x192   : > { %v1502_v5 = vpop.f32.mrf.mxu0 }
 0x193   : > { %v1752_v23 = vpop.f32.mrf.mxu1  ;;  %5826 = vmatmul.msk.bf16.gmra.mxu2 %vm266_vm0, %v7329_v53  ;;  %v1573_v52 = vadd.f32 %v1494_v41, %v1323_v6 }
 0x194   : > { %5866 = vmatmul.msk.bf16.gmra.mxu3 %vm266_vm0, %v7035_v17 }
 0x195   : > { %v7370_v12 = vadd.f32 %v1744_v36, %v1573_v52  ;;  %5907 = vmatmul.msk.bf16.gmra.mxu0 %vm266_vm0, %v7064_v39 }
 0x196   : > { %5947 = vmatmul.msk.bf16.gmra.mxu1 %vm266_vm0, %v7361_v21  ;;  %v997_v35 = vpop.f32.mrf.mxu2 }
 0x197   : > { %v1247_v3 = vpop.f32.mrf.mxu3  ;;  %v1074_v55 = vadd.f32 %v997_v35, %v7192_v43 }
 0x199   : > { %v1324_v58 = vadd.f32 %v1247_v3, %v1074_v55 }
 0x19a   : > { %v1504_v17 = vpop.f32.mrf.mxu0 }
 0x19b   : > { %v1754_v6 = vpop.f32.mrf.mxu1  ;;  %v1574_v26 = vadd.f32 %v1497_v42, %v1324_v58  ;;  %v6518_v42 = vld [vmem:[%s8770_s1 + $0xc0] sm:$0xff] }
 0x19c   : > { %1991 = vmatpush.bf16.msra.mxu2 %v6518_v42 }
 0x19d   : > { %v7377_v7 = vadd.f32 %v1747_v62, %v1574_v26  ;;  %v1628_v26 = vld [vmem:[#allocation2 + $0x13a] sm:$0xff] }
 0x19e   : > { %v999_v41 = vpop.f32.mrf.mxu2 }
 0x19f   : > { %v1249_v36 = vpop.f32.mrf.mxu3  ;;  %v1075_v39 = vadd.f32 %v999_v41, %v7200_v34  ;;  %v6522_v34 = vld [vmem:[%s8770_s1 + $0xe0] sm:$0xff] }
 0x1a0   : > { %2241 = vmatpush.bf16.msra.mxu3 %v6522_v34  ;;  %v1629_v41 = vld [vmem:[#allocation2 + $0x142] sm:$0xff] }
 0x1a1   : > { %v1325_v61 = vadd.f32 %v1249_v36, %v1075_v39 }
 0x1a2   : > { %v1507_v47 = vpop.f32.mrf.mxu0 }
 0x1a3   : > { %v1757_v63 = vpop.f32.mrf.mxu1  ;;  %5827 = vmatmul.msk.bf16.gmra.mxu2 %vm266_vm0, %v7346_v48  ;;  %v1575_v43 = vadd.f32 %v1499_v37, %v1325_v61 }
 0x1a4   : > { %5867 = vmatmul.msk.bf16.gmra.mxu3 %vm266_vm0, %v7066_v40 }
 0x1a5   : > { %v7389_v62 = vadd.f32 %v1749_v38, %v1575_v43  ;;  %5908 = vmatmul.msk.bf16.gmra.mxu0 %vm266_vm0, %v7086_v59  ;;  %v6526_v59 = vld [vmem:[%s8770_s1 + $0x100] sm:$0xff] }
 0x1a6   : > { %5948 = vmatmul.msk.bf16.gmra.mxu1 %vm266_vm0, %v7380_v27  ;;  %v1002_v16 = vpop.f32.mrf.mxu2  ;;  %2491 = vmatpush.bf16.msra.mxu0 %v6526_v59 }
 0x1a7   : > { %v1252_v52 = vpop.f32.mrf.mxu3  ;;  %v1076_v40 = vadd.f32 %v1002_v16, %v7209_v54  ;;  %v7405_v54 = vpack.c.bf16 %v1629_v41, %v1628_v26 }
 0x1a9   : > { %v1326_v37 = vadd.f32 %v1252_v52, %v1076_v40 }
 0x1aa   : > { %v1509_v11 = vpop.f32.mrf.mxu0 }
 0x1ab   : > { %v1759_v38 = vpop.f32.mrf.mxu1  ;;  %v1576_v35 = vadd.f32 %v1502_v5, %v1326_v37  ;;  %v1630_v37 = vld [vmem:[#allocation2 + $0x152] sm:$0xff] }
 0x1ad   : > { %v7399_v3 = vadd.f32 %v1752_v23, %v1576_v35  ;;  %v6543_v23 = vld [vmem:[%s8772_s3 + $0x68] sm:$0xff] }
 0x1ae   : > { %v1004_v55 = vpop.f32.mrf.mxu2  ;;  %2939 = vmatpush.bf16.msra.mxu1 %v6543_v23 }
 0x1af   : > { %v1254_v58 = vpop.f32.mrf.mxu3  ;;  %v1077_v36 = vadd.f32 %v1004_v55, %v7217_v4 }
 0x1b1   : > { %v1327_v14 = vadd.f32 %v1254_v58, %v1077_v36 }
 0x1b2   : > { %v1512_v20 = vpop.f32.mrf.mxu0 }
 0x1b3   : > { %v1762_v39 = vpop.f32.mrf.mxu1  ;;  %5828 = vmatmul.msk.bf16.gmra.mxu2 %vm266_vm0, %v7361_v21  ;;  %v1577_v5 = vadd.f32 %v1504_v17, %v1327_v14 }
 0x1b4   : > { %5868 = vmatmul.msk.bf16.gmra.mxu3 %vm266_vm0, %v7088_v60 }
 0x1b5   : > { %v7414_v61 = vadd.f32 %v1754_v6, %v1577_v5  ;;  %5909 = vmatmul.msk.bf16.gmra.mxu0 %vm266_vm0, %v7117_v24  ;;  %v1631_v24 = vld [vmem:[#allocation2 + $0x15a] sm:$0xff] }
 0x1b6   : > { %5949 = vmatmul.msk.bf16.gmra.mxu1 %vm266_vm0, %v7405_v54  ;;  %v1007_v4 = vpop.f32.mrf.mxu2  ;;  %v7426_v55 = vpack.c.bf16 %v1631_v24, %v1630_v37 }
 0x1b7   : > { %v1257_v43 = vpop.f32.mrf.mxu3  ;;  %v1078_v42 = vadd.f32 %v1007_v4, %v7227_v15 }
 0x1b9   : > { %v1328_v34 = vadd.f32 %v1257_v43, %v1078_v42  ;;  %v1632_v42 = vld [vmem:[#allocation2 + $0x16a] sm:$0xff] }
 0x1ba   : > { %v1514_v60 = vpop.f32.mrf.mxu0 }
 0x1bb   : > { %v7421_v17 = vpop.f32.mrf.mxu1  ;;  %v1578_v16 = vadd.f32 %v1507_v47, %v1328_v34  ;;  %v6680_v47 = vld [vmem:[%s6954_s26 + $0x78] sm:$0xff]  }
 0x1bc   : > { %v6665_v41 = vunpack.c.h.bf16 %v6680_v47  ;;  %v1633_v34 = vld [vmem:[#allocation2 + $0x172] sm:$0xff] }
 0x1bd   : > { %v7423_v52 = vadd.f32 %v1757_v63, %v1578_v16 }
 0x1be   : > { %v1009_v6 = vpop.f32.mrf.mxu2  ;;  %418 = vst.msk [vmem:[#allocation2 + $0x189] sm:$0xff] %vm266_vm0, %v6665_v41 }
 0x1bf   : > { %v1259_v40 = vpop.f32.mrf.mxu3  ;;  %v1079_v35 = vadd.f32 %v1009_v6, %v7244_v33  ;;  %v6664_v33 = vunpack.c.l.bf16 %v6680_v47 }
 0x1c1   : > { %v1329_v59 = vadd.f32 %v1259_v40, %v1079_v35  ;;  %417 = vst.msk [vmem:[#allocation2 + $0x181] sm:$0xff] %vm266_vm0, %v6664_v33  ;;  %v7447_v40 = vpack.c.bf16 %v1633_v34, %v1632_v42 }
 0x1c2   : > { %v1517_v58 = vpop.f32.mrf.mxu0 }
 0x1c3   : > { %v1767_v26 = vpop.f32.mrf.mxu1  ;;  %5829 = vmatmul.msk.bf16.gmra.mxu2 %vm266_vm0, %v7380_v27  ;;  %v1579_v15 = vadd.f32 %v1509_v11, %v1329_v59 }
 0x1c4   : > { %5869 = vmatmul.msk.bf16.gmra.mxu3 %vm266_vm0, %v7119_v25 }
 0x1c5   : > { %v7433_v63 = vadd.f32 %v1759_v38, %v1579_v15  ;;  %5910 = vmatmul.msk.bf16.gmra.mxu0 %vm266_vm0, %v7136_v45 }
 0x1c6   : > { %5950 = vmatmul.msk.bf16.gmra.mxu1 %vm266_vm0, %v7426_v55  ;;  %v1012_v36 = vpop.f32.mrf.mxu2 }
 0x1c7   : > { %v1262_v14 = vpop.f32.mrf.mxu3  ;;  %v1080_v5 = vadd.f32 %v1012_v36, %v7254_v56 }
 0x1c8   : > { %v1384_v33 = vld [vmem:[#allocation2 + $0x181] sm:$0xff] }
 0x1c9   : > { %v1330_v25 = vadd.f32 %v1262_v14, %v1080_v5  ;;  %v1385_v14 = vld [vmem:[#allocation2 + $0x189] sm:$0xff] }
 0x1ca   : > { %v1519_v11 = vpop.f32.mrf.mxu0  ;;  %v1635_v5 = vld [vmem:[#allocation2 + $0x18a] sm:$0xff] }
 0x1cb   : > { %v7442_v38 = vpop.f32.mrf.mxu1  ;;  %v1580_v23 = vadd.f32 %v1512_v20, %v1330_v25 }
 0x1cd   : > { %v7444_v4 = vadd.f32 %v1762_v39, %v1580_v23  ;;  %v6542_v39 = vld [vmem:[%s8772_s3 + $0x60] sm:$0xff] }
 0x1ce   : > { %v1014_v45 = vpop.f32.mrf.mxu2  ;;  %2940 = vmatpush.bf16.msra.mxu1 %v6542_v39 }
 0x1cf   : > { %v1264_v43 = vpop.f32.mrf.mxu3  ;;  %v1081_v16 = vadd.f32 %v1014_v45, %v7262_v1  ;;  %v1401_v45 = vpack.c.bf16 %v1385_v14, %v1384_v33 }
 0x1d1   : > { %v1331_v6 = vadd.f32 %v1264_v43, %v1081_v16 }
 0x1d2   : > { %v1522_v56 = vpop.f32.mrf.mxu0 }
 0x1d3   : > { %v1772_v37 = vpop.f32.mrf.mxu1  ;;  %5830 = vmatmul.msk.bf16.gmra.mxu2 %vm266_vm0, %v7405_v54  ;;  %v7453_v20 = vadd.f32 %v1514_v60, %v1331_v6 }
 0x1d4   : > { %5870 = vmatmul.msk.bf16.gmra.mxu3 %vm266_vm0, %v7138_v46 }
 0x1d5   : > { %5911 = vmatmul.msk.bf16.gmra.mxu0 %vm266_vm0, %v7172_v8  ;;  %v1634_v8 = vld [vmem:[#allocation2 + $0x182] sm:$0xff] }
 0x1d6   : > { %5951 = vmatmul.msk.bf16.gmra.mxu1 %vm266_vm0, %v7447_v40  ;;  %v1017_v1 = vpop.f32.mrf.mxu2  ;;  %v7468_v43 = vpack.c.bf16 %v1635_v5, %v1634_v8 }
 0x1d7   : > { %v1267_v24 = vpop.f32.mrf.mxu3  ;;  %v1082_v35 = vadd.f32 %v1017_v1, %v7272_v29 }
 0x1d9   : > { %v1332_v59 = vadd.f32 %v1267_v24, %v1082_v35  ;;  %v1134_v24 = vld [vmem:[#allocation2 + $0x180] sm:$0xff]  ;;  %v1135_v35 = vld [vmem:[#allocation2 + $0x188] sm:$0xff] }
 0x1da   : > { %v1524_v15 = vpop.f32.mrf.mxu0  ;;  %v1151_v33 = vpack.c.bf16 %v1135_v35, %v1134_v24 }
 0x1db   : > { %v7463_v46 = vpop.f32.mrf.mxu1  ;;  %v1582_v60 = vadd.f32 %v1517_v58, %v1332_v59 }
 0x1dd   : > { %v7465_v47 = vadd.f32 %v1767_v26, %v1582_v60 }
 0x1de   : > { %v1019_v41 = vpop.f32.mrf.mxu2 }
 0x1df   : > { %v1269_v36 = vpop.f32.mrf.mxu3  ;;  %v1083_v25 = vadd.f32 %v1019_v41, %v7280_v49 }
 0x1e1   : > { %v1333_v23 = vadd.f32 %v1269_v36, %v1083_v25 }
 0x1e2   : > { %v1527_v29 = vpop.f32.mrf.mxu0 }
 0x1e3   : > { %v1777_v42 = vpop.f32.mrf.mxu1  ;;  %5831 = vmatmul.msk.bf16.gmra.mxu2 %vm266_vm0, %v7426_v55  ;;  %v7474_v58 = vadd.f32 %v1519_v11, %v1333_v23 }
 0x1e4   : > { %5871 = vmatmul.msk.bf16.gmra.mxu3 %vm266_vm0, %v7174_v9 }
 0x1e5   : > { %5912 = vmatmul.msk.bf16.gmra.mxu0 %vm266_vm0, %v1401_v45 }
 0x1e6   : > { %5952 = vmatmul.msk.bf16.gmra.mxu1 %vm266_vm0, %v7468_v43  ;;  %v1022_v49 = vpop.f32.mrf.mxu2 }
 0x1e7   : > { %v1272_v26 = vpop.f32.mrf.mxu3  ;;  %v1084_v34 = vadd.f32 %v1022_v49, %v7290_v18  ;;  %v1855_v49 = vld [vmem:[#allocation2 + $0x30] sm:$0xff] }
 0x1e9   : > { %v1334_v16 = vadd.f32 %v1272_v26, %v1084_v34  ;;  %v2105_v26 = vld [vmem:[#allocation2 + $0x31] sm:$0xff]  ;;  %v2106_v34 = vld [vmem:[#allocation2 + $0x39] sm:$0xff] }
 0x1ea   : > { %v1529_v6 = vpop.f32.mrf.mxu0 }
 0x1eb   : > { %v7480_v39 = vpop.f32.mrf.mxu1  ;;  %v1584_v1 = vadd.f32 %v1522_v56, %v1334_v16  ;;  %v6541_v56 = vld [vmem:[%s8772_s3 + $0x58] sm:$0xff] }
 0x1ec   : > { %2941 = vmatpush.bf16.msra.mxu1 %v6541_v56 }
 0x1ed   : > { %v7482_v59 = vadd.f32 %v1772_v37, %v1584_v1 }
 0x1ee   : > { %v1024_v9 = vpop.f32.mrf.mxu2 }
 0x1ef   : > { %v1274_v11 = vpop.f32.mrf.mxu3  ;;  %v1085_v60 = vadd.f32 %v1024_v9, %v7298_v30  ;;  %v2137_v9 = vpack.c.bf16 %v2106_v34, %v2105_v26 }
 0x1f1   : > { %v1335_v41 = vadd.f32 %v1274_v11, %v1085_v60 }
 0x1f2   : > { %v1532_v36 = vpop.f32.mrf.mxu0 }
 0x1f3   : > { %v1782_v14 = vpop.f32.mrf.mxu1  ;;  %5832 = vmatmul.msk.bf16.gmra.mxu2 %vm266_vm0, %v7447_v40  ;;  %v7488_v18 = vadd.f32 %v1524_v15, %v1335_v41  ;;  %v1856_v15 = vld [vmem:[#allocation2 + $0x38] sm:$0xff] }
 0x1f4   : > { %5872 = vmatmul.msk.bf16.gmra.mxu3 %vm266_vm0, %v1151_v33  ;;  %v1887_v35 = vpack.c.bf16 %v1856_v15, %v1855_v49  ;;  %v2108_v49 = vld [vmem:[#allocation2 + $0x51] sm:$0xff] }
 0x1f5   : > { %6057 = vmatmul.msk.bf16.vlgmr.msra.gmra.mxu0 %vm266_vm0, %v7187_v22 }
 0x1f6   : > { %v1027_v30 = vpop.f32.mrf.mxu2 }
 0x1f7   : > { %v1277_v37 = vpop.f32.mrf.mxu3  ;;  %v1086_v8 = vadd.f32 %v1027_v30, %v7308_v2 }
 0x1f9   : > { %v1336_v5 = vadd.f32 %v1277_v37, %v1086_v8  ;;  %v1857_v37 = vld [vmem:[#allocation2 + $0x48] sm:$0xff] }
 0x1fa   : > { %v1534_v25 = vpop.f32.mrf.mxu0 }
 0x1fb   : > { %v7496_v23 = vpop.f32.mrf.mxu1  ;;  %v1586_v45 = vadd.f32 %v1527_v29, %v1336_v5  ;;  %v1858_v5 = vld [vmem:[#allocation2 + $0x50] sm:$0xff] }
 0x1fd   : > { %v7498_v16 = vadd.f32 %v1777_v42, %v1586_v45  ;;  %v2107_v45 = vld [vmem:[#allocation2 + $0x49] sm:$0xff] }
 0x1fe   : > { %v1029_v1 = vpop.f32.mrf.mxu2 }
 0x1ff   : > { %v1279_v24 = vpop.f32.mrf.mxu3  ;;  %v1087_v22 = vadd.f32 %v1029_v1, %v7322_v32  ;;  %v2138_v1 = vpack.c.bf16 %v2108_v49, %v2107_v45 }
 0x201   : > { %v1337_v11 = vadd.f32 %v1279_v24, %v1087_v22 }
 0x202   : > { %v1537_v60 = vpop.f32.mrf.mxu0 }
 0x203   : > { %v1787_v2 = vpop.f32.mrf.mxu1  ;;  %5977 = vmatmul.msk.bf16.vlgmr.msra.gmra.mxu2 %vm266_vm0, %v1887_v35  ;;  %v7503_v29 = vadd.f32 %v1529_v6, %v1337_v11 }
 0x204   : > { %6017 = vmatmul.msk.bf16.vlgmr.msra.gmra.mxu3 %vm266_vm0, %v2137_v9 }
 0x205   : > { %6058 = vmatmul.msk.bf16.gmra.mxu0 %vm266_vm0, %v7204_v51  ;;  %v1888_v51 = vpack.c.bf16 %v1858_v5, %v1857_v37 }
 0x206   : > { %v1032_v42 = vpop.f32.mrf.mxu2 }
 0x207   : > { %v1282_v33 = vpop.f32.mrf.mxu3  ;;  %v1088_v41 = vadd.f32 %v1032_v42, %v7198_v31 }
 0x209   : > { %v1338_v56 = vadd.f32 %v1282_v33, %v1088_v41  ;;  %v1859_v41 = vld [vmem:[#allocation2 + $0x60] sm:$0xff] }
 0x20a   : > { %v1539_v32 = vpop.f32.mrf.mxu0 }
 0x20b   : > { %v1588_v30 = vadd.f32 %v1532_v36, %v1338_v56  ;;  %v7508_v8 = vpop.f32.mrf.mxu1  ;;  %v6540_v36 = vld [vmem:[%s8772_s3 + $0x50] sm:$0xff]  ;;  %v1860_v56 = vld [vmem:[#allocation2 + $0x68] sm:$0xff] }
 0x20c   : > { %2942 = vmatpush.bf16.msra.mxu1 %v6540_v36 }
 0x20d   : > { %v7510_v15 = vadd.f32 %v1782_v14, %v1588_v30  ;;  %v2110_v30 = vld [vmem:[#allocation2 + $0x69] sm:$0xff] }
 0x20e   : > { %v1034_v6 = vpop.f32.mrf.mxu2 }
 0x20f   : > { %v1284_v26 = vpop.f32.mrf.mxu3  ;;  %v1089_v34 = vadd.f32 %v1034_v6, %v7202_v50 }
 0x211   : > { %v1339_v24 = vadd.f32 %v1284_v26, %v1089_v34 }
 0x212   : > { %v1542_v22 = vpop.f32.mrf.mxu0 }
 0x213   : > { %5978 = vmatmul.msk.bf16.gmra.mxu2 %vm266_vm0, %v1888_v51  ;;  %v7515_v31 = vadd.f32 %v1534_v25, %v1339_v24  ;;  %v1792_v14 = vpop.f32.mrf.mxu1  ;;  %v2109_v25 = vld [vmem:[#allocation2 + $0x61] sm:$0xff] }
 0x214   : > { %6018 = vmatmul.msk.bf16.gmra.mxu3 %vm266_vm0, %v2138_v1  ;;  %v2139_v6 = vpack.c.bf16 %v2110_v30, %v2109_v25 }
 0x215   : > { %6059 = vmatmul.msk.bf16.gmra.mxu0 %vm266_vm0, %v7221_v13  ;;  %v1889_v13 = vpack.c.bf16 %v1860_v56, %v1859_v41 }
 0x216   : > { %v1037_v50 = vpop.f32.mrf.mxu2 }
 0x217   : > { %v1287_v35 = vpop.f32.mrf.mxu3  ;;  %v1090_v9 = vadd.f32 %v1037_v50, %v7215_v57 }
 0x219   : > { %v1340_v11 = vadd.f32 %v1287_v35, %v1090_v9  ;;  %v1861_v35 = vld [vmem:[#allocation2 + $0x78] sm:$0xff]  ;;  %v1862_v9 = vld [vmem:[#allocation2 + $0x80] sm:$0xff] }
 0x21a   : > { %v1544_v42 = vpop.f32.mrf.mxu0  ;;  %v1890_v30 = vpack.c.bf16 %v1862_v9, %v1861_v35  ;;  %v2114_v35 = vld [vmem:[#allocation2 + $0x99] sm:$0xff] }
 0x21b   : > { %v1590_v33 = vadd.f32 %v1537_v60, %v1340_v11  ;;  %v7526_v26 = vpop.f32.mrf.mxu1  ;;  %v2111_v11 = vld [vmem:[#allocation2 + $0x79] sm:$0xff] }
 0x21d   : > { %v7523_v37 = vadd.f32 %v1787_v2, %v1590_v33  ;;  %v2112_v33 = vld [vmem:[#allocation2 + $0x81] sm:$0xff] }
 0x21e   : > { %v1039_v5 = vpop.f32.mrf.mxu2 }
 0x21f   : > { %v1289_v45 = vpop.f32.mrf.mxu3  ;;  %v1091_v49 = vadd.f32 %v1039_v5, %v7219_v10 }
 0x221   : > { %v1341_v34 = vadd.f32 %v1289_v45, %v1091_v49  ;;  %v8793_v49 = vld [vmem:[#allocation6_spill] sm:$0xff] }
 0x222   : > { %v1547_v51 = vpop.f32.mrf.mxu0 }
 0x223   : > { %5979 = vmatmul.msk.bf16.gmra.mxu2 %vm266_vm0, %v1889_v13  ;;  %v7530_v57 = vadd.f32 %v1539_v32, %v1341_v34  ;;  %v1797_v24 = vpop.f32.mrf.mxu1 }
 0x224   : > { %6019 = vmatmul.msk.bf16.gmra.mxu3 %vm266_vm0, %v2139_v6  ;;  %v8794_v6 = vld [vmem:[#allocation4_spill] sm:$0xff] }
 0x225   : > { %6060 = vmatmul.msk.bf16.gmra.mxu0 %vm266_vm0, %v7248_v0  ;;  %v2140_v0 = vpack.c.bf16 %v2112_v33, %v2111_v11 }
 0x226   : > { %v1042_v60 = vpop.f32.mrf.mxu2 }
 0x227   : > { %v1292_v2 = vpop.f32.mrf.mxu3  ;;  %v1092_v1 = vadd.f32 %v1042_v60, %v7239_v19 }
 0x229   : > { %v1342_v10 = vadd.f32 %v1292_v2, %v1092_v1 }
 0x22a   : > { %v1549_v36 = vpop.f32.mrf.mxu0 }
 0x22b   : > { %v1592_v50 = vadd.f32 %v1542_v22, %v1342_v10  ;;  %v7542_v22 = vpop.f32.mrf.mxu1  ;;  %v1863_v10 = vld [vmem:[#allocation2 + $0x90] sm:$0xff] }
 0x22c   : > { %8792 = vst [vmem:[#allocation17_spill] sm:$0xff] %v7542_v22 }
 0x22d   : > { %v7535_v41 = vadd.f32 %v1792_v14, %v1592_v50  ;;  %v6539_v14 = vld [vmem:[%s8772_s3 + $0x48] sm:$0xff]  ;;  %v2113_v50 = vld [vmem:[#allocation2 + $0x91] sm:$0xff] }
 0x22e   : > { %v1044_v56 = vpop.f32.mrf.mxu2  ;;  %2943 = vmatpush.bf16.msra.mxu1 %v6539_v14 }
 0x22f   : > { %v1294_v32 = vpop.f32.mrf.mxu3  ;;  %v1093_v25 = vadd.f32 %v1044_v56, %v7246_v44 }
 0x231   : > { %v1343_v5 = vadd.f32 %v1294_v32, %v1093_v25  ;;  %v8795_v32 = vld [vmem:[#allocation5_spill] sm:$0xff] }
 0x232   : > { %v1552_v45 = vpop.f32.mrf.mxu0 }
 0x233   : > { %5980 = vmatmul.msk.bf16.gmra.mxu2 %vm266_vm0, %v1890_v30  ;;  %v7540_v19 = vadd.f32 %v1544_v42, %v1343_v5  ;;  %v1864_v42 = vld [vmem:[#allocation2 + $0x98] sm:$0xff]  ;;  %v1802_v11 = vpop.f32.mrf.mxu1 }
 0x234   : > { %6020 = vmatmul.msk.bf16.gmra.mxu3 %vm266_vm0, %v2140_v0  ;;  %v1891_v30 = vpack.c.bf16 %v1864_v42, %v1863_v10  ;;  %v2141_v0 = vpack.c.bf16 %v2114_v35, %v2113_v50  ;;  %v1865_v42 = vld [vmem:[#allocation2 + $0xa8] sm:$0xff]  ;;  %v1866_v50 = vld [vmem:[#allocation2 + $0xb0] sm:$0xff] }
 0x235   : > { %6061 = vmatmul.msk.bf16.gmra.mxu0 %vm266_vm0, %v8793_v49  ;;  %v8796_v49 = vld [vmem:[#allocation9_spill] sm:$0xff] }
 0x236   : > { %v1047_v44 = vpop.f32.mrf.mxu2  ;;  %v2115_v35 = vld [vmem:[#allocation2 + $0xa9] sm:$0xff] }
 0x237   : > { %v1297_v13 = vpop.f32.mrf.mxu3  ;;  %v1094_v34 = vadd.f32 %v1047_v44, %v8794_v6 }
 0x239   : > { %v1344_v60 = vadd.f32 %v1297_v13, %v1094_v34  ;;  %v8797_v13 = vld [vmem:[#allocation7_spill] sm:$0xff] }
 0x23a   : > { %v1554_v2 = vpop.f32.mrf.mxu0 }
 0x23b   : > { %v1594_v1 = vadd.f32 %v1547_v51, %v1344_v60  ;;  %v7560_v34 = vpop.f32.mrf.mxu1 }
 0x23c   : > { %8798 = vst [vmem:[#allocation6_spill] sm:$0xff] %v7560_v34 }
 0x23d   : > { %v7550_v9 = vadd.f32 %v1797_v24, %v1594_v1 }
 0x23e   : > { %v1049_v33 = vpop.f32.mrf.mxu2 }
 0x23f   : > { %v1299_v56 = vpop.f32.mrf.mxu3  ;;  %v1095_v25 = vadd.f32 %v1049_v33, %v8795_v32  ;;  %v2116_v33 = vld [vmem:[#allocation2 + $0xb1] sm:$0xff] }
 0x241   : > { %v1345_v5 = vadd.f32 %v1299_v56, %v1095_v25  ;;  %v8800_v25 = vld [vmem:[#allocation8_spill] sm:$0xff] }
 0x242   : > { %v1557_v14 = vpop.f32.mrf.mxu0 }
 0x243   : > { %5981 = vmatmul.msk.bf16.gmra.mxu2 %vm266_vm0, %v1891_v30  ;;  %v7555_v51 = vadd.f32 %v1549_v36, %v1345_v5  ;;  %v2142_v5 = vpack.c.bf16 %v2116_v33, %v2115_v35  ;;  %v1807_v22 = vpop.f32.mrf.mxu1  ;;  %v1867_v33 = vld [vmem:[#allocation2 + $0xc0] sm:$0xff] }
 0x244   : > { %6021 = vmatmul.msk.bf16.gmra.mxu3 %vm266_vm0, %v2141_v0  ;;  %v1892_v0 = vpack.c.bf16 %v1866_v50, %v1865_v42 }
 0x245   : > { %6062 = vmatmul.msk.bf16.gmra.mxu0 %vm266_vm0, %v8796_v49 }
 0x246   : > { %v1052_v24 = vpop.f32.mrf.mxu2 }
 0x247   : > { %v1302_v44 = vpop.f32.mrf.mxu3  ;;  %v1096_v6 = vadd.f32 %v1052_v24, %v8797_v13 }
 0x249   : > { %v1346_v60 = vadd.f32 %v1302_v44, %v1096_v6  ;;  %v8802_v44 = vld [vmem:[#allocation12_spill] sm:$0xff] }
 0x24a   : > { %v1559_v1 = vpop.f32.mrf.mxu0 }
 0x24b   : > { %v1596_v10 = vadd.f32 %v1552_v45, %v1346_v60  ;;  %v8803_v60 = vld [vmem:[#allocation10_spill] sm:$0xff] }
 0x24d   : > { %v7562_v56 = vadd.f32 %v1802_v11, %v1596_v10  ;;  %v6538_v11 = vld [vmem:[%s8772_s3 + $0x40] sm:$0xff] }
 0x24e   : > { %v1054_v36 = vpop.f32.mrf.mxu2  ;;  %2944 = vmatpush.bf16.msra.mxu1 %v6538_v11 }
 0x24f   : > { %8799 = vst [vmem:[#allocation4_spill] sm:$0xff] %v7562_v56  ;;  %v1304_v32 = vpop.f32.mrf.mxu3  ;;  %v1097_v30 = vadd.f32 %v1054_v36, %v8800_v25  ;;  %v7575_v36 = vpop.f32.mrf.mxu1  ;;  %v2118_v25 = vld [vmem:[#allocation2 + $0xc9] sm:$0xff]  ;;  %v2824_v56 = vld [vmem:[#allocation3 + $0x1] sm:$0xff] }
 0x250   : > { %8804 = vst [vmem:[#allocation9_spill] sm:$0xff] %v7575_v36 }
 0x251   : > { %v1347_v49 = vadd.f32 %v1304_v32, %v1097_v30  ;;  %v2117_v32 = vld [vmem:[#allocation2 + $0xc1] sm:$0xff] }
 0x252   : > { %v1562_v24 = vpop.f32.mrf.mxu0  ;;  %v2143_v34 = vpack.c.bf16 %v2118_v25, %v2117_v32 }
 0x253   : > { %5982 = vmatmul.msk.bf16.gmra.mxu2 %vm266_vm0, %v1892_v0  ;;  %v7567_v45 = vadd.f32 %v1554_v2, %v1347_v49  ;;  %v1868_v2 = vld [vmem:[#allocation2 + $0xc8] sm:$0xff]  ;;  %v8805_v49 = vld [vmem:[#allocation11_spill] sm:$0xff] }
 0x254   : > { %6022 = vmatmul.msk.bf16.gmra.mxu3 %vm266_vm0, %v2142_v5  ;;  %v1893_v11 = vpack.c.bf16 %v1868_v2, %v1867_v33 }
 0x255   : > { %8801 = vst [vmem:[#allocation5_spill] sm:$0xff] %v7567_v45  ;;  %6063 = vmatmul.msk.bf16.gmra.mxu0 %vm266_vm0, %v8802_v44 }
 0x256   : > { %v1057_v13 = vpop.f32.mrf.mxu2 }
 0x257   : > { %v1307_v6 = vpop.f32.mrf.mxu3  ;;  %v1098_v10 = vadd.f32 %v1057_v13, %v8803_v60  ;;  %v2825_v13 = vld [vmem:[#allocation3 + $0x9] sm:$0xff] }
 0x258   : > { %v2856_v60 = vpack.c.bf16 %v2825_v13, %v2824_v56  ;;  %v1870_v56 = vld [vmem:[#allocation2 + $0xe0] sm:$0xff] }
 0x259   : > { %v1348_v42 = vadd.f32 %v1307_v6, %v1098_v10 }
 0x25a   : > { %v1564_v50 = vpop.f32.mrf.mxu0  ;;  %2945 = vmatmul.bf16.vlgmr.msra.gmra.mxu1 %v2856_v60 }
 0x25b   : > { %v1598_v35 = vadd.f32 %v1557_v14, %v1348_v42 }
 0x25d   : > { %v7577_v30 = vadd.f32 %v1807_v22, %v1598_v35  ;;  %v1812_v22 = vpop.f32.mrf.mxu1  ;;  %v8806_v35 = vld [vmem:[#allocation13_spill] sm:$0xff] }
 0x25e   : > { %v1059_v0 = vpop.f32.mrf.mxu2 }
 0x25f   : > { %v1309_v5 = vpop.f32.mrf.mxu3  ;;  %v1099_v44 = vadd.f32 %v1059_v0, %v8805_v49  ;;  %v1869_v0 = vld [vmem:[#allocation2 + $0xd8] sm:$0xff]  ;;  %v2120_v49 = vld [vmem:[#allocation2 + $0xe1] sm:$0xff] }
 0x260   : > { %v1894_v13 = vpack.c.bf16 %v1870_v56, %v1869_v0  ;;  %v6561_v56 = vld [vmem:[%s8772_s3 + $0xf8] sm:$0xff] }
 0x261   : > { %v1349_v45 = vadd.f32 %v1309_v5, %v1099_v44  ;;  %v2119_v5 = vld [vmem:[#allocation2 + $0xd9] sm:$0xff]  ;;  %3510 = vmatpush.bf16.msrb.mxu0 %v6561_v56 }
 0x262   : > { %v1567_v6 = vpop.f32.mrf.mxu0  ;;  %v2144_v60 = vpack.c.bf16 %v2120_v49, %v2119_v5  ;;  %v6569_v5 = vld [vmem:[%s8772_s3 + $0x138] sm:$0xff] }
 0x263   : > { %5983 = vmatmul.msk.bf16.gmra.mxu2 %vm266_vm0, %v1893_v11  ;;  %v7582_v14 = vadd.f32 %v1559_v1, %v1349_v45  ;;  %v8807_v45 = vld [vmem:[#allocation14_spill] sm:$0xff]  ;;  %3744 = vmatpush.bf16.msrb.mxu1 %v6569_v5 }
 0x264   : > { %6023 = vmatmul.msk.bf16.gmra.mxu3 %vm266_vm0, %v2143_v34 }
 0x265   : > { %6064 = vmatmul.msk.bf16.gmra.mxu0 %vm266_vm0, %v7329_v53  ;;  %v7590_v53 = vpop.f32.mrf.mxu1 }
 0x266   : > { %v1062_v10 = vpop.f32.mrf.mxu2 }
 0x267   : > { %v1312_v42 = vpop.f32.mrf.mxu3  ;;  %v1100_v33 = vadd.f32 %v1062_v10, %v8806_v35  ;;  %v6537_v10 = vld [vmem:[%s8772_s3 + $0x38] sm:$0xff] }
 0x268   : > { %3074 = vmatpush.bf16.msrb.mxu2 %v6537_v10  ;;  %v8809_v10 = vld [vmem:[#allocation16_spill] sm:$0xff] }
 0x269   : > { %v1350_v2 = vadd.f32 %v1312_v42, %v1100_v33 }
 0x26a   : > { %v1569_v32 = vpop.f32.mrf.mxu0 }
 0x26b   : > { %v1600_v25 = vadd.f32 %v1562_v24, %v1350_v2  ;;  %v6553_v24 = vld [vmem:[%s8772_s3 + $0xb8] sm:$0xff] }
 0x26c   : > { %3276 = vmatpush.bf16.msrb.mxu3 %v6553_v24  ;;  %v8808_v2 = vld [vmem:[#allocation15_spill] sm:$0xff] }
 0x26d   : > { %v7587_v44 = vadd.f32 %v1812_v22, %v1600_v25 }
 0x26e   : > { %v1064_v34 = vpop.f32.mrf.mxu2 }
 0x26f   : > { %v1314_v1 = vpop.f32.mrf.mxu3  ;;  %v1101_v11 = vadd.f32 %v1064_v34, %v8807_v45  ;;  %v1871_v34 = vld [vmem:[#allocation2 + $0xf0] sm:$0xff]  ;;  %v2122_v45 = vld [vmem:[#allocation2 + $0xf9] sm:$0xff] }
 0x271   : > { %v1351_v36 = vadd.f32 %v1314_v1, %v1101_v11  ;;  %v2121_v1 = vld [vmem:[#allocation2 + $0xf1] sm:$0xff] }
 0x272   : > { %v2493_v42 = vpop.f32.mrf.mxu0 }
 0x273   : > { %5984 = vmatmul.msk.bf16.gmra.mxu2 %vm266_vm0, %v1894_v13  ;;  %v7600_v22 = vadd.f32 %v1564_v50, %v1351_v36  ;;  %v1817_v50 = vpop.f32.mrf.mxu1 }
 0x274   : > { %6024 = vmatmul.msk.bf16.gmra.mxu3 %vm266_vm0, %v2144_v60 }
 0x275   : > { %6065 = vmatmul.msk.bf16.gmra.mxu0 %vm266_vm0, %v7346_v48  ;;  %v1872_v48 = vld [vmem:[#allocation2 + $0xf8] sm:$0xff] }
 0x276   : > { %v1067_v35 = vpop.f32.mrf.mxu2 }
 0x277   : > { %v1317_v33 = vpop.f32.mrf.mxu3  ;;  %v1102_v25 = vadd.f32 %v1067_v35, %v8808_v2  ;;  %v1895_v35 = vpack.c.bf16 %v1872_v48, %v1871_v34 }
 0x279   : > { %v1352_v0 = vadd.f32 %v1317_v33, %v1102_v25  ;;  %v2145_v33 = vpack.c.bf16 %v2122_v45, %v2121_v1  ;;  %v1873_v1 = vld [vmem:[#allocation2 + $0x108] sm:$0xff]  ;;  %v1874_v45 = vld [vmem:[#allocation2 + $0x110] sm:$0xff] }
 0x27a   : > { %v2495_v36 = vpop.f32.mrf.mxu0 }
 0x27b   : > { %v1602_v49 = vadd.f32 %v1567_v6, %v1352_v0 }
 0x27d   : > { %v7611_v11 = vadd.f32 %v1817_v50, %v1602_v49  ;;  %v7624_v49 = vld [vmem:[%s8771_s2] ss:$0 sm:$0xff] }
 0x27e   : > { %v1069_v13 = vpop.f32.mrf.mxu2 }
 0x27f   : > { %v1319_v60 = vpop.f32.mrf.mxu3  ;;  %v1103_v24 = vadd.f32 %v1069_v13, %v8809_v10  ;;  %v2123_v13 = vld [vmem:[#allocation2 + $0x109] sm:$0xff] }
 0x281   : > { %v1353_v2 = vadd.f32 %v1319_v60, %v1103_v24 }
 0x282   : > { %v2498_v25 = vpop.f32.mrf.mxu0 }
 0x283   : > { %5985 = vmatmul.msk.bf16.gmra.mxu2 %vm266_vm0, %v1895_v35  ;;  %v7616_v6 = vadd.f32 %v1569_v32, %v1353_v2  ;;  %v2124_v32 = vld [vmem:[#allocation2 + $0x111] sm:$0xff] }
 0x284   : > { %6025 = vmatmul.msk.bf16.gmra.mxu3 %vm266_vm0, %v2145_v33  ;;  %v2146_v33 = vpack.c.bf16 %v2124_v32, %v2123_v13 }
 0x285   : > { %6066 = vmatmul.msk.bf16.gmra.mxu0 %vm266_vm0, %v7361_v21 }
 0x286   : > { %v1993_v0 = vpop.f32.mrf.mxu2 }
 0x287   : > { %v2243_v56 = vpop.f32.mrf.mxu3  ;;  %v2073_v5 = vadd.f32 %v1993_v0, %v7359_v28  ;;  %v1896_v28 = vpack.c.bf16 %v1874_v45, %v1873_v1  ;;  %v6536_v0 = vld [vmem:[%s8772_s3 + $0x30] sm:$0xff] }
 0x288   : > { %3075 = vmatpush.bf16.msrb.mxu2 %v6536_v0 }
 0x289   : > { %v2323_v50 = vadd.f32 %v2243_v56, %v2073_v5 }
 0x28a   : > { %v2500_v34 = vpop.f32.mrf.mxu0 }
 0x28b   : > { %v2573_v48 = vadd.f32 %v2493_v42, %v2323_v50  ;;  %v6552_v42 = vld [vmem:[%s8772_s3 + $0xb0] sm:$0xff] }
 0x28c   : > { %3277 = vmatpush.bf16.msrb.mxu3 %v6552_v42 }
 0x28d   : > { %v2609_v60 = vadd.f32 %v7624_v49, %v2573_v48 }
 0x28e   : > { %v1995_v10 = vpop.f32.mrf.mxu2 }
 0x28f   : > { %v2245_v21 = vpop.f32.mrf.mxu3  ;;  %v2641_v24 = vmax.f32 %v2609_v60, 0.0  ;;  %v2074_v35 = vadd.f32 %v1995_v10, %v7370_v12  ;;  %v6568_v60 = vld [vmem:[%s8772_s3 + $0x130] sm:$0xff] }
 0x290   : > { %3745 = vmatpush.bf16.msrb.mxu1 %v6568_v60 }
 0x291   : > { %2728 = vst [vmem:[#allocation3 + $0x19] sm:$0xff] %v2641_v24  ;;  %v2324_v2 = vadd.f32 %v2245_v21, %v2074_v35  ;;  %v1875_v35 = vld [vmem:[#allocation2 + $0x120] sm:$0xff] }
 0x292   : > { %v2503_v56 = vpop.f32.mrf.mxu0 }
 0x293   : > { %v2574_v5 = vadd.f32 %v2495_v36, %v2324_v2  ;;  %5986 = vmatmul.msk.bf16.gmra.mxu2 %vm266_vm0, %v1896_v28  ;;  %v6560_v36 = vld [vmem:[%s8772_s3 + $0xf0] sm:$0xff]  ;;  %v2125_v28 = vld [vmem:[#allocation2 + $0x121] sm:$0xff] }
 0x294   : > { %6026 = vmatmul.msk.bf16.gmra.mxu3 %vm266_vm0, %v2146_v33  ;;  %3511 = vmatpush.bf16.msrb.mxu0 %v6560_v36  ;;  %v2126_v33 = vld [vmem:[#allocation2 + $0x129] sm:$0xff] }
 0x295   : > { %v2610_v12 = vadd.f32 %v7624_v49, %v2574_v5  ;;  %6067 = vmatmul.msk.bf16.gmra.mxu0 %vm266_vm0, %v7380_v27  ;;  %v1876_v27 = vld [vmem:[#allocation2 + $0x128] sm:$0xff] }
 0x296   : > { %v1998_v50 = vpop.f32.mrf.mxu2  ;;  %v1897_v5 = vpack.c.bf16 %v1876_v27, %v1875_v35  ;;  %v1878_v27 = vld [vmem:[#allocation2 + $0x140] sm:$0xff] }
 0x297   : > { %v2248_v48 = vpop.f32.mrf.mxu3  ;;  %v2642_v1 = vmax.f32 %v2610_v12, 0.0  ;;  %v2075_v45 = vadd.f32 %v1998_v50, %v7377_v7  ;;  %v2147_v12 = vpack.c.bf16 %v2126_v33, %v2125_v28  ;;  %v2127_v28 = vld [vmem:[#allocation2 + $0x139] sm:$0xff]  ;;  %v2128_v33 = vld [vmem:[#allocation2 + $0x141] sm:$0xff] }
 0x299   : > { %2729 = vst [vmem:[#allocation3 + $0x21] sm:$0xff] %v2642_v1  ;;  %v2325_v13 = vadd.f32 %v2248_v48, %v2075_v45  ;;  %v2857_v32 = vpack.c.bf16 %v2642_v1, %v2641_v24 }
 0x29a   : > { %v2505_v10 = vpop.f32.mrf.mxu0 }
 0x29b   : > { %v2575_v21 = vadd.f32 %v2498_v25, %v2325_v13  ;;  %2950 = vmatmul.bf16.gmra.mxu1 %v2857_v32 }
 0x29d   : > { %v2611_v7 = vadd.f32 %v7624_v49, %v2575_v21 }
 0x29e   : > { %v2000_v24 = vpop.f32.mrf.mxu2 }
 0x29f   : > { %v2250_v2 = vpop.f32.mrf.mxu3  ;;  %v2643_v0 = vmax.f32 %v2611_v7, 0.0  ;;  %v2076_v42 = vadd.f32 %v2000_v24, %v7389_v62 }
 0x2a1   : > { %2730 = vst [vmem:[#allocation3 + $0x31] sm:$0xff] %v2643_v0  ;;  %v2326_v50 = vadd.f32 %v2250_v2, %v2076_v42 }
 0x2a2   : > { %v2508_v48 = vpop.f32.mrf.mxu0 }
 0x2a3   : > { %v2576_v25 = vadd.f32 %v2500_v34, %v2326_v50  ;;  %5987 = vmatmul.msk.bf16.gmra.mxu2 %vm266_vm0, %v1897_v5  ;;  %v1877_v34 = vld [vmem:[#allocation2 + $0x138] sm:$0xff] }
 0x2a4   : > { %6027 = vmatmul.msk.bf16.gmra.mxu3 %vm266_vm0, %v2147_v12  ;;  %v1898_v5 = vpack.c.bf16 %v1878_v27, %v1877_v34  ;;  %v2148_v12 = vpack.c.bf16 %v2128_v33, %v2127_v28  ;;  %v1879_v27 = vld [vmem:[#allocation2 + $0x150] sm:$0xff]  ;;  %v2130_v33 = vld [vmem:[#allocation2 + $0x159] sm:$0xff] }
 0x2a5   : > { %v2612_v1 = vadd.f32 %v7624_v49, %v2576_v25  ;;  %6068 = vmatmul.msk.bf16.gmra.mxu0 %vm266_vm0, %v7405_v54  ;;  %v2129_v28 = vld [vmem:[#allocation2 + $0x151] sm:$0xff] }
 0x2a6   : > { %v2003_v45 = vpop.f32.mrf.mxu2 }
 0x2a7   : > { %v2253_v13 = vpop.f32.mrf.mxu3  ;;  %v2644_v32 = vmax.f32 %v2612_v1, 0.0  ;;  %v2077_v62 = vadd.f32 %v2003_v45, %v7399_v3 }
 0x2a9   : > { %2731 = vst [vmem:[#allocation3 + $0x39] sm:$0xff] %v2644_v32  ;;  %v2327_v36 = vadd.f32 %v2253_v13, %v2077_v62  ;;  %v2858_v60 = vpack.c.bf16 %v2644_v32, %v2643_v0  ;;  %v6551_v0 = vld [vmem:[%s8772_s3 + $0xa8] sm:$0xff] }
 0x2aa   : > { %v2510_v21 = vpop.f32.mrf.mxu0  ;;  %3278 = vmatpush.bf16.msrb.mxu3 %v6551_v0 }
 0x2ab   : > { %v2577_v35 = vadd.f32 %v2503_v56, %v2327_v36  ;;  %2955 = vmatmul.bf16.gmra.mxu1 %v2858_v60  ;;  %v6535_v56 = vld [vmem:[%s8772_s3 + $0x28] sm:$0xff] }
 0x2ac   : > { %3076 = vmatpush.bf16.msrb.mxu2 %v6535_v56  ;;  %v6567_v60 = vld [vmem:[%s8772_s3 + $0x128] sm:$0xff] }
 0x2ad   : > { %v2613_v7 = vadd.f32 %v7624_v49, %v2577_v35  ;;  %3746 = vmatpush.bf16.msrb.mxu1 %v6567_v60  ;;  %v1831_v60 = vadd.f32 %v7421_v17, %v7453_v20  ;;  %v6557_v20 = vld [vmem:[%s8772_s3 + $0xd8] sm:$0xff] }
 0x2ae   : > { %v2005_v24 = vpop.f32.mrf.mxu2 }
 0x2af   : > { %v2255_v2 = vpop.f32.mrf.mxu3  ;;  %v2645_v54 = vmax.f32 %v2613_v7, 0.0  ;;  %v2078_v42 = vadd.f32 %v2005_v24, %v7414_v61 }
 0x2b1   : > { %2732 = vst [vmem:[#allocation3 + $0x49] sm:$0xff] %v2645_v54  ;;  %v2328_v3 = vadd.f32 %v2255_v2, %v2078_v42 }
 0x2b2   : > { %v2513_v50 = vpop.f32.mrf.mxu0 }
 0x2b3   : > { %v2578_v25 = vadd.f32 %v2505_v10, %v2328_v3  ;;  %5988 = vmatmul.msk.bf16.gmra.mxu2 %vm266_vm0, %v1898_v5  ;;  %v6559_v10 = vld [vmem:[%s8772_s3 + $0xe8] sm:$0xff]  ;;  %v2149_v5 = vpack.c.bf16 %v2130_v33, %v2129_v28 }
 0x2b4   : > { %6028 = vmatmul.msk.bf16.gmra.mxu3 %vm266_vm0, %v2148_v12  ;;  %3512 = vmatpush.bf16.msrb.mxu0 %v6559_v10  ;;  %v2132_v10 = vld [vmem:[#allocation2 + $0x171] sm:$0xff] }
 0x2b5   : > { %v2614_v61 = vadd.f32 %v7624_v49, %v2578_v25  ;;  %6069 = vmatmul.msk.bf16.gmra.mxu0 %vm266_vm0, %v7426_v55  ;;  %v1880_v55 = vld [vmem:[#allocation2 + $0x158] sm:$0xff] }
 0x2b6   : > { %v2008_v1 = vpop.f32.mrf.mxu2  ;;  %v1899_v42 = vpack.c.bf16 %v1880_v55, %v1879_v27  ;;  %v6550_v55 = vld [vmem:[%s8772_s3 + $0xa0] sm:$0xff] }
 0x2b7   : > { %v2258_v45 = vpop.f32.mrf.mxu3  ;;  %v2646_v13 = vmax.f32 %v2614_v61, 0.0  ;;  %v2079_v32 = vadd.f32 %v2008_v1, %v7423_v52  ;;  %3279 = vmatpush.bf16.msrb.mxu3 %v6550_v55 }
 0x2b9   : > { %2733 = vst [vmem:[#allocation3 + $0x51] sm:$0xff] %v2646_v13  ;;  %v2329_v62 = vadd.f32 %v2258_v45, %v2079_v32  ;;  %v2859_v36 = vpack.c.bf16 %v2646_v13, %v2645_v54  ;;  %v1881_v32 = vld [vmem:[#allocation2 + $0x168] sm:$0xff] }
 0x2ba   : > { %v2515_v35 = vpop.f32.mrf.mxu0 }
 0x2bb   : > { %v2579_v34 = vadd.f32 %v2508_v48, %v2329_v62  ;;  %2960 = vmatmul.bf16.gmra.mxu1 %v2859_v36  ;;  %v1882_v62 = vld [vmem:[#allocation2 + $0x170] sm:$0xff] }
 0x2bc   : > { %v2131_v36 = vld [vmem:[#allocation2 + $0x169] sm:$0xff] }
 0x2bd   : > { %v2615_v52 = vadd.f32 %v7624_v49, %v2579_v34 }
 0x2be   : > { %v2010_v7 = vpop.f32.mrf.mxu2 }
 0x2bf   : > { %v2260_v24 = vpop.f32.mrf.mxu3  ;;  %v2647_v2 = vmax.f32 %v2615_v52, 0.0  ;;  %v2080_v54 = vadd.f32 %v2010_v7, %v7433_v63  ;;  %v1900_v52 = vpack.c.bf16 %v1882_v62, %v1881_v32  ;;  %v2150_v7 = vpack.c.bf16 %v2132_v10, %v2131_v36  ;;  %v6547_v32 = vld [vmem:[%s8772_s3 + $0x88] sm:$0xff]  ;;  %v1883_v36 = vld [vmem:[#allocation2 + $0x180] sm:$0xff] }
 0x2c0   : > { %v1884_v10 = vld [vmem:[#allocation2 + $0x188] sm:$0xff] }
 0x2c1   : > { %2734 = vst [vmem:[#allocation3 + $0x61] sm:$0xff] %v2647_v2  ;;  %v2330_v12 = vadd.f32 %v2260_v24, %v2080_v54  ;;  %v6549_v54 = vld [vmem:[%s8772_s3 + $0x98] sm:$0xff] }
 0x2c2   : > { %v7676_v3 = vpop.f32.mrf.mxu0  ;;  %3280 = vmatpush.bf16.msrb.mxu3 %v6549_v54 }
 0x2c3   : > { %v2580_v48 = vadd.f32 %v2510_v21, %v2330_v12  ;;  %5989 = vmatmul.msk.bf16.gmra.mxu2 %vm266_vm0, %v1899_v42 }
 0x2c4   : > { %6029 = vmatmul.msk.bf16.gmra.mxu3 %vm266_vm0, %v2149_v5  ;;  %v6556_v5 = vld [vmem:[%s8772_s3 + $0xd0] sm:$0xff] }
 0x2c5   : > { %v2616_v56 = vadd.f32 %v7624_v49, %v2580_v48  ;;  %6070 = vmatmul.msk.bf16.gmra.mxu0 %vm266_vm0, %v7447_v40  ;;  %v6558_v40 = vld [vmem:[%s8772_s3 + $0xe0] sm:$0xff] }
 0x2c6   : > { %v2013_v0 = vpop.f32.mrf.mxu2  ;;  %3513 = vmatpush.bf16.msrb.mxu0 %v6558_v40  ;;  %v2133_v40 = vld [vmem:[#allocation2 + $0x181] sm:$0xff] }
 0x2c7   : > { %v2263_v25 = vpop.f32.mrf.mxu3  ;;  %v2648_v61 = vmax.f32 %v2616_v56, 0.0  ;;  %v2081_v63 = vadd.f32 %v2013_v0, %v7444_v4  ;;  %v6548_v0 = vld [vmem:[%s8772_s3 + $0x90] sm:$0xff] }
 0x2c8   : > { %3281 = vmatpush.bf16.msrb.mxu3 %v6548_v0 }
 0x2c9   : > { %2735 = vst [vmem:[#allocation3 + $0x69] sm:$0xff] %v2648_v61  ;;  %v2331_v1 = vadd.f32 %v2263_v25, %v2081_v63  ;;  %v2860_v45 = vpack.c.bf16 %v2648_v61, %v2647_v2  ;;  %v6533_v2 = vld [vmem:[%s8772_s3 + $0x18] sm:$0xff] }
 0x2ca   : > { %v7684_v13 = vpop.f32.mrf.mxu0  ;;  %3514 = vmatpush.bf16.msrb.mxu0 %v6557_v20  ;;  %v1901_v20 = vpack.c.bf16 %v1884_v10, %v1883_v36 }
 0x2cb   : > { %v2581_v21 = vadd.f32 %v2513_v50, %v2331_v1  ;;  %2965 = vmatmul.bf16.gmra.mxu1 %v2860_v45  ;;  %v6534_v50 = vld [vmem:[%s8772_s3 + $0x20] sm:$0xff] }
 0x2cc   : > { %3077 = vmatpush.bf16.msrb.mxu2 %v6534_v50  ;;  %v6566_v45 = vld [vmem:[%s8772_s3 + $0x120] sm:$0xff]  ;;  %3282 = vmatpush.bf16.msrb.mxu3 %v6547_v32 }
 0x2cd   : > { %v2617_v4 = vadd.f32 %v7624_v49, %v2581_v21  ;;  %3747 = vmatpush.bf16.msrb.mxu1 %v6566_v45  ;;  %v2385_v50 = vld [vmem:[#allocation2 + $0x19a] sm:$0xff] }
 0x2ce   : > { %v2015_v34 = vpop.f32.mrf.mxu2  ;;  %3515 = vmatpush.bf16.msrb.mxu0 %v6556_v5  ;;  %v2136_v45 = vld [vmem:[#allocation2 + $0x1a1] sm:$0xff] }
 0x2cf   : > { %v2265_v27 = vpop.f32.mrf.mxu3  ;;  %v2649_v28 = vmax.f32 %v2617_v4, 0.0  ;;  %v2082_v33 = vadd.f32 %v2015_v34, %v1831_v60  ;;  %v2134_v60 = vld [vmem:[#allocation2 + $0x189] sm:$0xff]  ;;  %v6554_v4 = vld [vmem:[%s8772_s3 + $0xc0] sm:$0xff]  ;;  %v1833_v34 = vadd.f32 %v7442_v38, %v7474_v58 }
 0x2d0   : > { %3078 = vmatpush.bf16.msrb.mxu2 %v6533_v2  ;;  %v2151_v38 = vpack.c.bf16 %v2134_v60, %v2133_v40 }
 0x2d1   : > { %2736 = vst [vmem:[#allocation3 + $0x79] sm:$0xff] %v2649_v28  ;;  %v2332_v17 = vadd.f32 %v2265_v27, %v2082_v33  ;;  %v6530_v33 = vld [vmem:[%s8772_s3] sm:$0xff] }
 0x2d2   : > { %v7701_v24 = vpop.f32.mrf.mxu0 }
 0x2d3   : > { %v2582_v42 = vadd.f32 %v2515_v35, %v2332_v17  ;;  %5990 = vmatmul.msk.bf16.gmra.mxu2 %vm266_vm0, %v1900_v52  ;;  %v6532_v35 = vld [vmem:[%s8772_s3 + $0x10] sm:$0xff]  ;;  %v6546_v52 = vld [vmem:[%s8772_s3 + $0x80] sm:$0xff] }
 0x2d4   : > { %6030 = vmatmul.msk.bf16.gmra.mxu3 %vm266_vm0, %v2150_v7  ;;  %3079 = vmatpush.bf16.msrb.mxu2 %v6532_v35 }
 0x2d5   : > { %v2618_v12 = vadd.f32 %v7624_v49, %v2582_v42  ;;  %6071 = vmatmul.msk.bf16.gmra.mxu0 %vm266_vm0, %v7468_v43  ;;  %v6555_v43 = vld [vmem:[%s8772_s3 + $0xc8] sm:$0xff]  ;;  %3283 = vmatpush.bf16.msrb.mxu3 %v6546_v52 }
 0x2d6   : > { %v2018_v48 = vpop.f32.mrf.mxu2  ;;  %3516 = vmatpush.bf16.msrb.mxu0 %v6555_v43 }
 0x2d7   : > { %v2268_v56 = vpop.f32.mrf.mxu3  ;;  %v2650_v25 = vmax.f32 %v2618_v12, 0.0  ;;  %v2083_v61 = vadd.f32 %v2018_v48, %v7465_v47  ;;  %v6531_v47 = vld [vmem:[%s8772_s3 + $0x8] sm:$0xff] }
 0x2d8   : > { %3080 = vmatpush.bf16.msrb.mxu2 %v6531_v47  ;;  %v1835_v47 = vadd.f32 %v7463_v46, %v7488_v18 }
 0x2d9   : > { %2737 = vst [vmem:[#allocation3 + $0x81] sm:$0xff] %v2650_v25  ;;  %v2333_v63 = vadd.f32 %v2268_v56, %v2083_v61  ;;  %v2861_v1 = vpack.c.bf16 %v2650_v25, %v2649_v28  ;;  %v2386_v28 = vld [vmem:[#allocation2 + $0x1a2] sm:$0xff] }
 0x2da   : > { %v7730_v21 = vpop.f32.mrf.mxu0  ;;  %3517 = vmatpush.bf16.msrb.mxu0 %v6554_v4  ;;  %v2402_v2 = vpack.c.bf16 %v2386_v28, %v2385_v50  ;;  %v3398_v4 = vld [vmem:[#allocation3 + $0x20] sm:$0xff] }
 0x2db   : > { %v2583_v62 = vadd.f32 %v7676_v3, %v2333_v63  ;;  %2970 = vmatmul.bf16.gmra.mxu1 %v2861_v1  ;;  %v1886_v63 = vld [vmem:[#allocation2 + $0x1a0] sm:$0xff] }
 0x2dc   : > { %3081 = vmatpush.bf16.msrb.mxu2 %v6530_v33  ;;  %v2135_v1 = vld [vmem:[#allocation2 + $0x199] sm:$0xff] }
 0x2dd   : > { %v2619_v27 = vadd.f32 %v7624_v49, %v2583_v62  ;;  %v2152_v60 = vpack.c.bf16 %v2136_v45, %v2135_v1 }
 0x2de   : > { %v2020_v3 = vpop.f32.mrf.mxu2 }
 0x2df   : > { %v2270_v55 = vpop.f32.mrf.mxu3  ;;  %v2651_v7 = vmax.f32 %v2619_v27, 0.0  ;;  %v2084_v17 = vadd.f32 %v2020_v3, %v1833_v34  ;;  %v3397_v27 = vld [vmem:[#allocation3 + $0x18] sm:$0xff] }
 0x2e0   : > { %v7764_v46 = vpack.c.bf16 %v3398_v4, %v3397_v27 }
 0x2e1   : > { %2738 = vst [vmem:[#allocation3 + $0x91] sm:$0xff] %v2651_v7  ;;  %v2334_v58 = vadd.f32 %v2270_v55, %v2084_v17 }
 0x2e2   : > { %v2528_v54 = vpop.f32.mrf.mxu0 }
 0x2e3   : > { %v2584_v42 = vadd.f32 %v7684_v13, %v2334_v58  ;;  %5991 = vmatmul.msk.bf16.gmra.mxu2 %vm266_vm0, %v1901_v20  ;;  %v1885_v13 = vld [vmem:[#allocation2 + $0x198] sm:$0xff] }
 0x2e4   : > { %6031 = vmatmul.msk.bf16.gmra.mxu3 %vm266_vm0, %v2151_v38  ;;  %v1902_v40 = vpack.c.bf16 %v1886_v63, %v1885_v13  ;;  %v3163_v38 = vld [vmem:[#allocation3 + $0x2] sm:$0xff]  ;;  %v3164_v58 = vld [vmem:[#allocation3 + $0xa] sm:$0xff] }
 0x2e5   : > { %v2620_v5 = vadd.f32 %v7624_v49, %v2584_v42  ;;  %6072 = vmatmul.msk.bf16.gmra.mxu0 %vm266_vm0, %v2402_v2  ;;  %v1837_v2 = vadd.f32 %v7480_v39, %v7503_v29  ;;  %v7774_v42 = vpop.f32.mrf.mxu1  ;;  %v3399_v63 = vld [vmem:[#allocation3 + $0x30] sm:$0xff] }
 0x2e6   : > { %v2023_v12 = vpop.f32.mrf.mxu2 }
 0x2e7   : > { %v2273_v48 = vpop.f32.mrf.mxu3  ;;  %v2652_v56 = vmax.f32 %v2620_v5, 0.0  ;;  %v2085_v35 = vadd.f32 %v2023_v12, %v7482_v59 }
 0x2e9   : > { %2739 = vst [vmem:[#allocation3 + $0x99] sm:$0xff] %v2652_v56  ;;  %v2335_v0 = vadd.f32 %v2273_v48, %v2085_v35  ;;  %v2862_v25 = vpack.c.bf16 %v2652_v56, %v2651_v7  ;;  %v6700_v35 = vld [vmem:[#allocation3] sm:$0xff] }
 0x2ea   : > { %v2530_v61 = vpop.f32.mrf.mxu0 }
 0x2eb   : > { %v2585_v43 = vadd.f32 %v7701_v24, %v2335_v0  ;;  %2975 = vmatmul.bf16.gmra.mxu1 %v2862_v25  ;;  %v2792_v0 = vpack.c.bf16 %v6700_v35, %v6700_v35  ;;  %v3195_v25 = vpack.c.bf16 %v3164_v58, %v3163_v38 }
 0x2ed   : > { %v2621_v32 = vadd.f32 %v7624_v49, %v2585_v43  ;;  %v3400_v43 = vld [vmem:[#allocation3 + $0x38] sm:$0xff]  ;;  %v7780_v45 = vpop.f32.mrf.mxu1 }
 0x2ee   : > { %v2025_v62 = vpop.f32.mrf.mxu2  ;;  %v7777_v39 = vpack.c.bf16 %v3400_v43, %v3399_v63  ;;  %v3168_v43 = vld [vmem:[#allocation3 + $0x3a] sm:$0xff] }
 0x2ef   : > { %v2275_v36 = vpop.f32.mrf.mxu3  ;;  %v2653_v10 = vmax.f32 %v2621_v32, 0.0  ;;  %v2086_v59 = vadd.f32 %v2025_v62, %v1835_v47 }
 0x2f1   : > { %2740 = vst [vmem:[#allocation3 + $0xa9] sm:$0xff] %v2653_v10  ;;  %v2336_v34 = vadd.f32 %v2275_v36, %v2086_v59 }
 0x2f2   : > { %v2533_v24 = vpop.f32.mrf.mxu0 }
 0x2f3   : > { %v2586_v50 = vadd.f32 %v7730_v21, %v2336_v34  ;;  %5992 = vmatmul.msk.bf16.gmra.mxu2 %vm266_vm0, %v1902_v40  ;;  %v6565_v21 = vld [vmem:[%s8772_s3 + $0x118] sm:$0xff] }
 0x2f4   : > { %6032 = vmatmul.msk.bf16.gmra.mxu3 %vm266_vm0, %v2152_v60  ;;  %3748 = vmatpush.bf16.msrb.mxu1 %v6565_v21  ;;  %v1839_v60 = vadd.f32 %v7496_v23, %v7515_v31 }
 0x2f5   : > { %v2622_v18 = vadd.f32 %v7624_v49, %v2586_v50  ;;  %3518 = vmatmul.bf16.vlgmr.msrb.gmra.mxu0 %v7764_v46  ;;  %v3165_v50 = vld [vmem:[#allocation3 + $0x1a] sm:$0xff] }
 0x2f6   : > { %v2028_v3 = vpop.f32.mrf.mxu2 }
 0x2f7   : > { %v2278_v55 = vpop.f32.mrf.mxu3  ;;  %v2654_v28 = vmax.f32 %v2622_v18, 0.0  ;;  %v2087_v33 = vadd.f32 %v2028_v3, %v7498_v16  ;;  %v3166_v18 = vld [vmem:[#allocation3 + $0x22] sm:$0xff] }
 0x2f9   : > { %2741 = vst [vmem:[#allocation3 + $0xb1] sm:$0xff] %v2654_v28  ;;  %v2337_v52 = vadd.f32 %v2278_v55, %v2087_v33  ;;  %v2863_v7 = vpack.c.bf16 %v2654_v28, %v2653_v10  ;;  %v7787_v28 = vpop.f32.mrf.mxu1 }
 0x2fa   : > { %v2535_v17 = vpop.f32.mrf.mxu0 }
 0x2fb   : > { %v2587_v20 = vadd.f32 %v2528_v54, %v2337_v52  ;;  %2980 = vmatmul.bf16.gmra.mxu1 %v2863_v7  ;;  %v3196_v52 = vpack.c.bf16 %v3166_v18, %v3165_v50 }
 0x2fd   : > { %v2623_v16 = vadd.f32 %v7624_v49, %v2587_v20 }
 0x2fe   : > { %v2030_v5 = vpop.f32.mrf.mxu2 }
 0x2ff   : > { %v2280_v12 = vpop.f32.mrf.mxu3  ;;  %v2655_v48 = vmax.f32 %v2623_v16, 0.0  ;;  %v2088_v56 = vadd.f32 %v2030_v5, %v1837_v2 }
 0x301   : > { %2742 = vst [vmem:[#allocation3 + $0xc1] sm:$0xff] %v2655_v48  ;;  %v2338_v54 = vadd.f32 %v2280_v12, %v2088_v56  ;;  %v1841_v56 = vadd.f32 %v7508_v8, %v7530_v57 }
 0x302   : > { %v2538_v13 = vpop.f32.mrf.mxu0 }
 0x303   : > { %v2588_v1 = vadd.f32 %v2530_v61, %v2338_v54  ;;  %3082 = vmatmul.bf16.vlgmr.msrb.gmra.mxu2 %v2792_v0 }
 0x304   : > { %3284 = vmatmul.bf16.vlgmr.msrb.gmra.mxu3 %v3195_v25  ;;  %v3167_v25 = vld [vmem:[#allocation3 + $0x32] sm:$0xff] }
 0x305   : > { %v2624_v29 = vadd.f32 %v7624_v49, %v2588_v1  ;;  %3523 = vmatmul.bf16.gmra.mxu0 %v7777_v39 }
 0x306   : > { %v2033_v47 = vpop.f32.mrf.mxu2 }
 0x307   : > { %v2283_v32 = vpop.f32.mrf.mxu3  ;;  %v2656_v62 = vmax.f32 %v2624_v29, 0.0  ;;  %v2089_v36 = vadd.f32 %v2033_v47, %v7510_v15  ;;  %v3402_v15 = vld [vmem:[#allocation3 + $0x50] sm:$0xff]  ;;  %v3404_v29 = vld [vmem:[#allocation3 + $0x68] sm:$0xff] }
 0x309   : > { %2743 = vst [vmem:[#allocation3 + $0xc9] sm:$0xff] %v2656_v62  ;;  %v2339_v10 = vadd.f32 %v2283_v32, %v2089_v36  ;;  %v2864_v59 = vpack.c.bf16 %v2656_v62, %v2655_v48  ;;  %v3197_v32 = vpack.c.bf16 %v3168_v43, %v3167_v25  ;;  %v3403_v62 = vld [vmem:[#allocation3 + $0x60] sm:$0xff] }
 0x30a   : > { %v2540_v40 = vpop.f32.mrf.mxu0  ;;  %v7806_v8 = vpack.c.bf16 %v3404_v29, %v3403_v62  ;;  %v3172_v29 = vld [vmem:[#allocation3 + $0x6a] sm:$0xff] }
 0x30b   : > { %v2589_v61 = vadd.f32 %v2533_v24, %v2339_v10  ;;  %2985 = vmatmul.bf16.gmra.mxu1 %v2864_v59  ;;  %v3401_v24 = vld [vmem:[#allocation3 + $0x48] sm:$0xff] }
 0x30c   : > { %v7790_v23 = vpack.c.bf16 %v3402_v15, %v3401_v24  ;;  %v3169_v15 = vld [vmem:[#allocation3 + $0x4a] sm:$0xff] }
 0x30d   : > { %v2625_v4 = vadd.f32 %v7624_v49, %v2589_v61 }
 0x30e   : > { %v2035_v34 = vpop.f32.mrf.mxu2 }
 0x30f   : > { %v2285_v27 = vpop.f32.mrf.mxu3  ;;  %v2657_v3 = vmax.f32 %v2625_v4, 0.0  ;;  %v2090_v55 = vadd.f32 %v2035_v34, %v1839_v60 }
 0x311   : > { %2744 = vst [vmem:[#allocation3 + $0xd9] sm:$0xff] %v2657_v3  ;;  %v2340_v33 = vadd.f32 %v2285_v27, %v2090_v55 }
 0x312   : > { %v2543_v7 = vpop.f32.mrf.mxu0 }
 0x313   : > { %v2590_v21 = vadd.f32 %v2535_v17, %v2340_v33  ;;  %3087 = vmatmul.bf16.gmra.mxu2 %v7764_v46  ;;  %v6564_v46 = vld [vmem:[%s8772_s3 + $0x110] sm:$0xff]  ;;  %v3170_v33 = vld [vmem:[#allocation3 + $0x52] sm:$0xff] }
 0x314   : > { %3289 = vmatmul.bf16.gmra.mxu3 %v3196_v52  ;;  %3749 = vmatpush.bf16.msrb.mxu1 %v6564_v46 }
 0x315   : > { %v2626_v31 = vadd.f32 %v7624_v49, %v2590_v21  ;;  %3528 = vmatmul.bf16.gmra.mxu0 %v7790_v23  ;;  %v3406_v21 = vld [vmem:[#allocation3 + $0x80] sm:$0xff] }
 0x316   : > { %v2038_v20 = vpop.f32.mrf.mxu2 }
 0x317   : > { %v2288_v38 = vpop.f32.mrf.mxu3  ;;  %v2658_v58 = vmax.f32 %v2626_v31, 0.0  ;;  %v2091_v2 = vadd.f32 %v2038_v20, %v7523_v37  ;;  %v3198_v20 = vpack.c.bf16 %v3170_v33, %v3169_v15 }
 0x318   : > { %v7795_v16 = vpop.f32.mrf.mxu1 }
 0x319   : > { %2745 = vst [vmem:[#allocation3 + $0xe1] sm:$0xff] %v2658_v58  ;;  %v2341_v5 = vadd.f32 %v2288_v38, %v2091_v2  ;;  %v2865_v12 = vpack.c.bf16 %v2658_v58, %v2657_v3 }
 0x31a   : > { %v2545_v17 = vpop.f32.mrf.mxu0 }
 0x31b   : > { %v2591_v48 = vadd.f32 %v2538_v13, %v2341_v5  ;;  %2990 = vmatmul.bf16.gmra.mxu1 %v2865_v12 }
 0x31d   : > { %v2627_v35 = vadd.f32 %v7624_v49, %v2591_v48 }
 0x31e   : > { %v2040_v0 = vpop.f32.mrf.mxu2 }
 0x31f   : > { %v2290_v37 = vpop.f32.mrf.mxu3  ;;  %v2659_v54 = vmax.f32 %v2627_v35, 0.0  ;;  %v2092_v63 = vadd.f32 %v2040_v0, %v1841_v56 }
 0x320   : > { %v7803_v1 = vpop.f32.mrf.mxu1 }
 0x321   : > { %2746 = vst [vmem:[#allocation3 + $0xf1] sm:$0xff] %v2659_v54  ;;  %v2342_v47 = vadd.f32 %v2290_v37, %v2092_v63  ;;  %v8810_v37 = vld [vmem:[#allocation17_spill] sm:$0xff]  ;;  %v3171_v63 = vld [vmem:[#allocation3 + $0x62] sm:$0xff] }
 0x322   : > { %v2548_v13 = vpop.f32.mrf.mxu0  ;;  %v1845_v25 = vadd.f32 %v8810_v37, %v7555_v51 }
 0x323   : > { %v2592_v36 = vadd.f32 %v2540_v40, %v2342_v47  ;;  %3092 = vmatmul.bf16.gmra.mxu2 %v7777_v39  ;;  %v1843_v39 = vadd.f32 %v7526_v26, %v7540_v19 }
 0x324   : > { %3294 = vmatmul.bf16.gmra.mxu3 %v3197_v32 }
 0x325   : > { %v2628_v57 = vadd.f32 %v7624_v49, %v2592_v36  ;;  %3533 = vmatmul.bf16.gmra.mxu0 %v7806_v8  ;;  %v3408_v36 = vld [vmem:[#allocation3 + $0x98] sm:$0xff] }
 0x326   : > { %v2043_v10 = vpop.f32.mrf.mxu2 }
 0x327   : > { %v2293_v59 = vpop.f32.mrf.mxu3  ;;  %v2660_v61 = vmax.f32 %v2628_v57, 0.0  ;;  %v2093_v60 = vadd.f32 %v2043_v10, %v7535_v41  ;;  %v3199_v10 = vpack.c.bf16 %v3172_v29, %v3171_v63 }
 0x328   : > { %v7811_v4 = vpop.f32.mrf.mxu1 }
 0x329   : > { %2747 = vst [vmem:[#allocation3 + $0xf9] sm:$0xff] %v2660_v61  ;;  %v2343_v34 = vadd.f32 %v2293_v59, %v2093_v60  ;;  %v2866_v27 = vpack.c.bf16 %v2660_v61, %v2659_v54  ;;  %v3407_v59 = vld [vmem:[#allocation3 + $0x90] sm:$0xff] }
 0x32a   : > { %v2550_v40 = vpop.f32.mrf.mxu0  ;;  %v7835_v51 = vpack.c.bf16 %v3408_v36, %v3407_v59  ;;  %v8814_v36 = vld [vmem:[#allocation9_spill] sm:$0xff] }
 0x32b   : > { %v2593_v50 = vadd.f32 %v2543_v7, %v2343_v34  ;;  %2995 = vmatmul.bf16.gmra.mxu1 %v2866_v27  ;;  %v3405_v7 = vld [vmem:[#allocation3 + $0x78] sm:$0xff] }
 0x32c   : > { %v7819_v26 = vpack.c.bf16 %v3406_v21, %v3405_v7  ;;  %v3173_v7 = vld [vmem:[#allocation3 + $0x7a] sm:$0xff] }
 0x32d   : > { %v2629_v18 = vadd.f32 %v7624_v49, %v2593_v50 }
 0x32e   : > { %v2045_v3 = vpop.f32.mrf.mxu2 }
 0x32f   : > { %v2295_v55 = vpop.f32.mrf.mxu3  ;;  %v2661_v52 = vmax.f32 %v2629_v18, 0.0  ;;  %v2094_v24 = vadd.f32 %v2045_v3, %v1843_v39  ;;  %v8811_v39 = vld [vmem:[#allocation4_spill] sm:$0xff] }
 0x330   : > { %v7816_v41 = vpop.f32.mrf.mxu1 }
 0x331   : > { %2748 = vst [vmem:[#allocation3 + $0x109] sm:$0xff] %v2661_v52  ;;  %v2344_v31 = vadd.f32 %v2295_v55, %v2094_v24 }
 0x332   : > { %v2553_v38 = vpop.f32.mrf.mxu0 }
 0x333   : > { %v2594_v58 = vadd.f32 %v2545_v17, %v2344_v31  ;;  %3097 = vmatmul.bf16.gmra.mxu2 %v7790_v23  ;;  %v6563_v23 = vld [vmem:[%s8772_s3 + $0x108] sm:$0xff] }
 0x334   : > { %3299 = vmatmul.bf16.gmra.mxu3 %v3198_v20  ;;  %3750 = vmatpush.bf16.msrb.mxu1 %v6563_v23 }
 0x335   : > { %v2630_v19 = vadd.f32 %v7624_v49, %v2594_v58  ;;  %3538 = vmatmul.bf16.gmra.mxu0 %v7819_v26  ;;  %v3174_v58 = vld [vmem:[#allocation3 + $0x82] sm:$0xff] }
 0x336   : > { %v2048_v2 = vpop.f32.mrf.mxu2 }
 0x337   : > { %v2298_v5 = vpop.f32.mrf.mxu3  ;;  %v2662_v12 = vmax.f32 %v2630_v19, 0.0  ;;  %v2095_v46 = vadd.f32 %v2048_v2, %v7550_v9 }
 0x338   : > { %v7824_v48 = vpop.f32.mrf.mxu1 }
 0x339   : > { %2749 = vst [vmem:[#allocation3 + $0x111] sm:$0xff] %v2662_v12  ;;  %v2345_v56 = vadd.f32 %v2298_v5, %v2095_v46  ;;  %v2867_v35 = vpack.c.bf16 %v2662_v12, %v2661_v52  ;;  %v8813_v52 = vld [vmem:[#allocation6_spill] sm:$0xff]  ;;  %v3410_v12 = vld [vmem:[#allocation3 + $0xb0] sm:$0xff] }
 0x33a   : > { %v2555_v17 = vpop.f32.mrf.mxu0 }
 0x33b   : > { %v2595_v0 = vadd.f32 %v2548_v13, %v2345_v56  ;;  %3000 = vmatmul.bf16.gmra.mxu1 %v2867_v35  ;;  %v3200_v56 = vpack.c.bf16 %v3174_v58, %v3173_v7 }
 0x33d   : > { %v2631_v43 = vadd.f32 %v7624_v49, %v2595_v0 }
 0x33e   : > { %v2050_v54 = vpop.f32.mrf.mxu2 }
 0x33f   : > { %v2300_v9 = vpop.f32.mrf.mxu3  ;;  %v2663_v47 = vmax.f32 %v2631_v43, 0.0  ;;  %v2096_v32 = vadd.f32 %v2050_v54, %v1845_v25 }
 0x340   : > { %v7832_v62 = vpop.f32.mrf.mxu1 }
 0x341   : > { %2750 = vst [vmem:[#allocation3 + $0x121] sm:$0xff] %v2663_v47  ;;  %v2346_v57 = vadd.f32 %v2300_v9, %v2096_v32 }
 0x342   : > { %v2558_v13 = vpop.f32.mrf.mxu0 }
 0x343   : > { %v2596_v61 = vadd.f32 %v2550_v40, %v2346_v57  ;;  %3102 = vmatmul.bf16.gmra.mxu2 %v7806_v8  ;;  %v8812_v8 = vld [vmem:[#allocation5_spill] sm:$0xff]  ;;  %v1849_v57 = vadd.f32 %v8814_v36, %v7582_v14 }
 0x344   : > { %3304 = vmatmul.bf16.gmra.mxu3 %v3199_v10  ;;  %v1847_v24 = vadd.f32 %v8813_v52, %v8812_v8 }
 0x345   : > { %v2632_v60 = vadd.f32 %v7624_v49, %v2596_v61  ;;  %3543 = vmatmul.bf16.gmra.mxu0 %v7835_v51  ;;  %v3175_v61 = vld [vmem:[#allocation3 + $0x92] sm:$0xff] }
 0x346   : > { %v2053_v34 = vpop.f32.mrf.mxu2 }
 0x347   : > { %v2303_v27 = vpop.f32.mrf.mxu3  ;;  %v2664_v50 = vmax.f32 %v2632_v60, 0.0  ;;  %v2097_v18 = vadd.f32 %v2053_v34, %v8811_v39  ;;  %v3176_v60 = vld [vmem:[#allocation3 + $0x9a] sm:$0xff]  ;;  %v3412_v39 = vld [vmem:[#allocation3 + $0xc8] sm:$0xff] }
 0x348   : > { %v7840_v3 = vpop.f32.mrf.mxu1 }
 0x349   : > { %2751 = vst [vmem:[#allocation3 + $0x129] sm:$0xff] %v2664_v50  ;;  %v2347_v55 = vadd.f32 %v2303_v27, %v2097_v18  ;;  %v2868_v15 = vpack.c.bf16 %v2664_v50, %v2663_v47 }
 0x34a   : > { %v2560_v40 = vpop.f32.mrf.mxu0 }
 0x34b   : > { %v2597_v33 = vadd.f32 %v2553_v38, %v2347_v55  ;;  %3005 = vmatmul.bf16.gmra.mxu1 %v2868_v15  ;;  %v3409_v38 = vld [vmem:[#allocation3 + $0xa8] sm:$0xff]  ;;  %v3201_v55 = vpack.c.bf16 %v3176_v60, %v3175_v61  ;;  %v3411_v15 = vld [vmem:[#allocation3 + $0xc0] sm:$0xff] }
 0x34c   : > { %v7848_v0 = vpack.c.bf16 %v3410_v12, %v3409_v38  ;;  %v7864_v14 = vpack.c.bf16 %v3412_v39, %v3411_v15  ;;  %v3177_v38 = vld [vmem:[#allocation3 + $0xaa] sm:$0xff]  ;;  %v3179_v15 = vld [vmem:[#allocation3 + $0xc2] sm:$0xff] }
 0x34d   : > { %v2633_v21 = vadd.f32 %v7624_v49, %v2597_v33 }
 0x34e   : > { %v2055_v31 = vpop.f32.mrf.mxu2 }
 0x34f   : > { %v2305_v20 = vpop.f32.mrf.mxu3  ;;  %v2665_v19 = vmax.f32 %v2633_v21, 0.0  ;;  %v2098_v2 = vadd.f32 %v2055_v31, %v1847_v24 }
 0x350   : > { %v7845_v5 = vpop.f32.mrf.mxu1 }
 0x351   : > { %2752 = vst [vmem:[#allocation3 + $0x139] sm:$0xff] %v2665_v19  ;;  %v2348_v46 = vadd.f32 %v2305_v20, %v2098_v2 }
 0x352   : > { %v2563_v35 = vpop.f32.mrf.mxu0 }
 0x353   : > { %v2598_v23 = vadd.f32 %v2555_v17, %v2348_v46  ;;  %3107 = vmatmul.bf16.gmra.mxu2 %v7819_v26  ;;  %v6562_v26 = vld [vmem:[%s8772_s3 + $0x100] sm:$0xff] }
 0x354   : > { %3309 = vmatmul.bf16.gmra.mxu3 %v3200_v56  ;;  %3751 = vmatpush.bf16.msrb.mxu1 %v6562_v26  ;;  %v6601_v26 = vld [vmem:[%s8772_s3 + $0x238] sm:$0xff] }
 0x355   : > { %v2634_v37 = vadd.f32 %v7624_v49, %v2598_v23  ;;  %3548 = vmatmul.bf16.gmra.mxu0 %v7848_v0  ;;  %v3178_v23 = vld [vmem:[#allocation3 + $0xb2] sm:$0xff] }
 0x356   : > { %v2058_v25 = vpop.f32.mrf.mxu2 }
 0x357   : > { %v2308_v43 = vpop.f32.mrf.mxu3  ;;  %v2666_v54 = vmax.f32 %v2634_v37, 0.0  ;;  %v2099_v9 = vadd.f32 %v2058_v25, %v7577_v30 }
 0x358   : > { %v7853_v63 = vpop.f32.mrf.mxu1  ;;  %4681 = vmatpush.bf16.msra.mxu1 %v6601_v26 }
 0x359   : > { %2753 = vst [vmem:[#allocation3 + $0x141] sm:$0xff] %v2666_v54  ;;  %v2349_v29 = vadd.f32 %v2308_v43, %v2099_v9  ;;  %v2869_v47 = vpack.c.bf16 %v2666_v54, %v2665_v19  ;;  %v3414_v54 = vld [vmem:[#allocation3 + $0xe0] sm:$0xff] }
 0x35a   : > { %v2565_v17 = vpop.f32.mrf.mxu0 }
 0x35b   : > { %v2599_v32 = vadd.f32 %v2558_v13, %v2349_v29  ;;  %3010 = vmatmul.bf16.gmra.mxu1 %v2869_v47  ;;  %v6593_v29 = vld [vmem:[%s8772_s3 + $0x1f8] sm:$0xff] }
 0x35c   : > { %4447 = vmatpush.bf16.msra.mxu0 %v6593_v29 }
 0x35d   : > { %v2635_v10 = vadd.f32 %v7624_v49, %v2599_v32  ;;  %v6701_v32 = vld [vmem:[%s8771_s2] ss:$0 sm:$0xff] }
 0x35e   : > { %v2060_v59 = vpop.f32.mrf.mxu2 }
 0x35f   : > { %v2310_v30 = vpop.f32.mrf.mxu3  ;;  %v2667_v34 = vmax.f32 %v2635_v10, 0.0  ;;  %v2100_v27 = vadd.f32 %v2060_v59, %v1849_v57 }
 0x360   : > { %v7861_v50 = vpop.f32.mrf.mxu1 }
 0x361   : > { %2754 = vst [vmem:[#allocation3 + $0x151] sm:$0xff] %v2667_v34  ;;  %v2350_v18 = vadd.f32 %v2310_v30, %v2100_v27  ;;  %v1853_v27 = vadd.f32 %v7774_v42, %v7616_v6 }
 0x362   : > { %v2568_v13 = vpop.f32.mrf.mxu0 }
 0x363   : > { %v2600_v33 = vadd.f32 %v2560_v40, %v2350_v18  ;;  %3112 = vmatmul.bf16.gmra.mxu2 %v7835_v51  ;;  %v6577_v51 = vld [vmem:[%s8772_s3 + $0x178] sm:$0xff] }
 0x364   : > { %3314 = vmatmul.bf16.gmra.mxu3 %v3201_v55  ;;  %v6585_v40 = vld [vmem:[%s8772_s3 + $0x1b8] sm:$0xff]  ;;  %3978 = vmatpush.bf16.msra.mxu2 %v6577_v51 }
 0x365   : > { %v2636_v8 = vadd.f32 %v7624_v49, %v2600_v33  ;;  %3553 = vmatmul.bf16.gmra.mxu0 %v7864_v14  ;;  %4213 = vmatpush.bf16.msra.mxu3 %v6585_v40  ;;  %v3180_v33 = vld [vmem:[#allocation3 + $0xca] sm:$0xff] }
 0x366   : > { %v2063_v52 = vpop.f32.mrf.mxu2 }
 0x367   : > { %v2313_v24 = vpop.f32.mrf.mxu3  ;;  %v2668_v21 = vmax.f32 %v2636_v8, 0.0  ;;  %v2101_v31 = vadd.f32 %v2063_v52, %v7587_v44  ;;  %v1851_v44 = vadd.f32 %v7590_v53, %v7600_v22  ;;  %v3413_v53 = vld [vmem:[#allocation3 + $0xd8] sm:$0xff] }
 0x368   : > { %v7869_v20 = vpop.f32.mrf.mxu1 }
 0x369   : > { %2755 = vst [vmem:[#allocation3 + $0x159] sm:$0xff] %v2668_v21  ;;  %v2351_v7 = vadd.f32 %v2313_v24, %v2101_v31  ;;  %v2870_v58 = vpack.c.bf16 %v2668_v21, %v2667_v34  ;;  %v3203_v31 = vpack.c.bf16 %v3180_v33, %v3179_v15 }
 0x36a   : > { %v2570_v19 = vpop.f32.mrf.mxu0 }
 0x36b   : > { %v2601_v2 = vadd.f32 %v2563_v35, %v2351_v7  ;;  %3015 = vmatmul.bf16.gmra.mxu1 %v2870_v58  ;;  %v3202_v35 = vpack.c.bf16 %v3178_v23, %v3177_v38  ;;  %v3415_v58 = vld [vmem:[#allocation3 + $0xf0] sm:$0xff] }
 0x36d   : > { %v2637_v12 = vadd.f32 %v7624_v49, %v2601_v2  ;;  %v7886_v49 = vpack.c.bf16 %v3414_v54, %v3413_v53  ;;  %v3632_v2 = vld [vmem:[#allocation3 + $0x21] sm:$0xff] }
 0x36e   : > { %v2065_v46 = vpop.f32.mrf.mxu2 }
 0x36f   : > { %v2315_v56 = vpop.f32.mrf.mxu3  ;;  %v2669_v37 = vmax.f32 %v2637_v12, 0.0  ;;  %v2102_v25 = vadd.f32 %v2065_v46, %v1851_v44 }
 0x370   : > { %v7880_v43 = vpop.f32.mrf.mxu1 }
 0x371   : > { %2756 = vst [vmem:[#allocation3 + $0x169] sm:$0xff] %v2669_v37  ;;  %v2352_v9 = vadd.f32 %v2315_v56, %v2102_v25  ;;  %v3631_v56 = vld [vmem:[#allocation3 + $0x19] sm:$0xff] }
 0x372   : > { %v3519_v47 = vpop.f32.mrf.mxu0  ;;  %v3663_v23 = vpack.c.bf16 %v3632_v2, %v3631_v56 }
 0x373   : > { %v2602_v22 = vadd.f32 %v2565_v17, %v2352_v9  ;;  %3117 = vmatmul.bf16.gmra.mxu2 %v7848_v0  ;;  %v3181_v9 = vld [vmem:[#allocation3 + $0xda] sm:$0xff] }
 0x374   : > { %3319 = vmatmul.bf16.gmra.mxu3 %v3202_v35  ;;  %v3182_v35 = vld [vmem:[#allocation3 + $0xe2] sm:$0xff] }
 0x375   : > { %v2638_v36 = vadd.f32 %v6701_v32, %v2602_v22  ;;  %3558 = vmatmul.bf16.gmra.mxu0 %v7886_v49  ;;  %v3418_v22 = vld [vmem:[#allocation3 + $0x110] sm:$0xff] }
 0x376   : > { %v2068_v57 = vpop.f32.mrf.mxu2 }
 0x377   : > { %v2318_v17 = vpop.f32.mrf.mxu3  ;;  %v2670_v10 = vmax.f32 %v2638_v36, 0.0  ;;  %v2103_v0 = vadd.f32 %v2068_v57, %v7611_v11  ;;  %v3416_v11 = vld [vmem:[#allocation3 + $0xf8] sm:$0xff]  ;;  %v6592_v36 = vld [vmem:[%s8772_s3 + $0x1f0] sm:$0xff] }
 0x378   : > { %v7896_v59 = vpop.f32.mrf.mxu1  ;;  %v3438_v6 = vpack.c.bf16 %v3416_v11, %v3415_v58  ;;  %4448 = vmatpush.bf16.msra.mxu0 %v6592_v36  ;;  %v6591_v36 = vld [vmem:[%s8772_s3 + $0x1e8] sm:$0xff] }
 0x379   : > { %2757 = vst [vmem:[#allocation3 + $0x171] sm:$0xff] %v2670_v10  ;;  %v2353_v30 = vadd.f32 %v2318_v17, %v2103_v0  ;;  %v2871_v61 = vpack.c.bf16 %v2670_v10, %v2669_v37  ;;  %v3417_v17 = vld [vmem:[#allocation3 + $0x108] sm:$0xff]  ;;  %v6600_v10 = vld [vmem:[%s8772_s3 + $0x230] sm:$0xff] }
 0x37a   : > { %v3521_v60 = vpop.f32.mrf.mxu0  ;;  %4682 = vmatpush.bf16.msra.mxu1 %v6600_v10  ;;  %v3421_v10 = vld [vmem:[#allocation3 + $0x138] sm:$0xff] }
 0x37b   : > { %v2603_v34 = vadd.f32 %v2568_v13, %v2353_v30  ;;  %3020 = vmatmul.bf16.gmra.mxu1 %v2871_v61  ;;  %v3634_v61 = vld [vmem:[#allocation3 + $0x39] sm:$0xff] }
 0x37c   : > { %4449 = vmatpush.bf16.msra.mxu0 %v6591_v36  ;;  %v3190_v36 = vld [vmem:[#allocation3 + $0x142] sm:$0xff] }
 0x37d   : > { %v2639_v39 = vadd.f32 %v6701_v32, %v2603_v34 }
 0x37e   : > { %v2070_v18 = vpop.f32.mrf.mxu2 }
 0x37f   : > { %v2320_v55 = vpop.f32.mrf.mxu3  ;;  %v2671_v8 = vmax.f32 %v2639_v39, 0.0  ;;  %v2104_v52 = vadd.f32 %v2070_v18, %v1853_v27  ;;  %v3633_v39 = vld [vmem:[#allocation3 + $0x31] sm:$0xff] }
 0x380   : > { %v7900_v24 = vpop.f32.mrf.mxu1  ;;  %v7929_v18 = vpack.c.bf16 %v3634_v61, %v3633_v39 }
 0x381   : > { %2758 = vst [vmem:[#allocation3 + $0x181] sm:$0xff] %v2671_v8  ;;  %v2354_v21 = vadd.f32 %v2320_v55, %v2104_v52  ;;  %v3183_v8 = vld [vmem:[#allocation3 + $0xf2] sm:$0xff]  ;;  %v3184_v52 = vld [vmem:[#allocation3 + $0xfa] sm:$0xff] }
 0x382   : > { %v3524_v7 = vpop.f32.mrf.mxu0  ;;  %v3205_v58 = vpack.c.bf16 %v3184_v52, %v3183_v8 }
 0x383   : > { %v2604_v13 = vadd.f32 %v2570_v19, %v2354_v21  ;;  %3122 = vmatmul.bf16.gmra.mxu2 %v7864_v14  ;;  %v6576_v14 = vld [vmem:[%s8772_s3 + $0x170] sm:$0xff] }
 0x384   : > { %3324 = vmatmul.bf16.gmra.mxu3 %v3203_v31  ;;  %v6584_v19 = vld [vmem:[%s8772_s3 + $0x1b0] sm:$0xff]  ;;  %3979 = vmatpush.bf16.msra.mxu2 %v6576_v14  ;;  %v6583_v14 = vld [vmem:[%s8772_s3 + $0x1a8] sm:$0xff] }
 0x385   : > { %v2640_v42 = vadd.f32 %v6701_v32, %v2604_v13  ;;  %3563 = vmatmul.bf16.gmra.mxu0 %v3438_v6  ;;  %4214 = vmatpush.bf16.msra.mxu3 %v6584_v19  ;;  %v3204_v32 = vpack.c.bf16 %v3182_v35, %v3181_v9  ;;  %v3186_v9 = vld [vmem:[#allocation3 + $0x112] sm:$0xff] }
 0x386   : > { %v3083_v51 = vpop.f32.mrf.mxu2 }
 0x387   : > { %v3285_v40 = vpop.f32.mrf.mxu3  ;;  %v2672_v44 = vmax.f32 %v2640_v42, 0.0  ;;  %v3084_v12 = vadd.f32 %v3083_v51, %v7780_v45  ;;  %v3419_v42 = vld [vmem:[#allocation3 + $0x120] sm:$0xff] }
 0x388   : > { %v7904_v46 = vpop.f32.mrf.mxu1 }
 0x389   : > { %2759 = vst [vmem:[#allocation3 + $0x189] sm:$0xff] %v2672_v44  ;;  %v3365_v38 = vadd.f32 %v3285_v40, %v3084_v12  ;;  %v3636_v44 = vld [vmem:[#allocation3 + $0x51] sm:$0xff]  ;;  %4215 = vmatpush.bf16.msra.mxu3 %v6583_v14  ;;  %v3640_v14 = vld [vmem:[#allocation3 + $0x81] sm:$0xff] }
 0x38a   : > { %v3526_v37 = vpop.f32.mrf.mxu0 }
 0x38b   : > { %3752 = vmatmul.bf16.vlgmr.msrb.gmra.mxu1 %v3663_v23  ;;  %v7912_v25 = vadd.f32 %v3519_v47, %v3365_v38  ;;  %v3439_v47 = vpack.c.bf16 %v3418_v22, %v3417_v17  ;;  %v3422_v22 = vld [vmem:[#allocation3 + $0x140] sm:$0xff] }
 0x38e   : > { %v3085_v45 = vpop.f32.mrf.mxu2 }
 0x38f   : > { %v3287_v54 = vpop.f32.mrf.mxu3  ;;  %v3086_v29 = vadd.f32 %v3085_v45, %v7787_v28 }
 0x390   : > { %v7915_v53 = vpop.f32.mrf.mxu1 }
 0x391   : > { %v3366_v26 = vadd.f32 %v3287_v54, %v3086_v29  ;;  %v3185_v54 = vld [vmem:[#allocation3 + $0x10a] sm:$0xff] }
 0x392   : > { %v3529_v57 = vpop.f32.mrf.mxu0 }
 0x393   : > { %3127 = vmatmul.bf16.gmra.mxu2 %v7886_v49  ;;  %v7924_v28 = vadd.f32 %v3521_v60, %v3366_v26 }
 0x394   : > { %3329 = vmatmul.bf16.gmra.mxu3 %v3204_v32  ;;  %v3206_v32 = vpack.c.bf16 %v3186_v9, %v3185_v54 }
 0x395   : > { %3568 = vmatmul.bf16.gmra.mxu0 %v3439_v47 }
 0x396   : > { %v3088_v0 = vpop.f32.mrf.mxu2 }
 0x397   : > { %v3290_v30 = vpop.f32.mrf.mxu3  ;;  %v3089_v34 = vadd.f32 %v3088_v0, %v7795_v16  ;;  %v3420_v16 = vld [vmem:[#allocation3 + $0x128] sm:$0xff]  ;;  %v6599_v0 = vld [vmem:[%s8772_s3 + $0x228] sm:$0xff] }
 0x398   : > { %v7927_v27 = vpop.f32.mrf.mxu1  ;;  %v3440_v51 = vpack.c.bf16 %v3420_v16, %v3419_v42  ;;  %4683 = vmatpush.bf16.msra.mxu1 %v6599_v0  ;;  %v3187_v16 = vld [vmem:[#allocation3 + $0x122] sm:$0xff]  ;;  %v6590_v0 = vld [vmem:[%s8772_s3 + $0x1e0] sm:$0xff] }
 0x399   : > { %v3367_v49 = vadd.f32 %v3290_v30, %v3089_v34  ;;  %v3638_v34 = vld [vmem:[#allocation3 + $0x69] sm:$0xff]  ;;  %4450 = vmatpush.bf16.msra.mxu0 %v6590_v0 }
 0x39a   : > { %v3531_v55 = vpop.f32.mrf.mxu0  ;;  %v6586_v0 = vld [vmem:[%s8772_s3 + $0x1c0] sm:$0xff] }
 0x39b   : > { %3757 = vmatmul.bf16.gmra.mxu1 %v7929_v18  ;;  %v7932_v15 = vadd.f32 %v3524_v7, %v3367_v49 }
 0x39e   : > { %v3090_v60 = vpop.f32.mrf.mxu2 }
 0x39f   : > { %v3292_v33 = vpop.f32.mrf.mxu3  ;;  %v3091_v11 = vadd.f32 %v3090_v60, %v7803_v1  ;;  %v3635_v1 = vld [vmem:[#allocation3 + $0x49] sm:$0xff]  ;;  %v3637_v60 = vld [vmem:[#allocation3 + $0x61] sm:$0xff] }
 0x3a0   : > { %v7935_v21 = vpop.f32.mrf.mxu1  ;;  %v7942_v23 = vpack.c.bf16 %v3636_v44, %v3635_v1 }
 0x3a1   : > { %v3368_v31 = vadd.f32 %v3292_v33, %v3091_v11  ;;  %v7967_v33 = vpack.c.bf16 %v3638_v34, %v3637_v60 }
 0x3a2   : > { %v3534_v13 = vpop.f32.mrf.mxu0 }
 0x3a3   : > { %3132 = vmatmul.bf16.gmra.mxu2 %v3438_v6  ;;  %v7937_v40 = vadd.f32 %v3526_v37, %v3368_v31  ;;  %v6575_v6 = vld [vmem:[%s8772_s3 + $0x168] sm:$0xff]  ;;  %v3188_v31 = vld [vmem:[#allocation3 + $0x12a] sm:$0xff] }
 0x3a4   : > { %3334 = vmatmul.bf16.gmra.mxu3 %v3205_v58  ;;  %3980 = vmatpush.bf16.msra.mxu2 %v6575_v6 }
 0x3a5   : > { %3573 = vmatmul.bf16.gmra.mxu0 %v3440_v51 }
 0x3a6   : > { %v3093_v7 = vpop.f32.mrf.mxu2 }
 0x3a7   : > { %v3295_v2 = vpop.f32.mrf.mxu3  ;;  %v3094_v12 = vadd.f32 %v3093_v7, %v7811_v4 }
 0x3a8   : > { %v7940_v56 = vpop.f32.mrf.mxu1 }
 0x3a9   : > { %v3369_v38 = vadd.f32 %v3295_v2, %v3094_v12  ;;  %v3207_v2 = vpack.c.bf16 %v3188_v31, %v3187_v16  ;;  %v3423_v12 = vld [vmem:[#allocation3 + $0x150] sm:$0xff] }
 0x3aa   : > { %v3536_v19 = vpop.f32.mrf.mxu0 }
 0x3ab   : > { %3762 = vmatmul.bf16.gmra.mxu1 %v7942_v23  ;;  %v7951_v37 = vadd.f32 %v3529_v57, %v3369_v38  ;;  %v3441_v57 = vpack.c.bf16 %v3422_v22, %v3421_v10 }
 0x3ae   : > { %v3095_v4 = vpop.f32.mrf.mxu2 }
 0x3af   : > { %v3297_v45 = vpop.f32.mrf.mxu3  ;;  %v3096_v35 = vadd.f32 %v3095_v4, %v7816_v41 }
 0x3b0   : > { %v7954_v29 = vpop.f32.mrf.mxu1 }
 0x3b1   : > { %v3370_v26 = vadd.f32 %v3297_v45, %v3096_v35  ;;  %v3639_v45 = vld [vmem:[#allocation3 + $0x79] sm:$0xff] }
 0x3b2   : > { %v3539_v17 = vpop.f32.mrf.mxu0  ;;  %v7985_v9 = vpack.c.bf16 %v3640_v14, %v3639_v45  ;;  %v6572_v14 = vld [vmem:[%s8772_s3 + $0x150] sm:$0xff]  ;;  %v6587_v45 = vld [vmem:[%s8772_s3 + $0x1c8] sm:$0xff] }
 0x3b3   : > { %3137 = vmatmul.bf16.gmra.mxu2 %v3439_v47  ;;  %v7962_v30 = vadd.f32 %v3531_v55, %v3370_v26 }
 0x3b4   : > { %3339 = vmatmul.bf16.gmra.mxu3 %v3206_v32  ;;  %v3189_v32 = vld [vmem:[#allocation3 + $0x13a] sm:$0xff] }
 0x3b5   : > { %3578 = vmatmul.bf16.gmra.mxu0 %v3441_v57 }
 0x3b6   : > { %v3098_v41 = vpop.f32.mrf.mxu2 }
 0x3b7   : > { %v3300_v61 = vpop.f32.mrf.mxu3  ;;  %v3099_v39 = vadd.f32 %v3098_v41, %v7824_v48  ;;  %v3424_v48 = vld [vmem:[#allocation3 + $0x158] sm:$0xff] }
 0x3b8   : > { %v7965_v49 = vpop.f32.mrf.mxu1  ;;  %v7977_v1 = vpack.c.bf16 %v3424_v48, %v3423_v12  ;;  %v3642_v48 = vld [vmem:[#allocation3 + $0x99] sm:$0xff]  ;;  %v3641_v12 = vld [vmem:[#allocation3 + $0x91] sm:$0xff] }
 0x3b9   : > { %v3371_v47 = vadd.f32 %v3300_v61, %v3099_v39  ;;  %v3426_v61 = vld [vmem:[#allocation3 + $0x170] sm:$0xff]  ;;  %v3208_v39 = vpack.c.bf16 %v3190_v36, %v3189_v32  ;;  %v3192_v36 = vld [vmem:[#allocation3 + $0x15a] sm:$0xff] }
 0x3ba   : > { %v3541_v8 = vpop.f32.mrf.mxu0  ;;  %v3191_v32 = vld [vmem:[#allocation3 + $0x152] sm:$0xff] }
 0x3bb   : > { %3767 = vmatmul.bf16.gmra.mxu1 %v7967_v33  ;;  %v7970_v52 = vadd.f32 %v3534_v13, %v3371_v47 }
 0x3be   : > { %v3100_v55 = vpop.f32.mrf.mxu2 }
 0x3bf   : > { %v3302_v11 = vpop.f32.mrf.mxu3  ;;  %v3101_v58 = vadd.f32 %v3100_v55, %v7832_v62  ;;  %v6598_v55 = vld [vmem:[%s8772_s3 + $0x220] sm:$0xff] }
 0x3c0   : > { %v7973_v42 = vpop.f32.mrf.mxu1  ;;  %4684 = vmatpush.bf16.msra.mxu1 %v6598_v55  ;;  %v3427_v55 = vld [vmem:[#allocation3 + $0x180] sm:$0xff] }
 0x3c1   : > { %v3372_v7 = vadd.f32 %v3302_v11, %v3101_v58  ;;  %v6573_v11 = vld [vmem:[%s8772_s3 + $0x158] sm:$0xff] }
 0x3c2   : > { %v7975_v44 = vpop.f32.mrf.mxu0 }
 0x3c3   : > { %3142 = vmatmul.bf16.gmra.mxu2 %v3440_v51  ;;  %v7979_v13 = vadd.f32 %v3536_v19, %v3372_v7  ;;  %v6574_v51 = vld [vmem:[%s8772_s3 + $0x160] sm:$0xff] }
 0x3c4   : > { %3344 = vmatmul.bf16.gmra.mxu3 %v3207_v2  ;;  %v6582_v19 = vld [vmem:[%s8772_s3 + $0x1a0] sm:$0xff]  ;;  %3981 = vmatpush.bf16.msra.mxu2 %v6574_v51 }
 0x3c5   : > { %3583 = vmatmul.bf16.gmra.mxu0 %v7977_v1  ;;  %4216 = vmatpush.bf16.msra.mxu3 %v6582_v19  ;;  %v6579_v19 = vld [vmem:[%s8772_s3 + $0x188] sm:$0xff] }
 0x3c6   : > { %v3103_v38 = vpop.f32.mrf.mxu2 }
 0x3c7   : > { %v3305_v6 = vpop.f32.mrf.mxu3  ;;  %v3104_v62 = vadd.f32 %v3103_v38, %v7840_v3 }
 0x3c8   : > { %v7983_v4 = vpop.f32.mrf.mxu1  ;;  %3982 = vmatpush.bf16.msra.mxu2 %v6573_v11 }
 0x3c9   : > { %v3373_v54 = vadd.f32 %v3305_v6, %v3104_v62  ;;  %v8029_v6 = vpack.c.bf16 %v3642_v48, %v3641_v12  ;;  %v6580_v62 = vld [vmem:[%s8772_s3 + $0x190] sm:$0xff]  ;;  %v3644_v48 = vld [vmem:[#allocation3 + $0xb1] sm:$0xff]  ;;  %v3643_v12 = vld [vmem:[#allocation3 + $0xa9] sm:$0xff] }
 0x3ca   : > { %v7993_v35 = vpop.f32.mrf.mxu0 }
 0x3cb   : > { %3772 = vmatmul.bf16.gmra.mxu1 %v7985_v9  ;;  %v7996_v3 = vadd.f32 %v3539_v17, %v3373_v54  ;;  %v3425_v17 = vld [vmem:[#allocation3 + $0x168] sm:$0xff]  ;;  %v6571_v54 = vld [vmem:[%s8772_s3 + $0x148] sm:$0xff] }
 0x3cc   : > { %v8006_v47 = vpack.c.bf16 %v3426_v61, %v3425_v17  ;;  %3983 = vmatpush.bf16.msra.mxu2 %v6572_v14  ;;  %v6570_v17 = vld [vmem:[%s8772_s3 + $0x140] sm:$0xff]  ;;  %v8069_v14 = vpack.c.bf16 %v3644_v48, %v3643_v12  ;;  %v4101_v48 = vld [vmem:[#allocation3 + $0x38] sm:$0xff] }
 0x3cd   : > { %v4100_v12 = vld [vmem:[#allocation3 + $0x30] sm:$0xff] }
 0x3ce   : > { %v3105_v22 = vpop.f32.mrf.mxu2 }
 0x3cf   : > { %v3307_v26 = vpop.f32.mrf.mxu3  ;;  %v3106_v10 = vadd.f32 %v3105_v22, %v7845_v5  ;;  %v6589_v5 = vld [vmem:[%s8772_s3 + $0x1d8] sm:$0xff] }
 0x3d0   : > { %v8002_v41 = vpop.f32.mrf.mxu1  ;;  %4451 = vmatpush.bf16.msra.mxu0 %v6589_v5  ;;  %3984 = vmatpush.bf16.msra.mxu2 %v6571_v54  ;;  %v6578_v5 = vld [vmem:[%s8772_s3 + $0x180] sm:$0xff] }
 0x3d1   : > { %v3374_v34 = vadd.f32 %v3307_v26, %v3106_v10  ;;  %v3193_v54 = vld [vmem:[#allocation3 + $0x16a] sm:$0xff] }
 0x3d2   : > { %v8004_v60 = vpop.f32.mrf.mxu0 }
 0x3d3   : > { %3147 = vmatmul.bf16.gmra.mxu2 %v3441_v57  ;;  %v8017_v16 = vadd.f32 %v3541_v8, %v3374_v34  ;;  %v6581_v57 = vld [vmem:[%s8772_s3 + $0x198] sm:$0xff]  ;;  %v6588_v8 = vld [vmem:[%s8772_s3 + $0x1d0] sm:$0xff] }
 0x3d4   : > { %3349 = vmatmul.bf16.gmra.mxu3 %v3208_v39  ;;  %4452 = vmatpush.bf16.msra.mxu0 %v6588_v8  ;;  %v3209_v39 = vpack.c.bf16 %v3192_v36, %v3191_v32 }
 0x3d5   : > { %3588 = vmatmul.bf16.gmra.mxu0 %v8006_v47  ;;  %4217 = vmatpush.bf16.msra.mxu3 %v6581_v57 }
 0x3d6   : > { %v3108_v31 = vpop.f32.mrf.mxu2  ;;  %3985 = vmatpush.bf16.msra.mxu2 %v6570_v17  ;;  %v3645_v17 = vld [vmem:[#allocation3 + $0xc1] sm:$0xff] }
 0x3d7   : > { %v3310_v58 = vpop.f32.mrf.mxu3  ;;  %v3109_v7 = vadd.f32 %v3108_v31, %v7853_v63 }
 0x3d8   : > { %v8027_v2 = vpop.f32.mrf.mxu1  ;;  %4453 = vmatpush.bf16.msra.mxu0 %v6587_v45 }
 0x3d9   : > { %v3375_v38 = vadd.f32 %v3310_v58, %v3109_v7  ;;  %4218 = vmatpush.bf16.msra.mxu3 %v6580_v62 }
 0x3da   : > { %v3551_v63 = vpop.f32.mrf.mxu0 }
 0x3db   : > { %3777 = vmatmul.bf16.gmra.mxu1 %v8029_v6  ;;  %v8045_v51 = vadd.f32 %v7975_v44, %v3375_v38  ;;  %v3428_v44 = vld [vmem:[#allocation3 + $0x188] sm:$0xff] }
 0x3dc   : > { %4454 = vmatpush.bf16.msra.mxu0 %v6586_v0  ;;  %v3444_v11 = vpack.c.bf16 %v3428_v44, %v3427_v55 }
 0x3dd   : > { %4219 = vmatpush.bf16.msra.mxu3 %v6579_v19  ;;  %v3194_v19 = vld [vmem:[#allocation3 + $0x172] sm:$0xff] }
 0x3de   : > { %v3110_v22 = vpop.f32.mrf.mxu2  ;;  %v3210_v32 = vpack.c.bf16 %v3194_v19, %v3193_v54 }
 0x3df   : > { %v3312_v26 = vpop.f32.mrf.mxu3  ;;  %v3111_v10 = vadd.f32 %v3110_v22, %v7861_v50 }
 0x3e0   : > { %v8054_v61 = vpop.f32.mrf.mxu1 }
 0x3e1   : > { %v3376_v34 = vadd.f32 %v3312_v26, %v3111_v10  ;;  %4220 = vmatpush.bf16.msra.mxu3 %v6578_v5  ;;  %v6597_v10 = vld [vmem:[%s8772_s3 + $0x218] sm:$0xff] }
 0x3e2   : > { %v3554_v50 = vpop.f32.mrf.mxu0  ;;  %4685 = vmatpush.bf16.msra.mxu1 %v6597_v10 }
 0x3e3   : > { %3152 = vmatmul.bf16.gmra.mxu2 %v7977_v1  ;;  %v8064_v57 = vadd.f32 %v7993_v35, %v3376_v34 }
 0x3e4   : > { %3354 = vmatmul.bf16.gmra.mxu3 %v3209_v39 }
 0x3e5   : > { %3593 = vmatmul.bf16.gmra.mxu0 %v3444_v11 }
 0x3e6   : > { %v3113_v31 = vpop.f32.mrf.mxu2 }
 0x3e7   : > { %v3315_v58 = vpop.f32.mrf.mxu3  ;;  %v3114_v7 = vadd.f32 %v3113_v31, %v7869_v20 }
 0x3e8   : > { %v8067_v8 = vpop.f32.mrf.mxu1 }
 0x3e9   : > { %v3377_v38 = vadd.f32 %v3315_v58, %v3114_v7  ;;  %v3866_v58 = vld [vmem:[#allocation3 + $0x22] sm:$0xff] }
 0x3ea   : > { %v3556_v1 = vpop.f32.mrf.mxu0 }
 0x3eb   : > { %3782 = vmatmul.bf16.gmra.mxu1 %v8069_v14  ;;  %v8073_v35 = vadd.f32 %v8004_v60, %v3377_v38 }
 0x3ee   : > { %v3115_v62 = vpop.f32.mrf.mxu2 }
 0x3ef   : > { %v3317_v45 = vpop.f32.mrf.mxu3  ;;  %v3116_v22 = vadd.f32 %v3115_v62, %v7880_v43  ;;  %v3646_v43 = vld [vmem:[#allocation3 + $0xc9] sm:$0xff] }
 0x3f0   : > { %v8076_v26 = vpop.f32.mrf.mxu1 }
 0x3f1   : > { %v3378_v20 = vadd.f32 %v3317_v45, %v3116_v22  ;;  %v4132_v45 = vpack.c.bf16 %v4101_v48, %v4100_v12 }
 0x3f2   : > { %v3559_v36 = vpop.f32.mrf.mxu0 }
 0x3f3   : > { %3157 = vmatmul.bf16.gmra.mxu2 %v8006_v47  ;;  %v8082_v60 = vadd.f32 %v3551_v63, %v3378_v20  ;;  %v8088_v47 = vpack.c.bf16 %v3646_v43, %v3645_v17  ;;  %v3648_v20 = vld [vmem:[#allocation3 + $0xe1] sm:$0xff] }
 0x3f4   : > { %3359 = vmatmul.bf16.gmra.mxu3 %v3210_v32 }
 0x3f5   : > { %4455 = vmatmul.bf16.vlgmr.msra.gmra.mxu0 %v7929_v18  ;;  %v3865_v18 = vld [vmem:[#allocation3 + $0x1a] sm:$0xff] }
 0x3f6   : > { %v3118_v0 = vpop.f32.mrf.mxu2  ;;  %v3897_v62 = vpack.c.bf16 %v3866_v58, %v3865_v18  ;;  %v4102_v18 = vld [vmem:[#allocation3 + $0x48] sm:$0xff] }
 0x3f7   : > { %v3320_v44 = vpop.f32.mrf.mxu3  ;;  %v3119_v34 = vadd.f32 %v3118_v0, %v7896_v59 }
 0x3f8   : > { %v8086_v39 = vpop.f32.mrf.mxu1 }
 0x3f9   : > { %v3379_v5 = vadd.f32 %v3320_v44, %v3119_v34 }
 0x3fa   : > { %v3561_v55 = vpop.f32.mrf.mxu0 }
 0x3fb   : > { %3787 = vmatmul.bf16.gmra.mxu1 %v8088_v47  ;;  %v8091_v11 = vadd.f32 %v3554_v50, %v3379_v5  ;;  %v3867_v5 = vld [vmem:[#allocation3 + $0x32] sm:$0xff] }
 0x3fe   : > { %v3120_v63 = vpop.f32.mrf.mxu2 }
 0x3ff   : > { %v3322_v31 = vpop.f32.mrf.mxu3  ;;  %v3121_v7 = vadd.f32 %v3120_v63, %v7900_v24  ;;  %v3647_v24 = vld [vmem:[#allocation3 + $0xd9] sm:$0xff] }
 0x400   : > { %v8094_v59 = vpop.f32.mrf.mxu1  ;;  %v8103_v43 = vpack.c.bf16 %v3648_v20, %v3647_v24  ;;  %v3868_v63 = vld [vmem:[#allocation3 + $0x3a] sm:$0xff]  ;;  %v3649_v20 = vld [vmem:[#allocation3 + $0xf1] sm:$0xff] }
 0x401   : > { %v3380_v38 = vadd.f32 %v3322_v31, %v3121_v7  ;;  %v4103_v31 = vld [vmem:[#allocation3 + $0x50] sm:$0xff]  ;;  %v8109_v7 = vpack.c.bf16 %v3868_v63, %v3867_v5  ;;  %v4105_v63 = vld [vmem:[#allocation3 + $0x68] sm:$0xff] }
 0x402   : > { %v3564_v54 = vpop.f32.mrf.mxu0  ;;  %v3870_v5 = vld [vmem:[#allocation3 + $0x52] sm:$0xff] }
 0x403   : > { %3986 = vmatmul.bf16.vlgmr.msra.gmra.mxu2 %v3897_v62  ;;  %v8096_v19 = vadd.f32 %v3556_v1, %v3380_v38 }
 0x404   : > { %4221 = vmatmul.bf16.vlgmr.msra.gmra.mxu3 %v4132_v45 }
 0x405   : > { %4460 = vmatmul.bf16.gmra.mxu0 %v7942_v23 }
 0x406   : > { %v3123_v50 = vpop.f32.mrf.mxu2 }
 0x407   : > { %v3325_v22 = vpop.f32.mrf.mxu3  ;;  %v3124_v32 = vadd.f32 %v3123_v50, %v7904_v46  ;;  %v3650_v50 = vld [vmem:[#allocation3 + $0xf9] sm:$0xff] }
 0x408   : > { %v3753_v10 = vpop.f32.mrf.mxu1  ;;  %v8125_v24 = vpack.c.bf16 %v3650_v50, %v3649_v20 }
 0x409   : > { %v3381_v0 = vadd.f32 %v3325_v22, %v3124_v32  ;;  %v8101_v44 = vadd.f32 %v3753_v10, %v7912_v25  ;;  %v4133_v25 = vpack.c.bf16 %v4103_v31, %v4102_v18  ;;  %v4104_v31 = vld [vmem:[#allocation3 + $0x60] sm:$0xff] }
 0x40a   : > { %v3566_v34 = vpop.f32.mrf.mxu0 }
 0x40b   : > { %3792 = vmatmul.bf16.gmra.mxu1 %v8103_v43  ;;  %v8106_v1 = vadd.f32 %v3559_v36, %v3381_v0  ;;  %v6596_v36 = vld [vmem:[%s8772_s3 + $0x210] sm:$0xff] }
 0x40c   : > { %4686 = vmatpush.bf16.msra.mxu1 %v6596_v36 }
 0x40e   : > { %v3125_v17 = vpop.f32.mrf.mxu2 }
 0x40f   : > { %v3327_v23 = vpop.f32.mrf.mxu3  ;;  %v3126_v46 = vadd.f32 %v3125_v17, %v7915_v53 }
 0x410   : > { %v3755_v58 = vpop.f32.mrf.mxu1 }
 0x411   : > { %v3382_v48 = vadd.f32 %v3327_v23, %v3126_v46  ;;  %v8112_v12 = vadd.f32 %v3755_v58, %v7924_v28  ;;  %v3869_v23 = vld [vmem:[#allocation3 + $0x4a] sm:$0xff] }
 0x412   : > { %v3569_v38 = vpop.f32.mrf.mxu0  ;;  %v8131_v58 = vpack.c.bf16 %v3870_v5, %v3869_v23  ;;  %v3872_v23 = vld [vmem:[#allocation3 + $0x6a] sm:$0xff]  ;;  %v4107_v5 = vld [vmem:[#allocation3 + $0x80] sm:$0xff] }
 0x413   : > { %3991 = vmatmul.bf16.gmra.mxu2 %v8109_v7  ;;  %v8118_v62 = vadd.f32 %v3561_v55, %v3382_v48 }
 0x414   : > { %4226 = vmatmul.bf16.gmra.mxu3 %v4133_v25 }
 0x415   : > { %4465 = vmatmul.bf16.gmra.mxu0 %v7967_v33 }
 0x416   : > { %v3128_v53 = vpop.f32.mrf.mxu2 }
 0x417   : > { %v3330_v45 = vpop.f32.mrf.mxu3  ;;  %v3129_v22 = vadd.f32 %v3128_v53, %v7927_v27 }
 0x418   : > { %v3758_v28 = vpop.f32.mrf.mxu1 }
 0x419   : > { %v3383_v32 = vadd.f32 %v3330_v45, %v3129_v22  ;;  %v8123_v10 = vadd.f32 %v3758_v28, %v7932_v15  ;;  %v4134_v15 = vpack.c.bf16 %v4105_v63, %v4104_v31  ;;  %v3651_v22 = vld [vmem:[#allocation3 + $0x109] sm:$0xff]  ;;  %v4106_v63 = vld [vmem:[#allocation3 + $0x78] sm:$0xff] }
 0x41a   : > { %v3571_v0 = vpop.f32.mrf.mxu0 }
 0x41b   : > { %3797 = vmatmul.bf16.gmra.mxu1 %v8125_v24  ;;  %v8128_v55 = vadd.f32 %v3564_v54, %v3383_v32 }
 0x41e   : > { %v3130_v33 = vpop.f32.mrf.mxu2 }
 0x41f   : > { %v3332_v17 = vpop.f32.mrf.mxu3  ;;  %v3131_v27 = vadd.f32 %v3130_v33, %v7935_v21  ;;  %v3652_v21 = vld [vmem:[#allocation3 + $0x111] sm:$0xff] }
 0x420   : > { %v3760_v46 = vpop.f32.mrf.mxu1 }
 0x421   : > { %v3384_v18 = vadd.f32 %v3332_v17, %v3131_v27  ;;  %v8134_v48 = vadd.f32 %v3760_v46, %v7937_v40  ;;  %v8144_v40 = vpack.c.bf16 %v3652_v21, %v3651_v22  ;;  %v3871_v17 = vld [vmem:[#allocation3 + $0x62] sm:$0xff] }
 0x422   : > { %v3574_v25 = vpop.f32.mrf.mxu0  ;;  %v8150_v46 = vpack.c.bf16 %v3872_v23, %v3871_v17  ;;  %v3654_v21 = vld [vmem:[#allocation3 + $0x129] sm:$0xff]  ;;  %v3873_v23 = vld [vmem:[#allocation3 + $0x7a] sm:$0xff] }
 0x423   : > { %3996 = vmatmul.bf16.gmra.mxu2 %v8131_v58  ;;  %v8137_v54 = vadd.f32 %v3566_v34, %v3384_v18 }
 0x424   : > { %4231 = vmatmul.bf16.gmra.mxu3 %v4134_v15 }
 0x425   : > { %4470 = vmatmul.bf16.gmra.mxu0 %v7985_v9 }
 0x426   : > { %v3133_v36 = vpop.f32.mrf.mxu2 }
 0x427   : > { %v3335_v53 = vpop.f32.mrf.mxu3  ;;  %v3134_v45 = vadd.f32 %v3133_v36, %v7940_v56 }
 0x428   : > { %v3763_v50 = vpop.f32.mrf.mxu1 }
 0x429   : > { %v3385_v28 = vadd.f32 %v3335_v53, %v3134_v45  ;;  %v8142_v20 = vadd.f32 %v3763_v50, %v7951_v37  ;;  %v4135_v37 = vpack.c.bf16 %v4107_v5, %v4106_v63  ;;  %v3653_v50 = vld [vmem:[#allocation3 + $0x121] sm:$0xff]  ;;  %v4108_v63 = vld [vmem:[#allocation3 + $0x90] sm:$0xff] }
 0x42a   : > { %v3576_v32 = vpop.f32.mrf.mxu0  ;;  %v3874_v5 = vld [vmem:[#allocation3 + $0x82] sm:$0xff] }
 0x42b   : > { %3802 = vmatmul.bf16.gmra.mxu1 %v8144_v40  ;;  %v8147_v34 = vadd.f32 %v3569_v38, %v3385_v28  ;;  %v6595_v38 = vld [vmem:[%s8772_s3 + $0x208] sm:$0xff] }
 0x42c   : > { %4687 = vmatpush.bf16.msra.mxu1 %v6595_v38 }
 0x42e   : > { %v3135_v33 = vpop.f32.mrf.mxu2 }
 0x42f   : > { %v3337_v9 = vpop.f32.mrf.mxu3  ;;  %v3136_v56 = vadd.f32 %v3135_v33, %v7954_v29  ;;  %v8166_v33 = vpack.c.bf16 %v3654_v21, %v3653_v50  ;;  %v3655_v50 = vld [vmem:[#allocation3 + $0x139] sm:$0xff] }
 0x430   : > { %v3765_v27 = vpop.f32.mrf.mxu1 }
 0x431   : > { %v3386_v31 = vadd.f32 %v3337_v9, %v3136_v56  ;;  %v8153_v18 = vadd.f32 %v3765_v27, %v7962_v30  ;;  %v4109_v56 = vld [vmem:[#allocation3 + $0x98] sm:$0xff] }
 0x432   : > { %v3579_v15 = vpop.f32.mrf.mxu0 }
 0x433   : > { %4001 = vmatmul.bf16.gmra.mxu2 %v8150_v46  ;;  %v8159_v36 = vadd.f32 %v3571_v0, %v3386_v31 }
 0x434   : > { %4236 = vmatmul.bf16.gmra.mxu3 %v4135_v37  ;;  %v8172_v37 = vpack.c.bf16 %v3874_v5, %v3873_v23  ;;  %v3875_v5 = vld [vmem:[#allocation3 + $0x92] sm:$0xff] }
 0x435   : > { %4475 = vmatmul.bf16.gmra.mxu0 %v8029_v6 }
 0x436   : > { %v3138_v29 = vpop.f32.mrf.mxu2 }
 0x437   : > { %v3340_v53 = vpop.f32.mrf.mxu3  ;;  %v3139_v45 = vadd.f32 %v3138_v29, %v7965_v49 }
 0x438   : > { %v3768_v30 = vpop.f32.mrf.mxu1 }
 0x439   : > { %v3387_v22 = vadd.f32 %v3340_v53, %v3139_v45  ;;  %v8164_v28 = vadd.f32 %v3768_v30, %v7970_v52  ;;  %v4136_v52 = vpack.c.bf16 %v4109_v56, %v4108_v63  ;;  %v3876_v56 = vld [vmem:[#allocation3 + $0x9a] sm:$0xff]  ;;  %v4110_v63 = vld [vmem:[#allocation3 + $0xa8] sm:$0xff] }
 0x43a   : > { %v3581_v9 = vpop.f32.mrf.mxu0 }
 0x43b   : > { %3807 = vmatmul.bf16.gmra.mxu1 %v8166_v33  ;;  %v8169_v0 = vadd.f32 %v3574_v25, %v3387_v22 }
 0x43e   : > { %v3140_v6 = vpop.f32.mrf.mxu2 }
 0x43f   : > { %v3342_v17 = vpop.f32.mrf.mxu3  ;;  %v3141_v49 = vadd.f32 %v3140_v6, %v7973_v42  ;;  %v3656_v42 = vld [vmem:[#allocation3 + $0x141] sm:$0xff] }
 0x440   : > { %v3770_v27 = vpop.f32.mrf.mxu1 }
 0x441   : > { %v3388_v31 = vadd.f32 %v3342_v17, %v3141_v49  ;;  %v8175_v38 = vadd.f32 %v3770_v27, %v7979_v13  ;;  %v8185_v13 = vpack.c.bf16 %v3656_v42, %v3655_v50  ;;  %v4111_v49 = vld [vmem:[#allocation3 + $0xb0] sm:$0xff] }
 0x442   : > { %v3584_v29 = vpop.f32.mrf.mxu0 }
 0x443   : > { %4006 = vmatmul.bf16.gmra.mxu2 %v8172_v37  ;;  %v8178_v25 = vadd.f32 %v3576_v32, %v3388_v31 }
 0x444   : > { %4241 = vmatmul.bf16.gmra.mxu3 %v4136_v52  ;;  %v8191_v52 = vpack.c.bf16 %v3876_v56, %v3875_v5 }
 0x445   : > { %4480 = vmatmul.bf16.gmra.mxu0 %v8069_v14 }
 0x446   : > { %v3143_v53 = vpop.f32.mrf.mxu2 }
 0x447   : > { %v3345_v21 = vpop.f32.mrf.mxu3  ;;  %v3144_v45 = vadd.f32 %v3143_v53, %v7983_v4 }
 0x448   : > { %v3773_v30 = vpop.f32.mrf.mxu1 }
 0x449   : > { %v3389_v22 = vadd.f32 %v3345_v21, %v3144_v45  ;;  %v8183_v6 = vadd.f32 %v3773_v30, %v7996_v3  ;;  %v4137_v3 = vpack.c.bf16 %v4111_v49, %v4110_v63  ;;  %v6594_v21 = vld [vmem:[%s8772_s3 + $0x200] sm:$0xff]  ;;  %v3658_v30 = vld [vmem:[#allocation3 + $0x159] sm:$0xff] }
 0x44a   : > { %v3586_v17 = vpop.f32.mrf.mxu0  ;;  %4688 = vmatpush.bf16.msra.mxu1 %v6594_v21  ;;  %v3878_v63 = vld [vmem:[#allocation3 + $0xb2] sm:$0xff] }
 0x44b   : > { %3812 = vmatmul.bf16.gmra.mxu1 %v8185_v13  ;;  %v8188_v32 = vadd.f32 %v3579_v15, %v3389_v22  ;;  %v3657_v22 = vld [vmem:[#allocation3 + $0x151] sm:$0xff] }
 0x44c   : > { %v8207_v5 = vpack.c.bf16 %v3658_v30, %v3657_v22 }
 0x44e   : > { %v3145_v23 = vpop.f32.mrf.mxu2 }
 0x44f   : > { %v3347_v14 = vpop.f32.mrf.mxu3  ;;  %v3146_v4 = vadd.f32 %v3145_v23, %v8002_v41 }
 0x450   : > { %v3775_v27 = vpop.f32.mrf.mxu1 }
 0x451   : > { %v3390_v31 = vadd.f32 %v3347_v14, %v3146_v4  ;;  %v8194_v53 = vadd.f32 %v3775_v27, %v8017_v16  ;;  %v3877_v4 = vld [vmem:[#allocation3 + $0xaa] sm:$0xff] }
 0x452   : > { %v3589_v15 = vpop.f32.mrf.mxu0  ;;  %v4113_v27 = vld [vmem:[#allocation3 + $0xc8] sm:$0xff] }
 0x453   : > { %4011 = vmatmul.bf16.gmra.mxu2 %v8191_v52  ;;  %v8200_v42 = vadd.f32 %v3581_v9, %v3390_v31  ;;  %v4112_v31 = vld [vmem:[#allocation3 + $0xc0] sm:$0xff] }
 0x454   : > { %4246 = vmatmul.bf16.gmra.mxu3 %v4137_v3 }
 0x455   : > { %4485 = vmatmul.bf16.gmra.mxu0 %v8088_v47 }
 0x456   : > { %v3148_v41 = vpop.f32.mrf.mxu2 }
 0x457   : > { %v3350_v45 = vpop.f32.mrf.mxu3  ;;  %v3149_v50 = vadd.f32 %v3148_v41, %v8027_v2  ;;  %v8213_v41 = vpack.c.bf16 %v3878_v63, %v3877_v4 }
 0x458   : > { %v3778_v16 = vpop.f32.mrf.mxu1 }
 0x459   : > { %v3391_v23 = vadd.f32 %v3350_v45, %v3149_v50  ;;  %v8205_v14 = vadd.f32 %v3778_v16, %v8045_v51  ;;  %v4138_v51 = vpack.c.bf16 %v4113_v27, %v4112_v31  ;;  %v3660_v16 = vld [vmem:[#allocation3 + $0x171] sm:$0xff]  ;;  %v3879_v27 = vld [vmem:[#allocation3 + $0xc2] sm:$0xff] }
 0x45a   : > { %v3591_v56 = vpop.f32.mrf.mxu0  ;;  %v4115_v31 = vld [vmem:[#allocation3 + $0xe0] sm:$0xff] }
 0x45b   : > { %3817 = vmatmul.bf16.gmra.mxu1 %v8207_v5  ;;  %v8210_v9 = vadd.f32 %v3584_v29, %v3391_v23 }
 0x45e   : > { %v3150_v47 = vpop.f32.mrf.mxu2 }
 0x45f   : > { %v3352_v49 = vpop.f32.mrf.mxu3  ;;  %v3151_v2 = vadd.f32 %v3150_v47, %v8054_v61  ;;  %v3659_v47 = vld [vmem:[#allocation3 + $0x169] sm:$0xff] }
 0x460   : > { %v3780_v3 = vpop.f32.mrf.mxu1 }
 0x461   : > { %v3392_v21 = vadd.f32 %v3352_v49, %v3151_v2  ;;  %v8216_v45 = vadd.f32 %v3780_v3, %v8064_v57  ;;  %v8226_v57 = vpack.c.bf16 %v3660_v16, %v3659_v47  ;;  %v3880_v2 = vld [vmem:[#allocation3 + $0xca] sm:$0xff]  ;;  %v4114_v3 = vld [vmem:[#allocation3 + $0xd8] sm:$0xff] }
 0x462   : > { %v3594_v22 = vpop.f32.mrf.mxu0 }
 0x463   : > { %4016 = vmatmul.bf16.gmra.mxu2 %v8213_v41  ;;  %v8219_v29 = vadd.f32 %v3586_v17, %v3392_v21 }
 0x464   : > { %4251 = vmatmul.bf16.gmra.mxu3 %v4138_v51 }
 0x465   : > { %4490 = vmatmul.bf16.gmra.mxu0 %v8103_v43 }
 0x466   : > { %v3153_v30 = vpop.f32.mrf.mxu2 }
 0x467   : > { %v3355_v50 = vpop.f32.mrf.mxu3  ;;  %v3154_v61 = vadd.f32 %v3153_v30, %v8067_v8  ;;  %v8232_v30 = vpack.c.bf16 %v3880_v2, %v3879_v27 }
 0x468   : > { %v3783_v23 = vpop.f32.mrf.mxu1 }
 0x469   : > { %v3393_v49 = vadd.f32 %v3355_v50, %v3154_v61  ;;  %v8224_v4 = vadd.f32 %v3783_v23, %v8073_v35  ;;  %v4139_v35 = vpack.c.bf16 %v4115_v31, %v4114_v3  ;;  %v3882_v3 = vld [vmem:[#allocation3 + $0xe2] sm:$0xff] }
 0x46a   : > { %v3596_v50 = vpop.f32.mrf.mxu0 }
 0x46b   : > { %3822 = vmatmul.bf16.gmra.mxu1 %v8226_v57  ;;  %v8229_v17 = vadd.f32 %v3589_v15, %v3393_v49 }
 0x46e   : > { %v3155_v63 = vpop.f32.mrf.mxu2 }
 0x46f   : > { %v3357_v43 = vpop.f32.mrf.mxu3  ;;  %v3156_v8 = vadd.f32 %v3155_v63, %v8076_v26  ;;  %v3662_v26 = vld [vmem:[#allocation3 + $0x189] sm:$0xff]  ;;  %v3661_v63 = vld [vmem:[#allocation3 + $0x181] sm:$0xff] }
 0x470   : > { %v3785_v21 = vpop.f32.mrf.mxu1 }
 0x471   : > { %v3394_v51 = vadd.f32 %v3357_v43, %v3156_v8  ;;  %v8235_v16 = vadd.f32 %v3785_v21, %v8082_v60  ;;  %v8245_v60 = vpack.c.bf16 %v3662_v26, %v3661_v63  ;;  %v3881_v8 = vld [vmem:[#allocation3 + $0xda] sm:$0xff] }
 0x472   : > { %v4456_v2 = vpop.f32.mrf.mxu0  ;;  %v4117_v21 = vld [vmem:[#allocation3 + $0xf8] sm:$0xff] }
 0x473   : > { %4021 = vmatmul.bf16.gmra.mxu2 %v8232_v30  ;;  %v8238_v15 = vadd.f32 %v3591_v56, %v3394_v51  ;;  %v4116_v51 = vld [vmem:[#allocation3 + $0xf0] sm:$0xff] }
 0x474   : > { %4256 = vmatmul.bf16.gmra.mxu3 %v4139_v35 }
 0x475   : > { %4495 = vmatmul.bf16.gmra.mxu0 %v8125_v24 }
 0x476   : > { %v3158_v61 = vpop.f32.mrf.mxu2 }
 0x477   : > { %v3360_v23 = vpop.f32.mrf.mxu3  ;;  %v3159_v47 = vadd.f32 %v3158_v61, %v8086_v39 }
 0x478   : > { %v3788_v49 = vpop.f32.mrf.mxu1 }
 0x479   : > { %v3395_v43 = vadd.f32 %v3360_v23, %v3159_v47  ;;  %v8243_v27 = vadd.f32 %v3788_v49, %v8091_v11  ;;  %v8251_v23 = vpack.c.bf16 %v3882_v3, %v3881_v8  ;;  %v4140_v11 = vpack.c.bf16 %v4117_v21, %v4116_v51  ;;  %v3884_v21 = vld [vmem:[#allocation3 + $0xfa] sm:$0xff] }
 0x47a   : > { %v4458_v47 = vpop.f32.mrf.mxu0 }
 0x47b   : > { %3827 = vmatmul.bf16.gmra.mxu1 %v8245_v60  ;;  %v8248_v56 = vadd.f32 %v3594_v22, %v3395_v43 }
 0x47e   : > { %v3160_v31 = vpop.f32.mrf.mxu2 }
 0x47f   : > { %v3362_v24 = vpop.f32.mrf.mxu3  ;;  %v3161_v39 = vadd.f32 %v3160_v31, %v8094_v59 }
 0x480   : > { %v3790_v35 = vpop.f32.mrf.mxu1 }
 0x481   : > { %v3396_v61 = vadd.f32 %v3362_v24, %v3161_v39  ;;  %v8254_v26 = vadd.f32 %v3790_v35, %v8096_v19  ;;  %v4119_v39 = vld [vmem:[#allocation3 + $0x110] sm:$0xff]  ;;  %v4118_v35 = vld [vmem:[#allocation3 + $0x108] sm:$0xff] }
 0x482   : > { %v4461_v51 = vpop.f32.mrf.mxu0 }
 0x483   : > { %4026 = vmatmul.bf16.gmra.mxu2 %v8251_v23  ;;  %v8257_v22 = vadd.f32 %v3596_v50, %v3396_v61  ;;  %v3883_v50 = vld [vmem:[#allocation3 + $0xf2] sm:$0xff] }
 0x484   : > { %4261 = vmatmul.bf16.gmra.mxu3 %v4140_v11  ;;  %v8268_v11 = vpack.c.bf16 %v3884_v21, %v3883_v50  ;;  %v3886_v21 = vld [vmem:[#allocation3 + $0x112] sm:$0xff] }
 0x485   : > { %4500 = vmatmul.bf16.gmra.mxu0 %v8144_v40 }
 0x486   : > { %v3987_v49 = vpop.f32.mrf.mxu2 }
 0x487   : > { %v4222_v63 = vpop.f32.mrf.mxu3  ;;  %v4067_v59 = vadd.f32 %v3987_v49, %v8101_v44  ;;  %v4141_v49 = vpack.c.bf16 %v4119_v39, %v4118_v35  ;;  %v4121_v39 = vld [vmem:[#allocation3 + $0x128] sm:$0xff] }
 0x488   : > { %v3793_v43 = vpop.f32.mrf.mxu1 }
 0x489   : > { %v4302_v31 = vadd.f32 %v4222_v63, %v4067_v59  ;;  %v8262_v24 = vadd.f32 %v3793_v43, %v8106_v1 }
 0x48b   : > { %4689 = vmatmul.bf16.vlgmr.msra.gmra.mxu1 %v8109_v7  ;;  %v8265_v19 = vadd.f32 %v4456_v2, %v4302_v31  ;;  %v4463_v31 = vpop.f32.mrf.mxu0 }
 0x48e   : > { %v3989_v8 = vpop.f32.mrf.mxu2 }
 0x48f   : > { %v4224_v3 = vpop.f32.mrf.mxu3  ;;  %v4068_v40 = vadd.f32 %v3989_v8, %v8112_v12 }
 0x490   : > { %v3795_v61 = vpop.f32.mrf.mxu1 }
 0x491   : > { %v4303_v44 = vadd.f32 %v4224_v3, %v4068_v40  ;;  %v8271_v1 = vadd.f32 %v3795_v61, %v8118_v62  ;;  %v4120_v40 = vld [vmem:[#allocation3 + $0x120] sm:$0xff] }
 0x493   : > { %4031 = vmatmul.bf16.gmra.mxu2 %v8268_v11  ;;  %v8274_v7 = vadd.f32 %v4458_v47, %v4303_v44  ;;  %v3885_v47 = vld [vmem:[#allocation3 + $0x10a] sm:$0xff]  ;;  %v4142_v44 = vpack.c.bf16 %v4121_v39, %v4120_v40  ;;  %v4122_v39 = vld [vmem:[#allocation3 + $0x138] sm:$0xff] }
 0x494   : > { %4266 = vmatmul.bf16.gmra.mxu3 %v4141_v49  ;;  %v8285_v61 = vpack.c.bf16 %v3886_v21, %v3885_v47  ;;  %v4466_v49 = vpop.f32.mrf.mxu0  ;;  %v3888_v47 = vld [vmem:[#allocation3 + $0x12a] sm:$0xff]  ;;  %v4123_v21 = vld [vmem:[#allocation3 + $0x140] sm:$0xff] }
 0x495   : > { %4505 = vmatmul.bf16.gmra.mxu0 %v8166_v33 }
 0x496   : > { %v3992_v2 = vpop.f32.mrf.mxu2 }
 0x497   : > { %v4227_v63 = vpop.f32.mrf.mxu3  ;;  %v4069_v12 = vadd.f32 %v3992_v2, %v8123_v10 }
 0x498   : > { %v3798_v59 = vpop.f32.mrf.mxu1 }
 0x499   : > { %v4304_v43 = vadd.f32 %v4227_v63, %v4069_v12  ;;  %v8279_v8 = vadd.f32 %v3798_v59, %v8128_v55 }
 0x49b   : > { %4694 = vmatmul.bf16.gmra.mxu1 %v8131_v58  ;;  %v8282_v62 = vadd.f32 %v4461_v51, %v4304_v43 }
 0x49c   : > { %v4468_v43 = vpop.f32.mrf.mxu0 }
 0x49e   : > { %v3994_v3 = vpop.f32.mrf.mxu2 }
 0x49f   : > { %v4229_v50 = vpop.f32.mrf.mxu3  ;;  %v4070_v33 = vadd.f32 %v3994_v3, %v8134_v48 }
 0x4a0   : > { %v3800_v35 = vpop.f32.mrf.mxu1 }
 0x4a1   : > { %v4305_v10 = vadd.f32 %v4229_v50, %v4070_v33  ;;  %v8288_v55 = vadd.f32 %v3800_v35, %v8137_v54  ;;  %v4143_v35 = vpack.c.bf16 %v4123_v21, %v4122_v39 }
 0x4a3   : > { %4036 = vmatmul.bf16.gmra.mxu2 %v8285_v61  ;;  %v8291_v58 = vadd.f32 %v4463_v31, %v4305_v10  ;;  %v3887_v31 = vld [vmem:[#allocation3 + $0x122] sm:$0xff] }
 0x4a4   : > { %4271 = vmatmul.bf16.gmra.mxu3 %v4142_v44  ;;  %v8302_v40 = vpack.c.bf16 %v3888_v47, %v3887_v31  ;;  %v4124_v31 = vld [vmem:[#allocation3 + $0x150] sm:$0xff] }
 0x4a5   : > { %4510 = vmatmul.bf16.gmra.mxu0 %v8185_v13 }
 0x4a6   : > { %v3997_v51 = vpop.f32.mrf.mxu2 }
 0x4a7   : > { %v4232_v2 = vpop.f32.mrf.mxu3  ;;  %v4071_v48 = vadd.f32 %v3997_v51, %v8142_v20 }
 0x4a8   : > { %v3803_v63 = vpop.f32.mrf.mxu1 }
 0x4a9   : > { %v4306_v12 = vadd.f32 %v4232_v2, %v4071_v48  ;;  %v8296_v59 = vadd.f32 %v3803_v63, %v8147_v34 }
 0x4ab   : > { %4699 = vmatmul.bf16.gmra.mxu1 %v8150_v46  ;;  %v8299_v54 = vadd.f32 %v4466_v49, %v4306_v12  ;;  %v4471_v49 = vpop.f32.mrf.mxu0  ;;  %v3889_v12 = vld [vmem:[#allocation3 + $0x13a] sm:$0xff] }
 0x4ae   : > { %v3999_v3 = vpop.f32.mrf.mxu2 }
 0x4af   : > { %v4234_v50 = vpop.f32.mrf.mxu3  ;;  %v4072_v13 = vadd.f32 %v3999_v3, %v8153_v18  ;;  %v4125_v3 = vld [vmem:[#allocation3 + $0x158] sm:$0xff] }
 0x4b0   : > { %v3805_v33 = vpop.f32.mrf.mxu1 }
 0x4b1   : > { %v4307_v20 = vadd.f32 %v4234_v50, %v4072_v13  ;;  %v8305_v34 = vadd.f32 %v3805_v33, %v8159_v36  ;;  %v4144_v13 = vpack.c.bf16 %v4125_v3, %v4124_v31  ;;  %v4128_v3 = vld [vmem:[#allocation3 + $0x180] sm:$0xff] }
 0x4b3   : > { %4041 = vmatmul.bf16.gmra.mxu2 %v8302_v40  ;;  %v8308_v46 = vadd.f32 %v4468_v43, %v4307_v20  ;;  %v3890_v43 = vld [vmem:[#allocation3 + $0x142] sm:$0xff]  ;;  %v4473_v39 = vpop.f32.mrf.mxu0  ;;  %v3891_v20 = vld [vmem:[#allocation3 + $0x152] sm:$0xff] }
 0x4b4   : > { %4276 = vmatmul.bf16.gmra.mxu3 %v4143_v35  ;;  %v8319_v21 = vpack.c.bf16 %v3890_v43, %v3889_v12  ;;  %v3892_v35 = vld [vmem:[#allocation3 + $0x15a] sm:$0xff] }
 0x4b5   : > { %4515 = vmatmul.bf16.gmra.mxu0 %v8207_v5  ;;  %v4364_v12 = vld [vmem:[#allocation3 + $0x199] sm:$0xff]  ;;  %v4365_v43 = vld [vmem:[#allocation3 + $0x1a1] sm:$0xff] }
 0x4b6   : > { %v4002_v10 = vpop.f32.mrf.mxu2 }
 0x4b7   : > { %v4237_v44 = vpop.f32.mrf.mxu3  ;;  %v4073_v18 = vadd.f32 %v4002_v10, %v8164_v28  ;;  %v4127_v10 = vld [vmem:[#allocation3 + $0x170] sm:$0xff] }
 0x4b8   : > { %v3808_v51 = vpop.f32.mrf.mxu1 }
 0x4b9   : > { %v4308_v2 = vadd.f32 %v4237_v44, %v4073_v18  ;;  %v8313_v48 = vadd.f32 %v3808_v51, %v8169_v0  ;;  %v4126_v44 = vld [vmem:[#allocation3 + $0x168] sm:$0xff]  ;;  %v8332_v18 = vpack.c.bf16 %v3892_v35, %v3891_v20 }
 0x4bb   : > { %8815 = vst [vmem:[#allocation7_spill] sm:$0xff] %v8313_v48  ;;  %4704 = vmatmul.bf16.gmra.mxu1 %v8172_v37  ;;  %v8316_v36 = vadd.f32 %v4471_v49, %v4308_v2  ;;  %v4145_v49 = vpack.c.bf16 %v4127_v10, %v4126_v44  ;;  %v3894_v2 = vld [vmem:[#allocation3 + $0x172] sm:$0xff]  ;;  %v8369_v44 = vld [vmem:[%s8773_s4] ss:$0 sm:$0xff] }
 0x4be   : > { %v4004_v63 = vpop.f32.mrf.mxu2 }
 0x4bf   : > { %v4074_v5 = vadd.f32 %v4004_v63, %v8175_v38  ;;  %v4239_v50 = vpop.f32.mrf.mxu3  ;;  %v4129_v63 = vld [vmem:[#allocation3 + $0x188] sm:$0xff] }
 0x4c0   : > { %v3810_v47 = vpop.f32.mrf.mxu1 }
 0x4c1   : > { %v4309_v28 = vadd.f32 %v4239_v50, %v4074_v5  ;;  %v8322_v0 = vadd.f32 %v3810_v47, %v8178_v25  ;;  %v4146_v50 = vpack.c.bf16 %v4129_v63, %v4128_v3  ;;  %v3895_v47 = vld [vmem:[#allocation3 + $0x182] sm:$0xff]  ;;  %v8388_v63 = vpop.f32.mrf.mxu0 }
 0x4c3   : > { %8816 = vst [vmem:[#allocation8_spill] sm:$0xff] %v8322_v0  ;;  %4046 = vmatmul.bf16.gmra.mxu2 %v8319_v21  ;;  %v8325_v37 = vadd.f32 %v4473_v39, %v4309_v28  ;;  %v3896_v28 = vld [vmem:[#allocation3 + $0x18a] sm:$0xff] }
 0x4c4   : > { %4281 = vmatmul.bf16.gmra.mxu3 %v4144_v13  ;;  %v6702_v13 = vld [vmem:[#allocation3] sm:$0xff]  ;;  %v8353_v20 = vpack.c.bf16 %v3896_v28, %v3895_v47 }
 0x4c5   : > { %4520 = vmatmul.bf16.gmra.mxu0 %v8226_v57  ;;  %v4147_v39 = vpack.c.bf16 %v6702_v13, %v6702_v13 }
 0x4c8   : > { %v3813_v33 = vpop.f32.mrf.mxu1 }
 0x4c9   : > { %v8329_v38 = vadd.f32 %v3813_v33, %v8188_v32 }
 0x4cb   : > { %8817 = vst [vmem:[#allocation12_spill] sm:$0xff] %v8329_v38  ;;  %4709 = vmatmul.bf16.gmra.mxu1 %v8191_v52  ;;  %v3893_v52 = vld [vmem:[#allocation3 + $0x16a] sm:$0xff] }
 0x4d0   : > { %v3815_v25 = vpop.f32.mrf.mxu1 }
 0x4d1   : > { %v8335_v51 = vadd.f32 %v3815_v25, %v8200_v42  ;;  %v8343_v42 = vpack.c.bf16 %v3894_v2, %v3893_v52  ;;  %v8385_v52 = vpop.f32.mrf.mxu3 }
 0x4d3   : > { %8818 = vst [vmem:[#allocation10_spill] sm:$0xff] %v8335_v51  ;;  %4051 = vmatmul.bf16.gmra.mxu2 %v8332_v18 }
 0x4d4   : > { %4286 = vmatmul.bf16.gmra.mxu3 %v4145_v49 }
 0x4d5   : > { %4525 = vmatmul.bf16.gmra.mxu0 %v8245_v60  ;;  %v4381_v60 = vpack.c.bf16 %v4365_v43, %v4364_v12 }
 0x4d8   : > { %v3818_v32 = vpop.f32.mrf.mxu1 }
 0x4d9   : > { %v8340_v57 = vadd.f32 %v3818_v32, %v8210_v9 }
 0x4db   : > { %8819 = vst [vmem:[#allocation11_spill] sm:$0xff] %v8340_v57  ;;  %4714 = vmatmul.bf16.gmra.mxu1 %v8213_v41 }
 0x4e0   : > { %v3820_v5 = vpop.f32.mrf.mxu1 }
 0x4e1   : > { %v8346_v31 = vadd.f32 %v3820_v5, %v8219_v29 }
 0x4e3   : > { %8820 = vst [vmem:[#allocation13_spill] sm:$0xff] %v8346_v31  ;;  %4056 = vmatmul.bf16.gmra.mxu2 %v8343_v42 }
 0x4e4   : > { %4291 = vmatmul.bf16.gmra.mxu3 %v4146_v50  ;;  %v8395_v50 = vpop.f32.mrf.mxu3 }
 0x4e5   : > { %4530 = vmatmul.bf16.gmra.mxu0 %v4381_v60 }
 0x4e8   : > { %v3823_v9 = vpop.f32.mrf.mxu1 }
 0x4e9   : > { %v8350_v41 = vadd.f32 %v3823_v9, %v8229_v17 }
 0x4eb   : > { %8821 = vst [vmem:[#allocation14_spill] sm:$0xff] %v8350_v41  ;;  %4719 = vmatmul.bf16.gmra.mxu1 %v8232_v30 }
 0x4f0   : > { %v3825_v33 = vpop.f32.mrf.mxu1 }
 0x4f1   : > { %v8356_v29 = vadd.f32 %v3825_v33, %v8238_v15  ;;  %v8400_v33 = vpop.f32.mrf.mxu0 }
 0x4f3   : > { %8822 = vst [vmem:[#allocation15_spill] sm:$0xff] %v8356_v29  ;;  %4061 = vmatmul.bf16.gmra.mxu2 %v8353_v20 }
 0x4f4   : > { %4296 = vmatmul.bf16.gmra.mxu3 %v4147_v39 }
 0x4f8   : > { %v3828_v35 = vpop.f32.mrf.mxu1 }
 0x4f9   : > { %v8360_v17 = vadd.f32 %v3828_v35, %v8248_v56 }
 0x4fb   : > { %8823 = vst [vmem:[#allocation16_spill] sm:$0xff] %v8360_v17  ;;  %4724 = vmatmul.bf16.gmra.mxu1 %v8251_v23  ;;  %v8380_v23 = vpop.f32.mrf.mxu2 }
 0x500   : > { %v3830_v30 = vpop.f32.mrf.mxu1 }
 0x501   : > { %v8364_v10 = vadd.f32 %v3830_v30, %v8257_v22 }
 0x503   : > { %8824 = vst [vmem:[#allocation17_spill] sm:$0xff] %v8364_v10  ;;  %v8390_v12 = vpop.f32.mrf.mxu2 }
 0x508   : > { %v4690_v15 = vpop.f32.mrf.mxu1 }
 0x509   : > { %v4770_v25 = vadd.f32 %v4690_v15, %v8265_v19 }
 0x50b   : > { %v4806_v49 = vadd.f32 %v8369_v44, %v4770_v25  ;;  %4729 = vmatmul.bf16.gmra.mxu1 %v8268_v11 }
 0x50d   : > { %v4838_v56 = vmax.f32 %v4806_v49, 0.0 }
 0x50f   : > { %4870 = vst [vmem:[%s8378_s10] sm:$0xff] %v4838_v56 }
 0x510   : > { %v4692_v22 = vpop.f32.mrf.mxu1 }
 0x511   : > { %v4771_v32 = vadd.f32 %v4692_v22, %v8274_v7 }
 0x513   : > { %v4807_v19 = vadd.f32 %v8369_v44, %v4771_v32 }
 0x515   : > { %v4839_v11 = vmax.f32 %v4807_v19, 0.0 }
 0x517   : > { %4871 = vst [vmem:[%s8378_s10 + $0x8] sm:$0xff] %v4839_v11 }
 0x518   : > { %v4695_v2 = vpop.f32.mrf.mxu1 }
 0x519   : > { %v4772_v43 = vadd.f32 %v4695_v2, %v8282_v62  ;;  %v8402_v62 = vpop.f32.mrf.mxu2 }
 0x51b   : > { %v4808_v3 = vadd.f32 %v8369_v44, %v4772_v43  ;;  %4734 = vmatmul.bf16.gmra.mxu1 %v8285_v61 }
 0x51d   : > { %v4840_v5 = vmax.f32 %v4808_v3, 0.0 }
 0x51f   : > { %4872 = vst [vmem:[%s8378_s10 + $0x10] sm:$0xff] %v4840_v5  ;;  %v4902_v7 = vmax.f32 %v4838_v56, %v4840_v5 }
 0x520   : > { %v4697_v60 = vpop.f32.mrf.mxu1 }
 0x521   : > { %v4934_v9 = vrot.slane %v4902_v7, 2  ;;  %v4935_v47 = vrot.slane %v4902_v7, 4  ;;  %v4936_v28 = vrot.slane %v4902_v7, 6  ;;  %v5031_v13 = vsel %vm5030_vm2, %v4902_v7, -inf }
 0x522   : > { %v4773_v39 = vadd.f32 %v4697_v60, %v8291_v58  ;;  %v5032_v35 = vrot.slane %v5031_v13, 4 }
 0x523   : > { %v5038_v61 = vsel %vm5030_vm2, %v4934_v9, -inf  ;;  %v5045_v30 = vsel %vm5030_vm2, %v4935_v47, -inf  ;;  %v5052_v15 = vsel %vm5030_vm2, %v4936_v28, -inf  ;;  %v8409_v47 = vpop.f32.mrf.mxu3 }
 0x524   : > { %v5039_v25 = vrot.slane %v5038_v61, 4  ;;  %v5046_v49 = vrot.slane %v5045_v30, 4  ;;  %v5053_v56 = vrot.slane %v5052_v15, 4  ;;  %v4809_v22 = vadd.f32 %v8369_v44, %v4773_v39 }
 0x525   : > { %v5033_v32 = vmax.f32 %v5031_v13, %v5032_v35 }
 0x526   : > { %v5040_v19 = vmax.f32 %v5038_v61, %v5039_v25  ;;  %v5047_v58 = vmax.f32 %v5045_v30, %v5046_v49  ;;  %v5054_v2 = vmax.f32 %v5052_v15, %v5053_v56  ;;  %v4841_v43 = vmax.f32 %v4809_v22, 0.0  ;;  %v8414_v56 = vpop.f32.mrf.mxu0  ;;  %v8416_v22 = vpop.f32.mrf.mxu2 }
 0x527   : > { %v5034_v3 = vrot.slane %v5033_v32, 2 }
 0x528   : > { %v5041_v5 = vrot.slane %v5040_v19, 2  ;;  %v5048_v7 = vrot.slane %v5047_v58, 2  ;;  %v5055_v60 = vrot.slane %v5054_v2, 2  ;;  %4873 = vst [vmem:[%s8378_s10 + $0x18] sm:$0xff] %v4841_v43  ;;  %v4903_v9 = vmax.f32 %v4839_v11, %v4841_v43  ;;  %v4700_v10 = vpop.f32.mrf.mxu1 }
 0x529   : > { %v5035_v28 = vmax.f32 %v5033_v32, %v5034_v3  ;;  %v4774_v39 = vadd.f32 %v4700_v10, %v8299_v54 }
 0x52a   : > { %v5042_v17 = vmax.f32 %v5040_v19, %v5041_v5  ;;  %v5049_v29 = vmax.f32 %v5047_v58, %v5048_v7  ;;  %v4937_v41 = vrot.slane %v4903_v9, 2  ;;  %v4938_v35 = vrot.slane %v4903_v9, 4 }
 0x52b   : > { %v5036_v13 = vrot.slane %v5035_v28, 1  ;;  %v4939_v61 = vrot.slane %v4903_v9, 6  ;;  %v5059_v30 = vsel %vm5030_vm2, %v4903_v9, -inf  ;;  %4739 = vmatmul.bf16.gmra.mxu1 %v8302_v40  ;;  %v5056_v49 = vmax.f32 %v5054_v2, %v5055_v60 }
 0x52c   : > { %v5043_v15 = vrot.slane %v5042_v17, 1  ;;  %v5050_v25 = vrot.slane %v5049_v29, 1  ;;  %v5060_v11 = vrot.slane %v5059_v30, 4  ;;  %v5066_v32 = vsel %vm5030_vm2, %v4937_v41, -inf }
 0x52d   : > { %v5073_v19 = vsel %vm5030_vm2, %v4938_v35, -inf  ;;  %v5080_v54 = vsel %vm5030_vm2, %v4939_v61, -inf  ;;  %v5037_v43 = vmax.f32 %v5035_v28, %v5036_v13  ;;  %v5067_v40 = vrot.slane %v5066_v32, 4 }
 0x52e   : > { %v5044_v10 = vmax.f32 %v5042_v17, %v5043_v15  ;;  %v5061_v58 = vmax.f32 %v5059_v30, %v5060_v11  ;;  %v5074_v3 = vrot.slane %v5073_v19, 4  ;;  %v5081_v5 = vrot.slane %v5080_v54, 4  ;;  %v8423_v30 = vpop.f32.mrf.mxu3 }
 0x52f   : > { %v5051_v2 = vmax.f32 %v5049_v29, %v5050_v25  ;;  %v5057_v7 = vrot.slane %v5056_v49, 1  ;;  %v4810_v9 = vadd.f32 %v8369_v44, %v4774_v39  ;;  %v5068_v35 = vmax.f32 %v5066_v32, %v5067_v40  ;;  %v8431_v40 = vpop.f32.mrf.mxu2 }
 0x530   : > { %v5062_v60 = vrot.slane %v5061_v58, 2  ;;  %v4702_v31 = vpop.f32.mrf.mxu1  ;;  %v5544_v41 = vsel %vm5543_vm3, %v5044_v10, %v5037_v43  ;;  %v5075_v57 = vmax.f32 %v5073_v19, %v5074_v3  ;;  %v5082_v61 = vmax.f32 %v5080_v54, %v5081_v5  ;;  %v8429_v43 = vpop.f32.mrf.mxu0 }
 0x531   : > { %v4842_v15 = vmax.f32 %v4810_v9, 0.0  ;;  %v5069_v28 = vrot.slane %v5068_v35, 2  ;;  %v4775_v29 = vadd.f32 %v4702_v31, %v8308_v46  ;;  %v5058_v25 = vmax.f32 %v5056_v49, %v5057_v7 }
 0x532   : > { %v5063_v17 = vmax.f32 %v5061_v58, %v5062_v60  ;;  %v5076_v13 = vrot.slane %v5075_v57, 2  ;;  %v5083_v11 = vrot.slane %v5082_v61, 2  ;;  %v5546_v39 = vsel %vm5545_vm4, %v5051_v2, %v5544_v41 }
 0x533   : > { %4874 = vst [vmem:[%s8378_s10 + $0x20] sm:$0xff] %v4842_v15  ;;  %v5070_v32 = vmax.f32 %v5068_v35, %v5069_v28  ;;  %v4811_v10 = vadd.f32 %v8369_v44, %v4775_v29  ;;  %v5548_v46 = vsel %vm5547_vm5, %v5058_v25, %v5546_v39 }
 0x534   : > { %v5064_v51 = vrot.slane %v5063_v17, 1  ;;  %v5077_v19 = vmax.f32 %v5075_v57, %v5076_v13  ;;  %v5084_v54 = vmax.f32 %v5082_v61, %v5083_v11 }
 0x535   : > { %v5071_v31 = vrot.slane %v5070_v32, 1  ;;  %v4843_v2 = vmax.f32 %v4811_v10, 0.0 }
 0x536   : > { %v5065_v58 = vmax.f32 %v5063_v17, %v5064_v51  ;;  %v5078_v49 = vrot.slane %v5077_v19, 1  ;;  %v5085_v3 = vrot.slane %v5084_v54, 1  ;;  %v8447_v17 = vpop.f32.mrf.mxu3 }
 0x537   : > { %v5072_v7 = vmax.f32 %v5070_v32, %v5071_v31  ;;  %4875 = vst [vmem:[%s8378_s10 + $0x28] sm:$0xff] %v4843_v2  ;;  %v8454_v25 = vpop.f32.mrf.mxu2 }
 0x538   : > { %v5550_v5 = vsel %vm5549_vm6, %v5065_v58, %v5548_v46  ;;  %v4705_v57 = vpop.f32.mrf.mxu1  ;;  %v5079_v60 = vmax.f32 %v5077_v19, %v5078_v49  ;;  %v5086_v9 = vmax.f32 %v5084_v54, %v5085_v3  ;;  %v8452_v29 = vpop.f32.mrf.mxu0 }
 0x539   : > { %v4776_v51 = vadd.f32 %v4705_v57, %v8316_v36  ;;  %v5552_v41 = vsel %vm5551_vm7, %v5072_v7, %v5550_v5  ;;  %v4076_v7 = vadd.f32 %v8390_v12, %v8194_v53  ;;  %v4077_v12 = vadd.f32 %v8402_v62, %v8205_v14 }
 0x53a   : > { %v5554_v35 = vsel %vm5553_vm8, %v5079_v60, %v5552_v41 }
 0x53b   : > { %4744 = vmatmul.bf16.gmra.mxu1 %v8319_v21  ;;  %v4812_v61 = vadd.f32 %v8369_v44, %v4776_v51  ;;  %v5556_v28 = vsel %vm5555_vm9, %v5086_v9, %v5554_v35  ;;  %v4311_v53 = vadd.f32 %v8395_v50, %v4076_v7  ;;  %v4312_v7 = vadd.f32 %v8409_v47, %v4077_v12 }
 0x53c   : > { %5614 = vst [vmem:[%s8441_s14] sm:$0xff] %v5556_v28 }
 0x53d   : > { %v4844_v36 = vmax.f32 %v4812_v61, 0.0 }
 0x53e   : > { %v8466_v51 = vpop.f32.mrf.mxu3 }
 0x53f   : > { %4876 = vst [vmem:[%s8378_s10 + $0x30] sm:$0xff] %v4844_v36  ;;  %v4904_v13 = vmax.f32 %v4842_v15, %v4844_v36 }
 0x540   : > { %v4707_v11 = vpop.f32.mrf.mxu1 }
 0x541   : > { %v4777_v39 = vadd.f32 %v4707_v11, %v8325_v37  ;;  %v4940_v21 = vrot.slane %v4904_v13, 2  ;;  %v4941_v32 = vrot.slane %v4904_v13, 4  ;;  %v4942_v19 = vrot.slane %v4904_v13, 6 }
 0x542   : > { %v5087_v54 = vsel %vm5030_vm2, %v4904_v13, -inf  ;;  %v4075_v37 = vadd.f32 %v8380_v23, %v8183_v6 }
 0x543   : > { %v5088_v10 = vrot.slane %v5087_v54, 4  ;;  %v4813_v58 = vadd.f32 %v8369_v44, %v4777_v39  ;;  %v5094_v46 = vsel %vm5030_vm2, %v4940_v21, -inf  ;;  %v5101_v15 = vsel %vm5030_vm2, %v4941_v32, -inf }
 0x544   : > { %v5108_v31 = vsel %vm5030_vm2, %v4942_v19, -inf  ;;  %v5095_v3 = vrot.slane %v5094_v46, 4  ;;  %v5102_v5 = vrot.slane %v5101_v15, 4  ;;  %v4310_v32 = vadd.f32 %v8385_v52, %v4075_v37 }
 0x545   : > { %v5089_v49 = vmax.f32 %v5087_v54, %v5088_v10  ;;  %v5109_v57 = vrot.slane %v5108_v31, 4  ;;  %v4845_v60 = vmax.f32 %v4813_v58, 0.0  ;;  %v8473_v54 = vpop.f32.mrf.mxu0  ;;  %v8475_v10 = vpop.f32.mrf.mxu2 }
 0x546   : > { %v5096_v41 = vmax.f32 %v5094_v46, %v5095_v3  ;;  %v5103_v35 = vmax.f32 %v5101_v15, %v5102_v5 }
 0x547   : > { %v5090_v9 = vrot.slane %v5089_v49, 2  ;;  %v5110_v61 = vmax.f32 %v5108_v31, %v5109_v57  ;;  %4877 = vst [vmem:[%s8378_s10 + $0x38] sm:$0xff] %v4845_v60  ;;  %v4905_v28 = vmax.f32 %v4843_v2, %v4845_v60 }
 0x548   : > { %v4710_v36 = vpop.f32.mrf.mxu1  ;;  %v5097_v11 = vrot.slane %v5096_v41, 2  ;;  %v5104_v39 = vrot.slane %v5103_v35, 2 }
 0x549   : > { %v5091_v13 = vmax.f32 %v5089_v49, %v5090_v9  ;;  %v5111_v21 = vrot.slane %v5110_v61, 2  ;;  %v4943_v6 = vrot.slane %v4905_v28, 2  ;;  %v4944_v23 = vrot.slane %v4905_v28, 4 }
 0x54a   : > { %v4945_v19 = vrot.slane %v4905_v28, 6  ;;  %v5098_v2 = vmax.f32 %v5096_v41, %v5097_v11  ;;  %v5105_v58 = vmax.f32 %v5103_v35, %v5104_v39  ;;  %v5115_v46 = vsel %vm5030_vm2, %v4905_v28, -inf }
 0x54b   : > { %4749 = vmatmul.bf16.gmra.mxu1 %v8332_v18  ;;  %v5122_v52 = vsel %vm5030_vm2, %v4943_v6, -inf  ;;  %v5129_v15 = vsel %vm5030_vm2, %v4944_v23, -inf  ;;  %v5092_v50 = vrot.slane %v5091_v13, 1  ;;  %v5112_v14 = vmax.f32 %v5110_v61, %v5111_v21  ;;  %v8485_v6 = vpop.f32.mrf.mxu3 }
 0x54c   : > { %v5136_v31 = vsel %vm5030_vm2, %v4945_v19, -inf  ;;  %v5099_v49 = vrot.slane %v5098_v2, 1  ;;  %v5106_v3 = vrot.slane %v5105_v58, 1  ;;  %v5116_v62 = vrot.slane %v5115_v46, 4 }
 0x54d   : > { %v5123_v5 = vrot.slane %v5122_v52, 4  ;;  %v5130_v57 = vrot.slane %v5129_v15, 4  ;;  %v5137_v37 = vrot.slane %v5136_v31, 4  ;;  %v4544_v18 = vadd.f32 %v8388_v63, %v4310_v32 }
 0x54e   : > { %v5100_v60 = vmax.f32 %v5098_v2, %v5099_v49  ;;  %v4545_v9 = vadd.f32 %v8400_v33, %v4311_v53  ;;  %v5117_v41 = vmax.f32 %v5115_v46, %v5116_v62  ;;  %v5093_v23 = vmax.f32 %v5091_v13, %v5092_v50  ;;  %v8492_v13 = vpop.f32.mrf.mxu0 }
 0x54f   : > { %v5124_v35 = vmax.f32 %v5122_v52, %v5123_v5  ;;  %v5131_v28 = vmax.f32 %v5129_v15, %v5130_v57  ;;  %v5138_v11 = vmax.f32 %v5136_v31, %v5137_v37  ;;  %v5113_v61 = vrot.slane %v5112_v14, 1 }
 0x550   : > { %v4712_v39 = vpop.f32.mrf.mxu1  ;;  %v4778_v21 = vadd.f32 %v4710_v36, %v4544_v18  ;;  %v5107_v38 = vmax.f32 %v5105_v58, %v5106_v3  ;;  %v5118_v0 = vrot.slane %v5117_v41, 2  ;;  %v5557_v12 = vsel %vm5543_vm3, %v5100_v60, %v5093_v23  ;;  %v8494_v36 = vpop.f32.mrf.mxu2 }
 0x551   : > { %v4779_v19 = vadd.f32 %v4712_v39, %v4545_v9  ;;  %v5125_v48 = vrot.slane %v5124_v35, 2  ;;  %v5132_v47 = vrot.slane %v5131_v28, 2  ;;  %v5139_v63 = vrot.slane %v5138_v11, 2 }
 0x552   : > { %v4814_v33 = vadd.f32 %v8369_v44, %v4778_v21  ;;  %v5119_v53 = vmax.f32 %v5117_v41, %v5118_v0  ;;  %v5558_v31 = vsel %vm5545_vm4, %v5107_v38, %v5557_v12  ;;  %v5114_v62 = vmax.f32 %v5112_v14, %v5113_v61 }
 0x553   : > { %v8490_v32 = vadd.f32 %v8369_v44, %v4779_v19  ;;  %v5126_v2 = vmax.f32 %v5124_v35, %v5125_v48  ;;  %v5133_v46 = vmax.f32 %v5131_v28, %v5132_v47  ;;  %v5140_v58 = vmax.f32 %v5138_v11, %v5139_v63  ;;  %v8505_v14 = vpop.f32.mrf.mxu3 }
 0x554   : > { %v4846_v52 = vmax.f32 %v4814_v33, 0.0  ;;  %v5120_v50 = vrot.slane %v5119_v53, 1  ;;  %v4546_v48 = vadd.f32 %v8414_v56, %v4312_v7  ;;  %v4078_v0 = vadd.f32 %v8416_v22, %v8216_v45 }
 0x555   : > { %v4847_v15 = vmax.f32 %v8490_v32, 0.0  ;;  %v5127_v49 = vrot.slane %v5126_v2, 1  ;;  %v5134_v3 = vrot.slane %v5133_v46, 1  ;;  %v5141_v5 = vrot.slane %v5140_v58, 1 }
 0x556   : > { %4878 = vst [vmem:[%s8378_s10 + $0x40] sm:$0xff] %v4846_v52  ;;  %v5121_v57 = vmax.f32 %v5119_v53, %v5120_v50  ;;  %v5559_v9 = vsel %vm5547_vm5, %v5114_v62, %v5558_v31  ;;  %v4313_v45 = vadd.f32 %v8423_v30, %v4078_v0  ;;  %v4079_v39 = vadd.f32 %v8431_v40, %v8224_v4  ;;  %v8516_v23 = vpop.f32.mrf.mxu0 }
 0x557   : > { %v5128_v37 = vmax.f32 %v5126_v2, %v5127_v49  ;;  %v5135_v60 = vmax.f32 %v5133_v46, %v5134_v3  ;;  %4879 = vst [vmem:[%s8378_s10 + $0x48] sm:$0xff] %v4847_v15  ;;  %v5142_v35 = vmax.f32 %v5140_v58, %v5141_v5  ;;  %v4080_v31 = vadd.f32 %v8454_v25, %v8235_v16 }
 0x558   : > { %v4715_v18 = vpop.f32.mrf.mxu1  ;;  %v5560_v41 = vsel %vm5549_vm6, %v5121_v57, %v5559_v9  ;;  %v8518_v61 = vpop.f32.mrf.mxu2  ;;  %v4547_v19 = vadd.f32 %v8429_v43, %v4313_v45  ;;  %v4314_v63 = vadd.f32 %v8447_v17, %v4079_v39 }
 0x559   : > { %v4780_v38 = vadd.f32 %v4715_v18, %v4546_v48  ;;  %v5561_v56 = vsel %vm5551_vm7, %v5128_v37, %v5560_v41 }
 0x55a   : > { %v5562_v22 = vsel %vm5553_vm8, %v5135_v60, %v5561_v56  ;;  %v4548_v0 = vadd.f32 %v8452_v29, %v4314_v63 }
 0x55b   : > { %v4816_v7 = vadd.f32 %v8369_v44, %v4780_v38  ;;  %4754 = vmatmul.bf16.gmra.mxu1 %v8343_v42  ;;  %v5563_v28 = vsel %vm5555_vm9, %v5142_v35, %v5562_v22  ;;  %v8530_v17 = vpop.f32.mrf.mxu3  ;;  %v4315_v38 = vadd.f32 %v8466_v51, %v4080_v31 }
 0x55c   : > { %5615 = vst [vmem:[%s8441_s14 + $0x8] sm:$0xff] %v5563_v28 }
 0x55d   : > { %v4848_v11 = vmax.f32 %v4816_v7, 0.0 }
 0x55e   : > { %v8535_v41 = vpop.f32.mrf.mxu0 }
 0x55f   : > { %4880 = vst [vmem:[%s8378_s10 + $0x50] sm:$0xff] %v4848_v11  ;;  %v4906_v21 = vmax.f32 %v4846_v52, %v4848_v11 }
 0x560   : > { %v4717_v42 = vpop.f32.mrf.mxu1  ;;  %v8537_v16 = vpop.f32.mrf.mxu2 }
 0x561   : > { %v4946_v47 = vrot.slane %v4906_v21, 2  ;;  %v4947_v30 = vrot.slane %v4906_v21, 4  ;;  %v4948_v12 = vrot.slane %v4906_v21, 6  ;;  %v5143_v33 = vsel %vm5030_vm2, %v4906_v21, -inf }
 0x562   : > { %v4781_v32 = vadd.f32 %v4717_v42, %v4547_v19  ;;  %v5144_v53 = vrot.slane %v5143_v33, 4 }
 0x563   : > { %v5150_v4 = vsel %vm5030_vm2, %v4946_v47, -inf  ;;  %v5157_v40 = vsel %vm5030_vm2, %v4947_v30, -inf  ;;  %v5164_v2 = vsel %vm5030_vm2, %v4948_v12, -inf  ;;  %v4081_v30 = vadd.f32 %v8475_v10, %v8243_v27 }
 0x564   : > { %v5151_v46 = vrot.slane %v5150_v4, 4  ;;  %v5158_v58 = vrot.slane %v5157_v40, 4  ;;  %v5165_v43 = vrot.slane %v5164_v2, 4  ;;  %v4817_v52 = vadd.f32 %v8369_v44, %v4781_v32  ;;  %v8547_v32 = vpop.f32.mrf.mxu3 }
 0x565   : > { %v5145_v50 = vmax.f32 %v5143_v33, %v5144_v53  ;;  %v4549_v33 = vadd.f32 %v8473_v54, %v4315_v38 }
 0x566   : > { %v5152_v49 = vmax.f32 %v5150_v4, %v5151_v46  ;;  %v5159_v3 = vmax.f32 %v5157_v40, %v5158_v58  ;;  %v5166_v62 = vmax.f32 %v5164_v2, %v5165_v43  ;;  %v4849_v5 = vmax.f32 %v4817_v52, 0.0 }
 0x567   : > { %v5146_v48 = vrot.slane %v5145_v50, 2 }
 0x568   : > { %v5153_v57 = vrot.slane %v5152_v49, 2  ;;  %v5160_v37 = vrot.slane %v5159_v3, 2  ;;  %v5167_v60 = vrot.slane %v5166_v62, 2  ;;  %4881 = vst [vmem:[%s8378_s10 + $0x58] sm:$0xff] %v4849_v5  ;;  %v4907_v18 = vmax.f32 %v4847_v15, %v4849_v5  ;;  %v4720_v9 = vpop.f32.mrf.mxu1 }
 0x569   : > { %v5147_v25 = vmax.f32 %v5145_v50, %v5146_v48  ;;  %v4782_v45 = vadd.f32 %v4720_v9, %v4548_v0 }
 0x56a   : > { %v5154_v35 = vmax.f32 %v5152_v49, %v5153_v57  ;;  %v5161_v56 = vmax.f32 %v5159_v3, %v5160_v37  ;;  %v4949_v7 = vrot.slane %v4907_v18, 2  ;;  %v4950_v28 = vrot.slane %v4907_v18, 4  ;;  %v8551_v3 = vpop.f32.mrf.mxu0  ;;  %v4598_v37 = vld [vmem:[#allocation3 + $0x19a] sm:$0xff] }
 0x56b   : > { %v5148_v22 = vrot.slane %v5147_v25, 1  ;;  %v4951_v29 = vrot.slane %v4907_v18, 6  ;;  %v5171_v11 = vsel %vm5030_vm2, %v4907_v18, -inf  ;;  %4759 = vmatmul.bf16.gmra.mxu1 %v8353_v20  ;;  %v5168_v21 = vmax.f32 %v5166_v62, %v5167_v60  ;;  %v8553_v62 = vpop.f32.mrf.mxu2  ;;  %v4599_v60 = vld [vmem:[#allocation3 + $0x1a2] sm:$0xff] }
 0x56c   : > { %v5155_v15 = vrot.slane %v5154_v35, 1  ;;  %v5162_v39 = vrot.slane %v5161_v56, 1  ;;  %v5172_v51 = vrot.slane %v5171_v11, 4  ;;  %v5178_v19 = vsel %vm5030_vm2, %v4949_v7, -inf }
 0x56d   : > { %v5185_v42 = vsel %vm5030_vm2, %v4950_v28, -inf  ;;  %v5192_v47 = vsel %vm5030_vm2, %v4951_v29, -inf  ;;  %v5149_v20 = vmax.f32 %v5147_v25, %v5148_v22  ;;  %v5179_v53 = vrot.slane %v5178_v19, 4 }
 0x56e   : > { %v5156_v12 = vmax.f32 %v5154_v35, %v5155_v15  ;;  %v5173_v63 = vmax.f32 %v5171_v11, %v5172_v51  ;;  %v5186_v4 = vrot.slane %v5185_v42, 4  ;;  %v5193_v40 = vrot.slane %v5192_v47, 4 }
 0x56f   : > { %v5163_v2 = vmax.f32 %v5161_v56, %v5162_v39  ;;  %v5169_v46 = vrot.slane %v5168_v21, 1  ;;  %v4818_v43 = vadd.f32 %v8369_v44, %v4782_v45  ;;  %v5180_v50 = vmax.f32 %v5178_v19, %v5179_v53 }
 0x570   : > { %v5174_v58 = vrot.slane %v5173_v63, 2  ;;  %v4722_v52 = vpop.f32.mrf.mxu1  ;;  %v5564_v31 = vsel %vm5543_vm3, %v5156_v12, %v5149_v20  ;;  %v5187_v27 = vmax.f32 %v5185_v42, %v5186_v4  ;;  %v5194_v10 = vmax.f32 %v5192_v47, %v5193_v40  ;;  %v8564_v47 = vpop.f32.mrf.mxu3 }
 0x571   : > { %v4850_v54 = vmax.f32 %v4818_v43, 0.0  ;;  %v5181_v5 = vrot.slane %v5180_v50, 2  ;;  %v4783_v57 = vadd.f32 %v4722_v52, %v4549_v33  ;;  %v4316_v18 = vadd.f32 %v8485_v6, %v4081_v30 }
 0x572   : > { %v5175_v49 = vmax.f32 %v5173_v63, %v5174_v58  ;;  %v5188_v48 = vrot.slane %v5187_v27, 2  ;;  %v5195_v0 = vrot.slane %v5194_v10, 2  ;;  %v5170_v9 = vmax.f32 %v5168_v21, %v5169_v46 }
 0x573   : > { %v5565_v38 = vsel %vm5545_vm4, %v5163_v2, %v5564_v31  ;;  %4882 = vst [vmem:[%s8378_s10 + $0x60] sm:$0xff] %v4850_v54  ;;  %v5182_v35 = vmax.f32 %v5180_v50, %v5181_v5  ;;  %v4819_v45 = vadd.f32 %v8369_v44, %v4783_v57  ;;  %v4082_v22 = vadd.f32 %v8494_v36, %v8254_v26  ;;  %v8573_v4 = vpop.f32.mrf.mxu2 }
 0x574   : > { %v5176_v25 = vrot.slane %v5175_v49, 1  ;;  %v5189_v56 = vmax.f32 %v5187_v27, %v5188_v48  ;;  %v5196_v7 = vmax.f32 %v5194_v10, %v5195_v0  ;;  %v4615_v29 = vpack.c.bf16 %v4599_v60, %v4598_v37 }
 0x575   : > { %v5566_v11 = vsel %vm5547_vm5, %v5170_v9, %v5565_v38  ;;  %v5183_v15 = vrot.slane %v5182_v35, 1  ;;  %v4851_v51 = vmax.f32 %v4819_v45, 0.0  ;;  %v4550_v19 = vadd.f32 %v8492_v13, %v4316_v18  ;;  %v8571_v13 = vpop.f32.mrf.mxu0 }
 0x576   : > { %v5177_v28 = vmax.f32 %v5175_v49, %v5176_v25  ;;  %v5190_v6 = vrot.slane %v5189_v56, 1  ;;  %v5197_v39 = vrot.slane %v5196_v7, 1  ;;  %v4317_v36 = vadd.f32 %v8505_v14, %v4082_v22 }
 0x577   : > { %v5184_v30 = vmax.f32 %v5182_v35, %v5183_v15  ;;  %4883 = vst [vmem:[%s8378_s10 + $0x68] sm:$0xff] %v4851_v51  ;;  %v4083_v14 = vadd.f32 %v8518_v61, %v8262_v24  ;;  %v4084_v52 = vadd.f32 %v8537_v16, %v8271_v1 }
 0x578   : > { %v5567_v21 = vsel %vm5549_vm6, %v5177_v28, %v5566_v11  ;;  %v4725_v42 = vpop.f32.mrf.mxu1  ;;  %v5191_v12 = vmax.f32 %v5189_v56, %v5190_v6  ;;  %v5198_v63 = vmax.f32 %v5196_v7, %v5197_v39  ;;  %v4551_v46 = vadd.f32 %v8516_v23, %v4317_v36  ;;  %v8584_v5 = vpop.f32.mrf.mxu3 }
 0x579   : > { %v4784_v26 = vadd.f32 %v4725_v42, %v4550_v19  ;;  %v5568_v33 = vsel %vm5551_vm7, %v5184_v30, %v5567_v21  ;;  %v4318_v0 = vadd.f32 %v8530_v17, %v4083_v14  ;;  %v4319_v60 = vadd.f32 %v8547_v32, %v4084_v52 }
 0x57a   : > { %v5569_v20 = vsel %vm5553_vm8, %v5191_v12, %v5568_v33 }
 0x57b   : > { %4764 = vmatmul.bf16.gmra.mxu1 %v4615_v29  ;;  %v4820_v53 = vadd.f32 %v8369_v44, %v4784_v26  ;;  %v5570_v40 = vsel %vm5555_vm9, %v5198_v63, %v5569_v20  ;;  %v8594_v38 = vpop.f32.mrf.mxu2  ;;  %v4552_v45 = vadd.f32 %v8535_v41, %v4318_v0  ;;  %v4553_v12 = vadd.f32 %v8551_v3, %v4319_v60 }
 0x57c   : > { %5616 = vst [vmem:[%s8441_s14 + $0x10] sm:$0xff] %v5570_v40  ;;  %v4085_v63 = vadd.f32 %v8553_v62, %v8279_v8 }
 0x57d   : > { %v4852_v2 = vmax.f32 %v4820_v53, 0.0  ;;  %v8592_v9 = vpop.f32.mrf.mxu0 }
 0x57f   : > { %4884 = vst [vmem:[%s8378_s10 + $0x70] sm:$0xff] %v4852_v2  ;;  %v4908_v58 = vmax.f32 %v4850_v54, %v4852_v2 }
 0x580   : > { %v4727_v43 = vpop.f32.mrf.mxu1  ;;  %v8605_v33 = vpop.f32.mrf.mxu3 }
 0x581   : > { %v4785_v31 = vadd.f32 %v4727_v43, %v4551_v46  ;;  %v4952_v50 = vrot.slane %v4908_v58, 2  ;;  %v4953_v27 = vrot.slane %v4908_v58, 4  ;;  %v4954_v10 = vrot.slane %v4908_v58, 6 }
 0x582   : > { %v5199_v49 = vsel %vm5030_vm2, %v4908_v58, -inf }
 0x583   : > { %v5200_v48 = vrot.slane %v5199_v49, 4  ;;  %v4821_v23 = vadd.f32 %v8369_v44, %v4785_v31  ;;  %v5206_v24 = vsel %vm5030_vm2, %v4952_v50, -inf  ;;  %v5213_v61 = vsel %vm5030_vm2, %v4953_v27, -inf  ;;  %v8609_v8 = vpop.f32.mrf.mxu2 }
 0x584   : > { %v5220_v1 = vsel %vm5030_vm2, %v4954_v10, -inf  ;;  %v5207_v54 = vrot.slane %v5206_v24, 4  ;;  %v5214_v57 = vrot.slane %v5213_v61, 4 }
 0x585   : > { %v5201_v16 = vmax.f32 %v5199_v49, %v5200_v48  ;;  %v5221_v37 = vrot.slane %v5220_v1, 4  ;;  %v4853_v18 = vmax.f32 %v4821_v23, 0.0  ;;  %v8607_v23 = vpop.f32.mrf.mxu0 }
 0x586   : > { %v5208_v17 = vmax.f32 %v5206_v24, %v5207_v54  ;;  %v5215_v35 = vmax.f32 %v5213_v61, %v5214_v57  ;;  %v4320_v57 = vadd.f32 %v8564_v47, %v4085_v63 }
 0x587   : > { %v5202_v25 = vrot.slane %v5201_v16, 2  ;;  %v5222_v56 = vmax.f32 %v5220_v1, %v5221_v37  ;;  %4885 = vst [vmem:[%s8378_s10 + $0x78] sm:$0xff] %v4853_v18  ;;  %v4909_v7 = vmax.f32 %v4851_v51, %v4853_v18 }
 0x588   : > { %v4730_v22 = vpop.f32.mrf.mxu1  ;;  %v5209_v29 = vrot.slane %v5208_v17, 2  ;;  %v5216_v11 = vrot.slane %v5215_v35, 2  ;;  %v4274_v47 = vpop.f32.mrf.mxu3 }
 0x589   : > { %v5203_v28 = vmax.f32 %v5201_v16, %v5202_v25  ;;  %v5223_v15 = vrot.slane %v5222_v56, 2  ;;  %v4955_v6 = vrot.slane %v4909_v7, 2  ;;  %v4956_v32 = vrot.slane %v4909_v7, 4 }
 0x58a   : > { %v4957_v39 = vrot.slane %v4909_v7, 6  ;;  %v5227_v21 = vsel %vm5030_vm2, %v4909_v7, -inf  ;;  %v5210_v42 = vmax.f32 %v5208_v17, %v5209_v29  ;;  %v5217_v30 = vmax.f32 %v5215_v35, %v5216_v11 }
 0x58b   : > { %v5204_v19 = vrot.slane %v5203_v28, 1  ;;  %v5228_v26 = vrot.slane %v5227_v21, 4  ;;  %v5234_v51 = vsel %vm5030_vm2, %v4955_v6, -inf  ;;  %v5241_v41 = vsel %vm5030_vm2, %v4956_v32, -inf }
 0x58c   : > { %v5248_v36 = vsel %vm5030_vm2, %v4957_v39, -inf  ;;  %v5211_v20 = vrot.slane %v5210_v42, 1  ;;  %v5218_v53 = vrot.slane %v5217_v30, 1  ;;  %v5224_v40 = vmax.f32 %v5222_v56, %v5223_v15 }
 0x58d   : > { %v5229_v2 = vmax.f32 %v5227_v21, %v5228_v26  ;;  %v5235_v46 = vrot.slane %v5234_v51, 4  ;;  %v5242_v14 = vrot.slane %v5241_v41, 4  ;;  %v5249_v58 = vrot.slane %v5248_v36, 4 }
 0x58e   : > { %v5205_v3 = vmax.f32 %v5203_v28, %v5204_v19  ;;  %v5212_v43 = vmax.f32 %v5210_v42, %v5211_v20  ;;  %v5219_v52 = vmax.f32 %v5217_v30, %v5218_v53  ;;  %v4786_v31 = vadd.f32 %v4730_v22, %v4552_v45 }
 0x58f   : > { %v5230_v50 = vrot.slane %v5229_v2, 2  ;;  %v5236_v27 = vmax.f32 %v5234_v51, %v5235_v46  ;;  %v5243_v10 = vmax.f32 %v5241_v41, %v5242_v14  ;;  %v5250_v49 = vmax.f32 %v5248_v36, %v5249_v58  ;;  %v8627_v41 = vpop.f32.mrf.mxu0  ;;  %v4042_v36 = vpop.f32.mrf.mxu2 }
 0x590   : > { %v4732_v48 = vpop.f32.mrf.mxu1  ;;  %v5225_v62 = vrot.slane %v5224_v40, 1  ;;  %v5571_v0 = vsel %vm5543_vm3, %v5212_v43, %v5205_v3  ;;  %v4822_v24 = vadd.f32 %v8369_v44, %v4786_v31  ;;  %v4554_v32 = vadd.f32 %v8571_v13, %v4320_v57  ;;  %v8638_v14 = vpop.f32.mrf.mxu3 }
 0x591   : > { %v4787_v61 = vadd.f32 %v4732_v48, %v4553_v12  ;;  %v5231_v1 = vmax.f32 %v5229_v2, %v5230_v50  ;;  %v5237_v16 = vrot.slane %v5236_v27, 2  ;;  %v5244_v54 = vrot.slane %v5243_v10, 2 }
 0x592   : > { %v5251_v37 = vrot.slane %v5250_v49, 2  ;;  %v4854_v60 = vmax.f32 %v4822_v24, 0.0  ;;  %v5572_v25 = vsel %vm5545_vm4, %v5219_v52, %v5571_v0  ;;  %v5226_v7 = vmax.f32 %v5224_v40, %v5225_v62 }
 0x593   : > { %v8615_v18 = vadd.f32 %v8369_v44, %v4787_v61  ;;  %v5232_v17 = vrot.slane %v5231_v1, 1  ;;  %v5238_v35 = vmax.f32 %v5236_v27, %v5237_v16  ;;  %v5245_v56 = vmax.f32 %v5243_v10, %v5244_v54 }
 0x594   : > { %v5252_v45 = vmax.f32 %v5250_v49, %v5251_v37  ;;  %4886 = vst [vmem:[%s8378_s10 + $0x80] sm:$0xff] %v4854_v60  ;;  %v5573_v15 = vsel %vm5547_vm5, %v5226_v7, %v5572_v25  ;;  %v4086_v39 = vadd.f32 %v8573_v4, %v8288_v55  ;;  %v4087_v53 = vadd.f32 %v8594_v38, %v8296_v59 }
 0x595   : > { %v4855_v22 = vmax.f32 %v8615_v18, 0.0  ;;  %v5233_v28 = vmax.f32 %v5231_v1, %v5232_v17  ;;  %v5239_v29 = vrot.slane %v5238_v35, 1  ;;  %v5246_v11 = vrot.slane %v5245_v56, 1 }
 0x596   : > { %v5253_v6 = vrot.slane %v5252_v45, 1  ;;  %v4321_v20 = vadd.f32 %v8584_v5, %v4086_v39  ;;  %v4322_v50 = vadd.f32 %v8605_v33, %v4087_v53  ;;  %v4088_v62 = vadd.f32 %v8609_v8, %v8305_v34 }
 0x597   : > { %4887 = vst [vmem:[%s8378_s10 + $0x88] sm:$0xff] %v4855_v22  ;;  %v5240_v21 = vmax.f32 %v5238_v35, %v5239_v29  ;;  %v5247_v19 = vmax.f32 %v5245_v56, %v5246_v11  ;;  %v5574_v42 = vsel %vm5549_vm6, %v5233_v28, %v5573_v15  ;;  %v8647_v0 = vpop.f32.mrf.mxu0  ;;  %v8649_v24 = vpop.f32.mrf.mxu2 }
 0x598   : > { %v4735_v30 = vpop.f32.mrf.mxu1  ;;  %v5254_v26 = vmax.f32 %v5252_v45, %v5253_v6  ;;  %v4555_v2 = vadd.f32 %v8592_v9, %v4321_v20  ;;  %v4556_v37 = vadd.f32 %v8607_v23, %v4322_v50  ;;  %v4323_v8 = vadd.f32 %v4274_v47, %v4088_v62  ;;  %v8654_v28 = vpop.f32.mrf.mxu3 }
 0x599   : > { %v4788_v12 = vadd.f32 %v4735_v30, %v4554_v32  ;;  %v5575_v51 = vsel %vm5551_vm7, %v5240_v21, %v5574_v42  ;;  %v8825_v42 = vld [vmem:[#allocation7_spill] sm:$0xff] }
 0x59a   : > { %v5576_v63 = vsel %vm5553_vm8, %v5247_v19, %v5575_v51  ;;  %v4089_v30 = vadd.f32 %v4042_v36, %v8825_v42  ;;  %v4557_v36 = vadd.f32 %v8627_v41, %v4323_v8 }
 0x59b   : > { %v4824_v13 = vadd.f32 %v8369_v44, %v4788_v12  ;;  %v5577_v55 = vsel %vm5555_vm9, %v5254_v26, %v5576_v63 }
 0x59c   : > { %5617 = vst [vmem:[%s8441_s14 + $0x18] sm:$0xff] %v5577_v55 }
 0x59d   : > { %v4856_v4 = vmax.f32 %v4824_v13, 0.0 }
 0x59f   : > { %4888 = vst [vmem:[%s8378_s10 + $0x90] sm:$0xff] %v4856_v4  ;;  %v4910_v40 = vmax.f32 %v4854_v60, %v4856_v4  ;;  %v4513_v51 = vpop.f32.mrf.mxu0  ;;  %v4047_v63 = vpop.f32.mrf.mxu2  ;;  %v8664_v4 = vld [vmem:[%s8773_s4] ss:$0 sm:$0xff] }
 0x5a0   : > { %v4737_v46 = vpop.f32.mrf.mxu1  ;;  %v4282_v41 = vpop.f32.mrf.mxu3 }
 0x5a1   : > { %v4958_v58 = vrot.slane %v4910_v40, 2  ;;  %v4959_v3 = vrot.slane %v4910_v40, 4  ;;  %v4960_v43 = vrot.slane %v4910_v40, 6  ;;  %v5255_v52 = vsel %vm5030_vm2, %v4910_v40, -inf }
 0x5a2   : > { %v5256_v5 = vrot.slane %v5255_v52, 4  ;;  %v4789_v31 = vadd.f32 %v4737_v46, %v4555_v2 }
 0x5a3   : > { %v5262_v27 = vsel %vm5030_vm2, %v4958_v58, -inf  ;;  %v5269_v59 = vsel %vm5030_vm2, %v4959_v3, -inf  ;;  %v5276_v38 = vsel %vm5030_vm2, %v4960_v43, -inf }
 0x5a4   : > { %v5257_v10 = vmax.f32 %v5255_v52, %v5256_v5  ;;  %v5263_v9 = vrot.slane %v5262_v27, 4  ;;  %v5270_v49 = vrot.slane %v5269_v59, 4  ;;  %v5277_v48 = vrot.slane %v5276_v38, 4 }
 0x5a5   : > { %v4825_v33 = vadd.f32 %v8369_v44, %v4789_v31 }
 0x5a6   : > { %v5258_v61 = vrot.slane %v5257_v10, 2  ;;  %v5264_v1 = vmax.f32 %v5262_v27, %v5263_v9  ;;  %v5271_v16 = vmax.f32 %v5269_v59, %v5270_v49  ;;  %v5278_v54 = vmax.f32 %v5276_v38, %v5277_v48 }
 0x5a7   : > { %v4857_v57 = vmax.f32 %v4825_v33, 0.0  ;;  %v4324_v38 = vadd.f32 %v8638_v14, %v4089_v30 }
 0x5a8   : > { %v5259_v60 = vmax.f32 %v5257_v10, %v5258_v61  ;;  %v5265_v18 = vrot.slane %v5264_v1, 2  ;;  %v5272_v25 = vrot.slane %v5271_v16, 2  ;;  %v5279_v17 = vrot.slane %v5278_v54, 2  ;;  %v4740_v35 = vpop.f32.mrf.mxu1 }
 0x5a9   : > { %4889 = vst [vmem:[%s8378_s10 + $0x98] sm:$0xff] %v4857_v57  ;;  %v4911_v34 = vmax.f32 %v4855_v22, %v4857_v57  ;;  %v4790_v45 = vadd.f32 %v4740_v35, %v4556_v37 }
 0x5aa   : > { %v5266_v56 = vmax.f32 %v5264_v1, %v5265_v18  ;;  %v5273_v7 = vmax.f32 %v5271_v16, %v5272_v25  ;;  %v5260_v6 = vrot.slane %v5259_v60, 1  ;;  %v5280_v39 = vmax.f32 %v5278_v54, %v5279_v17  ;;  %v8826_v17 = vld [vmem:[#allocation8_spill] sm:$0xff] }
 0x5ab   : > { %v4961_v44 = vrot.slane %v4911_v34, 2  ;;  %v4962_v29 = vrot.slane %v4911_v34, 4  ;;  %v4963_v11 = vrot.slane %v4911_v34, 6  ;;  %v5283_v15 = vsel %vm5030_vm2, %v4911_v34, -inf }
 0x5ac   : > { %v5267_v23 = vrot.slane %v5266_v56, 1  ;;  %v5274_v32 = vrot.slane %v5273_v7, 1  ;;  %v5284_v21 = vrot.slane %v5283_v15, 4  ;;  %v4826_v53 = vadd.f32 %v8664_v4, %v4790_v45  ;;  %v4049_v45 = vpop.f32.mrf.mxu2 }
 0x5ad   : > { %v5290_v19 = vsel %vm5030_vm2, %v4961_v44, -inf  ;;  %v5297_v22 = vsel %vm5030_vm2, %v4962_v29, -inf  ;;  %v5304_v47 = vsel %vm5030_vm2, %v4963_v11, -inf  ;;  %v5261_v40 = vmax.f32 %v5259_v60, %v5260_v6 }
 0x5ae   : > { %v5268_v12 = vmax.f32 %v5266_v56, %v5267_v23  ;;  %v5291_v26 = vrot.slane %v5290_v19, 4  ;;  %v5285_v13 = vmax.f32 %v5283_v15, %v5284_v21  ;;  %v5298_v20 = vrot.slane %v5297_v22, 4  ;;  %v8827_v21 = vld [vmem:[#allocation12_spill] sm:$0xff] }
 0x5af   : > { %v5305_v55 = vrot.slane %v5304_v47, 4  ;;  %v5281_v2 = vrot.slane %v5280_v39, 1  ;;  %v5275_v3 = vmax.f32 %v5273_v7, %v5274_v32  ;;  %v4858_v27 = vmax.f32 %v4826_v53, 0.0  ;;  %v4516_v7 = vpop.f32.mrf.mxu0 }
 0x5b0   : > { %v5292_v46 = vmax.f32 %v5290_v19, %v5291_v26  ;;  %v4742_v58 = vpop.f32.mrf.mxu1  ;;  %v5286_v43 = vrot.slane %v5285_v13, 2  ;;  %v5299_v52 = vmax.f32 %v5297_v22, %v5298_v20  ;;  %v5578_v31 = vsel %vm5543_vm3, %v5268_v12, %v5261_v40  ;;  %v4284_v22 = vpop.f32.mrf.mxu3 }
 0x5b1   : > { %v5306_v5 = vmax.f32 %v5304_v47, %v5305_v55  ;;  %v4791_v59 = vadd.f32 %v4742_v58, %v4557_v36  ;;  %4890 = vst [vmem:[%s8378_s10 + $0xa0] sm:$0xff] %v4858_v27  ;;  %v5579_v33 = vsel %vm5545_vm4, %v5275_v3, %v5578_v31  ;;  %v5282_v54 = vmax.f32 %v5280_v39, %v5281_v2 }
 0x5b2   : > { %v5293_v50 = vrot.slane %v5292_v46, 2  ;;  %v5287_v10 = vmax.f32 %v5285_v13, %v5286_v43  ;;  %v5300_v9 = vrot.slane %v5299_v52, 2  ;;  %v4558_v25 = vadd.f32 %v8647_v0, %v4324_v38 }
 0x5b3   : > { %v5307_v49 = vrot.slane %v5306_v5, 2  ;;  %v8672_v62 = vadd.f32 %v8664_v4, %v4791_v59  ;;  %v4090_v35 = vadd.f32 %v8649_v24, %v8826_v17  ;;  %v5580_v34 = vsel %vm5547_vm5, %v5282_v54, %v5579_v33 }
 0x5b4   : > { %v5294_v48 = vmax.f32 %v5292_v46, %v5293_v50  ;;  %v5288_v61 = vrot.slane %v5287_v10, 1  ;;  %v5301_v1 = vmax.f32 %v5299_v52, %v5300_v9  ;;  %v4091_v19 = vadd.f32 %v4047_v63, %v8827_v21  ;;  %v4052_v2 = vpop.f32.mrf.mxu2  ;;  %v8828_v52 = vld [vmem:[#allocation10_spill] sm:$0xff] }
 0x5b5   : > { %v5308_v16 = vmax.f32 %v5306_v5, %v5307_v49  ;;  %v4859_v37 = vmax.f32 %v8672_v62, 0.0  ;;  %v4325_v23 = vadd.f32 %v8654_v28, %v4090_v35  ;;  %v4092_v5 = vadd.f32 %v4049_v45, %v8828_v52 }
 0x5b6   : > { %v5295_v57 = vrot.slane %v5294_v48, 1  ;;  %v5289_v14 = vmax.f32 %v5287_v10, %v5288_v61  ;;  %v5302_v60 = vrot.slane %v5301_v1, 1  ;;  %v4326_v40 = vadd.f32 %v4282_v41, %v4091_v19 }
 0x5b7   : > { %v5309_v18 = vrot.slane %v5308_v16, 1  ;;  %4891 = vst [vmem:[%s8378_s10 + $0xa8] sm:$0xff] %v4859_v37  ;;  %v4559_v42 = vadd.f32 %v4513_v51, %v4325_v23  ;;  %v4518_v28 = vpop.f32.mrf.mxu0 }
 0x5b8   : > { %v5296_v8 = vmax.f32 %v5294_v48, %v5295_v57  ;;  %v4745_v56 = vpop.f32.mrf.mxu1  ;;  %v5303_v44 = vmax.f32 %v5301_v1, %v5302_v60  ;;  %v5581_v29 = vsel %vm5549_vm6, %v5289_v14, %v5580_v34  ;;  %v4560_v9 = vadd.f32 %v4516_v7, %v4326_v40  ;;  %v4287_v61 = vpop.f32.mrf.mxu3 }
 0x5b9   : > { %v4792_v11 = vadd.f32 %v4745_v56, %v4558_v25  ;;  %v5310_v15 = vmax.f32 %v5308_v16, %v5309_v18  ;;  %v4327_v16 = vadd.f32 %v4284_v22, %v4092_v5 }
 0x5ba   : > { %v5582_v6 = vsel %vm5551_vm7, %v5296_v8, %v5581_v29 }
 0x5bb   : > { %v5583_v0 = vsel %vm5553_vm8, %v5303_v44, %v5582_v6  ;;  %v4828_v24 = vadd.f32 %v8664_v4, %v4792_v11 }
 0x5bc   : > { %v5584_v32 = vsel %vm5555_vm9, %v5310_v15, %v5583_v0  ;;  %v4054_v45 = vpop.f32.mrf.mxu2  ;;  %v8829_v15 = vld [vmem:[#allocation11_spill] sm:$0xff] }
 0x5bd   : > { %5618 = vst [vmem:[%s8441_s14 + $0x20] sm:$0xff] %v5584_v32  ;;  %v4860_v39 = vmax.f32 %v4828_v24, 0.0  ;;  %v4093_v6 = vadd.f32 %v4052_v2, %v8829_v15 }
 0x5bf   : > { %4892 = vst [vmem:[%s8378_s10 + $0xb0] sm:$0xff] %v4860_v39  ;;  %v4912_v47 = vmax.f32 %v4858_v27, %v4860_v39  ;;  %v4521_v7 = vpop.f32.mrf.mxu0 }
 0x5c0   : > { %v4747_v30 = vpop.f32.mrf.mxu1 }
 0x5c1   : > { %v4964_v12 = vrot.slane %v4912_v47, 2  ;;  %v4965_v26 = vrot.slane %v4912_v47, 4  ;;  %v4966_v13 = vrot.slane %v4912_v47, 6  ;;  %v5311_v20 = vsel %vm5030_vm2, %v4912_v47, -inf }
 0x5c2   : > { %v5312_v55 = vrot.slane %v5311_v20, 4  ;;  %v4793_v53 = vadd.f32 %v4747_v30, %v4559_v42  ;;  %v4561_v42 = vadd.f32 %v4518_v28, %v4327_v16 }
 0x5c3   : > { %v5318_v46 = vsel %vm5030_vm2, %v4964_v12, -inf  ;;  %v5325_v36 = vsel %vm5030_vm2, %v4965_v26, -inf  ;;  %v5332_v63 = vsel %vm5030_vm2, %v4966_v13, -inf }
 0x5c4   : > { %v5313_v58 = vmax.f32 %v5311_v20, %v5312_v55  ;;  %v5319_v3 = vrot.slane %v5318_v46, 4  ;;  %v5326_v51 = vrot.slane %v5325_v36, 4  ;;  %v5333_v43 = vrot.slane %v5332_v63, 4 }
 0x5c5   : > { %v4829_v31 = vadd.f32 %v8664_v4, %v4793_v53 }
 0x5c6   : > { %v5314_v50 = vrot.slane %v5313_v58, 2  ;;  %v5320_v27 = vmax.f32 %v5318_v46, %v5319_v3  ;;  %v5327_v59 = vmax.f32 %v5325_v36, %v5326_v51  ;;  %v5334_v38 = vmax.f32 %v5332_v63, %v5333_v43  ;;  %v4289_v36 = vpop.f32.mrf.mxu3 }
 0x5c7   : > { %v4861_v10 = vmax.f32 %v4829_v31, 0.0  ;;  %v4328_v46 = vadd.f32 %v4287_v61, %v4093_v6 }
 0x5c8   : > { %v5315_v49 = vmax.f32 %v5313_v58, %v5314_v50  ;;  %v5321_v48 = vrot.slane %v5320_v27, 2  ;;  %v5328_v62 = vrot.slane %v5327_v59, 2  ;;  %v5335_v41 = vrot.slane %v5334_v38, 2  ;;  %v4750_v33 = vpop.f32.mrf.mxu1 }
 0x5c9   : > { %4893 = vst [vmem:[%s8378_s10 + $0xb8] sm:$0xff] %v4861_v10  ;;  %v4913_v1 = vmax.f32 %v4859_v37, %v4861_v10  ;;  %v4794_v14 = vadd.f32 %v4750_v33, %v4560_v9  ;;  %v4057_v10 = vpop.f32.mrf.mxu2 }
 0x5ca   : > { %v5322_v54 = vmax.f32 %v5320_v27, %v5321_v48  ;;  %v5329_v57 = vmax.f32 %v5327_v59, %v5328_v62  ;;  %v5316_v35 = vrot.slane %v5315_v49, 1  ;;  %v5336_v56 = vmax.f32 %v5334_v38, %v5335_v41  ;;  %v4523_v38 = vpop.f32.mrf.mxu0  ;;  %v8830_v41 = vld [vmem:[#allocation13_spill] sm:$0xff] }
 0x5cb   : > { %v4967_v60 = vrot.slane %v4913_v1, 2  ;;  %v4968_v18 = vrot.slane %v4913_v1, 4  ;;  %v4969_v25 = vrot.slane %v4913_v1, 6  ;;  %v5339_v17 = vsel %vm5030_vm2, %v4913_v1, -inf }
 0x5cc   : > { %v5323_v34 = vrot.slane %v5322_v54, 1  ;;  %v5330_v8 = vrot.slane %v5329_v57, 1  ;;  %v5340_v44 = vrot.slane %v5339_v17, 4  ;;  %v4830_v21 = vadd.f32 %v8664_v4, %v4794_v14 }
 0x5cd   : > { %v5346_v29 = vsel %vm5030_vm2, %v4967_v60, -inf  ;;  %v5353_v37 = vsel %vm5030_vm2, %v4968_v18, -inf  ;;  %v5360_v11 = vsel %vm5030_vm2, %v4969_v25, -inf  ;;  %v5317_v19 = vmax.f32 %v5315_v49, %v5316_v35 }
 0x5ce   : > { %v5324_v0 = vmax.f32 %v5322_v54, %v5323_v34  ;;  %v5347_v24 = vrot.slane %v5346_v29, 4  ;;  %v5341_v23 = vmax.f32 %v5339_v17, %v5340_v44  ;;  %v5354_v32 = vrot.slane %v5353_v37, 4 }
 0x5cf   : > { %v5361_v39 = vrot.slane %v5360_v11, 4  ;;  %v5337_v22 = vrot.slane %v5336_v56, 1  ;;  %v5331_v12 = vmax.f32 %v5329_v57, %v5330_v8  ;;  %v4862_v40 = vmax.f32 %v4830_v21, 0.0  ;;  %v4292_v8 = vpop.f32.mrf.mxu3 }
 0x5d0   : > { %v5348_v47 = vmax.f32 %v5346_v29, %v5347_v24  ;;  %v4752_v30 = vpop.f32.mrf.mxu1  ;;  %v5342_v26 = vrot.slane %v5341_v23, 2  ;;  %v5355_v13 = vmax.f32 %v5353_v37, %v5354_v32  ;;  %v5585_v55 = vsel %vm5543_vm3, %v5324_v0, %v5317_v19 }
 0x5d1   : > { %v5362_v20 = vmax.f32 %v5360_v11, %v5361_v39  ;;  %v4795_v2 = vadd.f32 %v4752_v30, %v4561_v42  ;;  %4894 = vst [vmem:[%s8378_s10 + $0xc0] sm:$0xff] %v4862_v40  ;;  %v5586_v43 = vsel %vm5545_vm4, %v5331_v12, %v5585_v55  ;;  %v5338_v50 = vmax.f32 %v5336_v56, %v5337_v22  ;;  %v4059_v15 = vpop.f32.mrf.mxu2 }
 0x5d2   : > { %v5349_v53 = vrot.slane %v5348_v47, 2  ;;  %v5343_v63 = vmax.f32 %v5341_v23, %v5342_v26  ;;  %v5356_v58 = vrot.slane %v5355_v13, 2  ;;  %v4562_v62 = vadd.f32 %v4521_v7, %v4328_v46  ;;  %v8831_v7 = vld [vmem:[#allocation14_spill] sm:$0xff]  ;;  %v4526_v11 = vpop.f32.mrf.mxu0 }
 0x5d3   : > { %v5363_v3 = vrot.slane %v5362_v20, 2  ;;  %v8706_v28 = vadd.f32 %v8664_v4, %v4795_v2  ;;  %v4094_v33 = vadd.f32 %v4054_v45, %v8830_v41  ;;  %v5587_v61 = vsel %vm5547_vm5, %v5338_v50, %v5586_v43 }
 0x5d4   : > { %v5350_v51 = vmax.f32 %v5348_v47, %v5349_v53  ;;  %v5344_v52 = vrot.slane %v5343_v63, 1  ;;  %v5357_v5 = vmax.f32 %v5355_v13, %v5356_v58  ;;  %v4095_v45 = vadd.f32 %v4057_v10, %v8831_v7  ;;  %v8832_v13 = vld [vmem:[#allocation15_spill] sm:$0xff] }
 0x5d5   : > { %v5364_v31 = vmax.f32 %v5362_v20, %v5363_v3  ;;  %v4863_v59 = vmax.f32 %v8706_v28, 0.0  ;;  %v4329_v35 = vadd.f32 %v4289_v36, %v4094_v33  ;;  %v4096_v20 = vadd.f32 %v4059_v15, %v8832_v13 }
 0x5d6   : > { %v5351_v27 = vrot.slane %v5350_v51, 1  ;;  %v5345_v9 = vmax.f32 %v5343_v63, %v5344_v52  ;;  %v5358_v49 = vrot.slane %v5357_v5, 1  ;;  %v4330_v21 = vadd.f32 %v4292_v8, %v4095_v45 }
 0x5d7   : > { %v5365_v48 = vrot.slane %v5364_v31, 1  ;;  %4895 = vst [vmem:[%s8378_s10 + $0xc8] sm:$0xff] %v4863_v59  ;;  %v4563_v29 = vadd.f32 %v4523_v38, %v4329_v35  ;;  %v4294_v36 = vpop.f32.mrf.mxu3 }
 0x5d8   : > { %v5352_v1 = vmax.f32 %v5350_v51, %v5351_v27  ;;  %v4755_v16 = vpop.f32.mrf.mxu1  ;;  %v5359_v54 = vmax.f32 %v5357_v5, %v5358_v49  ;;  %v5588_v57 = vsel %vm5549_vm6, %v5345_v9, %v5587_v61  ;;  %v4564_v58 = vadd.f32 %v4526_v11, %v4330_v21 }
 0x5d9   : > { %v4796_v14 = vadd.f32 %v4755_v16, %v4562_v62  ;;  %v5366_v60 = vmax.f32 %v5364_v31, %v5365_v48  ;;  %v4331_v31 = vadd.f32 %v4294_v36, %v4096_v20  ;;  %v4062_v9 = vpop.f32.mrf.mxu2 }
 0x5da   : > { %v5589_v18 = vsel %vm5551_vm7, %v5352_v1, %v5588_v57  ;;  %v4528_v10 = vpop.f32.mrf.mxu0 }
 0x5db   : > { %v5590_v25 = vsel %vm5553_vm8, %v5359_v54, %v5589_v18  ;;  %v4832_v17 = vadd.f32 %v8664_v4, %v4796_v14 }
 0x5dc   : > { %v5591_v34 = vsel %vm5555_vm9, %v5366_v60, %v5590_v25  ;;  %v8833_v60 = vld [vmem:[#allocation16_spill] sm:$0xff] }
 0x5dd   : > { %5619 = vst [vmem:[%s8441_s14 + $0x28] sm:$0xff] %v5591_v34  ;;  %v4864_v56 = vmax.f32 %v4832_v17, 0.0  ;;  %v4097_v18 = vadd.f32 %v4062_v9, %v8833_v60 }
 0x5df   : > { %4896 = vst [vmem:[%s8378_s10 + $0xd0] sm:$0xff] %v4864_v56  ;;  %v4914_v44 = vmax.f32 %v4862_v40, %v4864_v56  ;;  %v4297_v35 = vpop.f32.mrf.mxu3 }
 0x5e0   : > { %v4757_v37 = vpop.f32.mrf.mxu1 }
 0x5e1   : > { %v4970_v6 = vrot.slane %v4914_v44, 2  ;;  %v4971_v0 = vrot.slane %v4914_v44, 4  ;;  %v4972_v24 = vrot.slane %v4914_v44, 6  ;;  %v5367_v23 = vsel %vm5030_vm2, %v4914_v44, -inf  ;;  %v4064_v13 = vpop.f32.mrf.mxu2 }
 0x5e2   : > { %v5368_v32 = vrot.slane %v5367_v23, 4  ;;  %v4797_v39 = vadd.f32 %v4757_v37, %v4563_v29  ;;  %v4565_v37 = vadd.f32 %v4528_v10, %v4331_v31 }
 0x5e3   : > { %v5374_v19 = vsel %vm5030_vm2, %v4970_v6, -inf  ;;  %v5381_v22 = vsel %vm5030_vm2, %v4971_v0, -inf  ;;  %v5388_v47 = vsel %vm5030_vm2, %v4972_v24, -inf }
 0x5e4   : > { %v5369_v42 = vmax.f32 %v5367_v23, %v5368_v32  ;;  %v5375_v30 = vrot.slane %v5374_v19, 4  ;;  %v5382_v12 = vrot.slane %v5381_v22, 4  ;;  %v5389_v26 = vrot.slane %v5388_v47, 4 }
 0x5e5   : > { %v4833_v55 = vadd.f32 %v8664_v4, %v4797_v39 }
 0x5e6   : > { %v5370_v53 = vrot.slane %v5369_v42, 2  ;;  %v5376_v40 = vmax.f32 %v5374_v19, %v5375_v30  ;;  %v5383_v2 = vmax.f32 %v5381_v22, %v5382_v12  ;;  %v5390_v46 = vmax.f32 %v5388_v47, %v5389_v26  ;;  %v4531_v22 = vpop.f32.mrf.mxu0 }
 0x5e7   : > { %v4865_v63 = vmax.f32 %v4833_v55, 0.0  ;;  %v4332_v19 = vadd.f32 %v4297_v35, %v4097_v18 }
 0x5e8   : > { %v5371_v3 = vmax.f32 %v5369_v42, %v5370_v53  ;;  %v5377_v51 = vrot.slane %v5376_v40, 2  ;;  %v5384_v28 = vrot.slane %v5383_v2, 2  ;;  %v5391_v43 = vrot.slane %v5390_v46, 2  ;;  %v4760_v52 = vpop.f32.mrf.mxu1 }
 0x5e9   : > { %4897 = vst [vmem:[%s8378_s10 + $0xd8] sm:$0xff] %v4865_v63  ;;  %v4915_v5 = vmax.f32 %v4863_v59, %v4865_v63  ;;  %v4798_v38 = vadd.f32 %v4760_v52, %v4564_v58  ;;  %v4566_v63 = vadd.f32 %v4531_v22, %v4332_v19 }
 0x5ea   : > { %v5378_v50 = vmax.f32 %v5376_v40, %v5377_v51  ;;  %v5385_v27 = vmax.f32 %v5383_v2, %v5384_v28  ;;  %v5372_v33 = vrot.slane %v5371_v3, 1  ;;  %v5392_v16 = vmax.f32 %v5390_v46, %v5391_v43  ;;  %v8834_v28 = vld [vmem:[#allocation17_spill] sm:$0xff] }
 0x5eb   : > { %v4973_v49 = vrot.slane %v4915_v5, 2  ;;  %v4974_v48 = vrot.slane %v4915_v5, 4  ;;  %v4975_v62 = vrot.slane %v4915_v5, 6  ;;  %v5395_v41 = vsel %vm5030_vm2, %v4915_v5, -inf }
 0x5ec   : > { %v5379_v61 = vrot.slane %v5378_v50, 1  ;;  %v5386_v1 = vrot.slane %v5385_v27, 1  ;;  %v5396_v54 = vrot.slane %v5395_v41, 4  ;;  %v4834_v7 = vadd.f32 %v8664_v4, %v4798_v38 }
 0x5ed   : > { %v5402_v57 = vsel %vm5030_vm2, %v4973_v49, -inf  ;;  %v5409_v59 = vsel %vm5030_vm2, %v4974_v48, -inf  ;;  %v5416_v14 = vsel %vm5030_vm2, %v4975_v62, -inf  ;;  %v5373_v45 = vmax.f32 %v5371_v3, %v5372_v33 }
 0x5ee   : > { %v5380_v25 = vmax.f32 %v5378_v50, %v5379_v61  ;;  %v5403_v17 = vrot.slane %v5402_v57, 4  ;;  %v5397_v34 = vmax.f32 %v5395_v41, %v5396_v54  ;;  %v5410_v8 = vrot.slane %v5409_v59, 4  ;;  %v4299_v50 = vpop.f32.mrf.mxu3  ;;  %v4533_v61 = vpop.f32.mrf.mxu0 }
 0x5ef   : > { %v5417_v56 = vrot.slane %v5416_v14, 4  ;;  %v5393_v44 = vrot.slane %v5392_v16, 1  ;;  %v5387_v15 = vmax.f32 %v5385_v27, %v5386_v1  ;;  %v4866_v39 = vmax.f32 %v4834_v7, 0.0 }
 0x5f0   : > { %v5404_v29 = vmax.f32 %v5402_v57, %v5403_v17  ;;  %v4762_v11 = vpop.f32.mrf.mxu1  ;;  %v5398_v6 = vrot.slane %v5397_v34, 2  ;;  %v5411_v0 = vmax.f32 %v5409_v59, %v5410_v8  ;;  %v5592_v23 = vsel %vm5543_vm3, %v5380_v25, %v5373_v45 }
 0x5f1   : > { %v5418_v24 = vmax.f32 %v5416_v14, %v5417_v56  ;;  %v4799_v21 = vadd.f32 %v4762_v11, %v4565_v37  ;;  %4898 = vst [vmem:[%s8378_s10 + $0xe0] sm:$0xff] %v4866_v39  ;;  %v5593_v20 = vsel %vm5545_vm4, %v5387_v15, %v5592_v23  ;;  %v5394_v2 = vmax.f32 %v5392_v16, %v5393_v44 }
 0x5f2   : > { %v5405_v32 = vrot.slane %v5404_v29, 2  ;;  %v5399_v47 = vmax.f32 %v5397_v34, %v5398_v6  ;;  %v5412_v42 = vrot.slane %v5411_v0, 2  ;;  %v4098_v43 = vadd.f32 %v4064_v13, %v8834_v28 }
 0x5f3   : > { %v5419_v30 = vrot.slane %v5418_v24, 2  ;;  %v4835_v26 = vadd.f32 %v8664_v4, %v4799_v21  ;;  %v5594_v52 = vsel %vm5547_vm5, %v5394_v2, %v5593_v20 }
 0x5f4   : > { %v5406_v12 = vmax.f32 %v5404_v29, %v5405_v32  ;;  %v5400_v55 = vrot.slane %v5399_v47, 1  ;;  %v5413_v53 = vmax.f32 %v5411_v0, %v5412_v42  ;;  %v4333_v41 = vadd.f32 %v4299_v50, %v4098_v43 }
 0x5f5   : > { %v5420_v40 = vmax.f32 %v5418_v24, %v5419_v30  ;;  %v4867_v36 = vmax.f32 %v4835_v26, 0.0 }
 0x5f6   : > { %v5407_v46 = vrot.slane %v5406_v12, 1  ;;  %v5401_v58 = vmax.f32 %v5399_v47, %v5400_v55  ;;  %v5414_v3 = vrot.slane %v5413_v53, 1  ;;  %v4567_v54 = vadd.f32 %v4533_v61, %v4333_v41 }
 0x5f7   : > { %v5421_v51 = vrot.slane %v5420_v40, 1  ;;  %4899 = vst [vmem:[%s8378_s10 + $0xe8] sm:$0xff] %v4867_v36 }
 0x5f8   : > { %v5408_v5 = vmax.f32 %v5406_v12, %v5407_v46  ;;  %v4765_v31 = vpop.f32.mrf.mxu1  ;;  %v5415_v27 = vmax.f32 %v5413_v53, %v5414_v3  ;;  %v5595_v38 = vsel %vm5549_vm6, %v5401_v58, %v5594_v52 }
 0x5f9   : > { %v4800_v10 = vadd.f32 %v4765_v31, %v4566_v63  ;;  %v5422_v9 = vmax.f32 %v5420_v40, %v5421_v51 }
 0x5fa   : > { %v5596_v49 = vsel %vm5551_vm7, %v5408_v5, %v5595_v38 }
 0x5fb   : > { %v5597_v48 = vsel %vm5553_vm8, %v5415_v27, %v5596_v49  ;;  %v4836_v62 = vadd.f32 %v8664_v4, %v4800_v10 }
 0x5fc   : > { %v5598_v33 = vsel %vm5555_vm9, %v5422_v9, %v5597_v48 }
 0x5fd   : > { %5620 = vst [vmem:[%s8441_s14 + $0x30] sm:$0xff] %v5598_v33  ;;  %v4868_v1 = vmax.f32 %v4836_v62, 0.0 }
 0x5ff   : > { %4900 = vst [vmem:[%s8378_s10 + $0xf0] sm:$0xff] %v4868_v1  ;;  %v4916_v16 = vmax.f32 %v4866_v39, %v4868_v1 }
 0x600   : > { %v4767_v57 = vpop.f32.mrf.mxu1 }
 0x601   : > { %v4976_v59 = vrot.slane %v4916_v16, 2  ;;  %v4977_v14 = vrot.slane %v4916_v16, 4  ;;  %v4978_v60 = vrot.slane %v4916_v16, 6  ;;  %v5423_v18 = vsel %vm5030_vm2, %v4916_v16, -inf }
 0x602   : > { %v5424_v25 = vrot.slane %v5423_v18, 4  ;;  %v4801_v17 = vadd.f32 %v4767_v57, %v4567_v54 }
 0x603   : > { %v5430_v35 = vsel %vm5030_vm2, %v4976_v59, -inf  ;;  %v5437_v34 = vsel %vm5030_vm2, %v4977_v14, -inf  ;;  %v5444_v8 = vsel %vm5030_vm2, %v4978_v60, -inf }
 0x604   : > { %v5425_v56 = vmax.f32 %v5423_v18, %v5424_v25  ;;  %v5431_v7 = vrot.slane %v5430_v35, 4  ;;  %v5438_v45 = vrot.slane %v5437_v34, 4  ;;  %v5445_v44 = vrot.slane %v5444_v8, 4 }
 0x605   : > { %v4837_v29 = vadd.f32 %v8664_v4, %v4801_v17 }
 0x606   : > { %v5426_v37 = vrot.slane %v5425_v56, 2  ;;  %v5432_v11 = vmax.f32 %v5430_v35, %v5431_v7  ;;  %v5439_v15 = vmax.f32 %v5437_v34, %v5438_v45  ;;  %v5446_v6 = vmax.f32 %v5444_v8, %v5445_v44 }
 0x607   : > { %v4869_v0 = vmax.f32 %v4837_v29, 0.0 }
 0x608   : > { %v5427_v24 = vmax.f32 %v5425_v56, %v5426_v37  ;;  %v5433_v23 = vrot.slane %v5432_v11, 2  ;;  %v5440_v32 = vrot.slane %v5439_v15, 2  ;;  %v5447_v22 = vrot.slane %v5446_v6, 2 }
 0x609   : > { %4901 = vst [vmem:[%s8378_s10 + $0xf8] sm:$0xff] %v4869_v0  ;;  %v4917_v39 = vmax.f32 %v4867_v36, %v4869_v0 }
 0x60a   : > { %v5434_v21 = vmax.f32 %v5432_v11, %v5433_v23  ;;  %v5441_v19 = vmax.f32 %v5439_v15, %v5440_v32  ;;  %v5428_v26 = vrot.slane %v5427_v24, 1  ;;  %v5448_v46 = vmax.f32 %v5446_v6, %v5447_v22 }
 0x60b   : > { %v4979_v47 = vrot.slane %v4917_v39, 2  ;;  %v4980_v42 = vrot.slane %v4917_v39, 4  ;;  %v4981_v30 = vrot.slane %v4917_v39, 6  ;;  %v5451_v12 = vsel %vm5030_vm2, %v4917_v39, -inf }
 0x60c   : > { %v5435_v4 = vrot.slane %v5434_v21, 1  ;;  %v5442_v13 = vrot.slane %v5441_v19, 1  ;;  %v5452_v20 = vrot.slane %v5451_v12, 4  ;;  %v5429_v51 = vmax.f32 %v5427_v24, %v5428_v26 }
 0x60d   : > { %v5458_v55 = vsel %vm5030_vm2, %v4979_v47, -inf  ;;  %v5465_v53 = vsel %vm5030_vm2, %v4980_v42, -inf  ;;  %v5472_v40 = vsel %vm5030_vm2, %v4981_v30, -inf  ;;  %v5449_v50 = vrot.slane %v5448_v46, 1 }
 0x60e   : > { %v5436_v2 = vmax.f32 %v5434_v21, %v5435_v4  ;;  %v5459_v36 = vrot.slane %v5458_v55, 4  ;;  %v5453_v63 = vmax.f32 %v5451_v12, %v5452_v20  ;;  %v5466_v58 = vrot.slane %v5465_v53, 4 }
 0x60f   : > { %v5473_v3 = vrot.slane %v5472_v40, 4  ;;  %v5443_v43 = vmax.f32 %v5441_v19, %v5442_v13  ;;  %v5450_v1 = vmax.f32 %v5448_v46, %v5449_v50 }
 0x610   : > { %v5460_v28 = vmax.f32 %v5458_v55, %v5459_v36  ;;  %v5454_v52 = vrot.slane %v5453_v63, 2  ;;  %v5467_v5 = vmax.f32 %v5465_v53, %v5466_v58  ;;  %v5599_v27 = vsel %vm5543_vm3, %v5436_v2, %v5429_v51 }
 0x611   : > { %v5474_v31 = vmax.f32 %v5472_v40, %v5473_v3  ;;  %v5600_v62 = vsel %vm5545_vm4, %v5443_v43, %v5599_v27 }
 0x612   : > { %v5461_v38 = vrot.slane %v5460_v28, 2  ;;  %v5455_v10 = vmax.f32 %v5453_v63, %v5454_v52  ;;  %v5468_v9 = vrot.slane %v5467_v5, 2  ;;  %v5601_v14 = vsel %vm5547_vm5, %v5450_v1, %v5600_v62 }
 0x613   : > { %v5475_v49 = vrot.slane %v5474_v31, 2 }
 0x614   : > { %v5462_v48 = vmax.f32 %v5460_v28, %v5461_v38  ;;  %v5456_v41 = vrot.slane %v5455_v10, 1  ;;  %v5469_v33 = vmax.f32 %v5467_v5, %v5468_v9 }
 0x615   : > { %v5476_v61 = vmax.f32 %v5474_v31, %v5475_v49 }
 0x616   : > { %v5463_v16 = vrot.slane %v5462_v48, 1  ;;  %v5457_v54 = vmax.f32 %v5455_v10, %v5456_v41  ;;  %v5470_v57 = vrot.slane %v5469_v33, 1 }
 0x617   : > { %v5477_v59 = vrot.slane %v5476_v61, 1 }
 0x618   : > { %v5464_v60 = vmax.f32 %v5462_v48, %v5463_v16  ;;  %v5471_v18 = vmax.f32 %v5469_v33, %v5470_v57  ;;  %v5602_v25 = vsel %vm5549_vm6, %v5457_v54, %v5601_v14 }
 0x619   : > { %v5478_v17 = vmax.f32 %v5476_v61, %v5477_v59 }
 0x61a   : > { %v5603_v35 = vsel %vm5551_vm7, %v5464_v60, %v5602_v25 }
 0x61b   : > { %v5604_v34 = vsel %vm5553_vm8, %v5471_v18, %v5603_v35 }
 0x61c   : > { %v5605_v8 = vsel %vm5555_vm9, %v5478_v17, %v5604_v34 }
 0x61d   : > { %5621 = vst [vmem:[%s8441_s14 + $0x38] sm:$0xff] %v5605_v8 }
 0x61e PF: > { %s17_s21 = sadd.s32 1, %s6710_s21  }
 0x61f   : > { %p14_p4 = scmp.ge.s32.totalorder %s17_s21, 4  }
 0x621   :  { %16 = sbr.rel (!%p14_p4) target bundleno = 1 (0x1), region = 102 }

</bundles_post_ra>
